<compile_context>
chip_gen: v7x
topology: tpu7x:2x2x1
jax: 0.10.0
libtpu: 0.0.40
codegen_flags: <defaults>
</compile_context>

<pallas_src>
import functools

import jax
import jax.numpy as jnp
from jax.experimental import pallas as pl
from jax.experimental.pallas import tpu as pltpu

_BIG = 1e30  # >> any representable squared pixel distance, << f32 max


def _round_up(x, m):
    return (x + m - 1) // m * m


def _hausdorff_kernel(flags_ref, i_tbl_ref, j_tbl_ref, j_rhs_ref,
                      out_ref, d2_p, d2_g, *, alpha, n_j, use_mxu):
    # flags_ref : (B, 4) i32 SMEM  [has_fg_pred, has_bg_pred, has_fg_gt, has_bg_gt]
    # i_tbl_ref : (1, ti, 128)     packed i-side table, cols [ri, ci, pred, gt, valid, 0..]
    # j_tbl_ref : (1, 8, tj)  f32  rows [pred_j, gt_j, |pj|^2, pad_pen, rj, cj, 0, 0]
    # j_rhs_ref : (128, tj) bf16   MXU RHS, rows [-2*rj, -2*cj, 0...]   (MXU path only)
    # out_ref   : (1, 1, 8, 128)   lane-dense per-(b, i-chunk) partial sum
    # d2_p/d2_g : (ti, tj) f32     running elementwise minima (VMEM scratch)
    b = pl.program_id(0)
    jj = pl.program_id(2)

    # ---- i-side per-pixel data (sublanes); column loads only, not the full tile
    ri = i_tbl_ref[0, :, 0:1].astype(jnp.float32)            # (ti, 1)
    ci = i_tbl_ref[0, :, 1:2].astype(jnp.float32)
    pred_i = i_tbl_ref[0, :, 2:3].astype(jnp.float32)
    gt_i = i_tbl_ref[0, :, 3:4].astype(jnp.float32)
    pm_i = pred_i > 0.5
    gm_i = gt_i > 0.5

    # ---- j-side chunk data (lanes) ----
    pm_j = j_tbl_ref[0, 0:1, :] > 0.5                        # (1, tj)
    gm_j = j_tbl_ref[0, 1:2, :] > 0.5
    sq_j = j_tbl_ref[0, 2:3, :]
    pad_pen = j_tbl_ref[0, 3:4, :]                           # 0 valid / BIG padded lane

    # Additive penalties selecting the class opposite to pixel i (2-field fold).
    pen_pj_fg = jnp.where(pm_j, 0.0, _BIG) + pad_pen         # targets: predicted fg
    pen_pj_bg = jnp.where(pm_j, _BIG, 0.0) + pad_pen         # targets: predicted bg
    pen_gj_fg = jnp.where(gm_j, 0.0, _BIG) + pad_pen
    pen_gj_bg = jnp.where(gm_j, _BIG, 0.0) + pad_pen
    pen_p = jnp.where(pm_i, pen_pj_bg, pen_pj_fg)            # (ti, tj)
    pen_g = jnp.where(gm_i, pen_gj_bg, pen_gj_fg)

    # ---- pairwise squared distances ----
    if use_mxu:
        # dt2 = |pi|^2 + |pj|^2 - 2 pi.pj; cross term on the MXU (bf16 coords,
        # exact for H, W <= 256; rows/cols >= 2 of the operands are zero).
        sq_i = ri * ri + ci * ci                             # (ti, 1)
        cross = jnp.dot(i_tbl_ref[0], j_rhs_ref[...],
                        preferred_element_type=jnp.float32)  # (ti, tj)
        dt2 = (sq_i + sq_j) + cross
    else:
        rj = j_tbl_ref[0, 4:5, :]
        cj = j_tbl_ref[0, 5:6, :]
        dr = ri - rj
        dc = ci - cj
        dt2 = dr * dr + dc * dc

    v_p = dt2 + pen_p
    v_g = dt2 + pen_g

    # ---- running elementwise minima (no BIG fill: first chunk writes directly)
    @pl.when(jj == 0)
    def _():
        d2_p[...] = v_p
        d2_g[...] = v_g

    @pl.when(jj > 0)
    def _():
        d2_p[...] = jnp.minimum(d2_p[...], v_p)
        d2_g[...] = jnp.minimum(d2_g[...], v_g)

    # ---- epilogue: one cross-lane min per field + per-(b, i-chunk) partial sum
    @pl.when(jj == n_j - 1)
    def _():
        m_p = jnp.min(d2_p[...], axis=1, keepdims=True)      # (ti, 1)
        m_g = jnp.min(d2_g[...], axis=1, keepdims=True)

        has_fg_p = flags_ref[b, 0] > 0
        has_bg_p = flags_ref[b, 1] > 0
        has_fg_g = flags_ref[b, 2] > 0
        has_bg_g = flags_ref[b, 3] > 0

        # field = edt(fg) + edt(bg); zero if the mask has no fg pixel, and the
        # fg part is zero when there is no bg pixel (scipy convention used by
        # the reference).  These gates also squash the 1e30 sentinel.
        ok_p = jnp.logical_and(has_fg_p,
                               jnp.logical_or(jnp.logical_not(pm_i), has_bg_p))
        ok_g = jnp.logical_and(has_fg_g,
                               jnp.logical_or(jnp.logical_not(gm_i), has_bg_g))
        f2_p = jnp.where(ok_p, m_p, 0.0)                     # squared field values
        f2_g = jnp.where(ok_g, m_g, 0.0)

        if alpha == 2.0:
            dist = f2_p + f2_g                               # field**2, no sqrt needed
        else:
            h = 0.5 * float(alpha)
            dist = (jnp.where(f2_p > 0, f2_p ** h, 0.0) +
                    jnp.where(f2_g > 0, f2_g ** h, 0.0))

        err = (pred_i - gt_i) ** 2
        valid_i = i_tbl_ref[0, :, 4:5].astype(jnp.float32) > 0.5
        partial = jnp.sum(jnp.where(valid_i, err * dist, 0.0))
        out_ref[...] = jnp.full(out_ref.shape, partial, jnp.float32)


def hausdorff_dt_loss(logits, ground_truth, alpha=2.0, *,
                      ti_max=1024, tj_max=1024, use_mxu=None):
    """logits: (B, C, H, W); ground_truth: (B, 1, H, W) binary. Returns scalar loss."""
    B, C, H, W = logits.shape
    assert ground_truth.shape == (B, 1, H, W)
    N = H * W

    ti_max = max(16, _round_up(ti_max, 16))
    tj_max = max(128, _round_up(tj_max, 128))
    ti = min(ti_max, _round_up(N, 16))
    tj = min(tj_max, _round_up(N, 128))
    n_pad_i = _round_up(N, ti)
    n_pad_j = _round_up(N, tj)
    n_i = n_pad_i // ti
    n_j = n_pad_j // tj

    if use_mxu is None:
        use_mxu = max(H, W) <= 256       # bf16 pixel coordinates are exact

    # ---- XLA-side precompute: argmax, binarized gt, fg/bg existence flags ----
    xf = logits.reshape(B, C, N).astype(jnp.float32)
    gf = ground_truth.reshape(B, N).astype(jnp.float32)
    pred = jnp.argmax(xf, axis=1).astype(jnp.float32)        # first-max tie-break
    gt = (gf > 0.5).astype(jnp.float32)

    pm = pred > 0.5
    gm = gt > 0.5
    flags = jnp.stack([jnp.any(pm, axis=1), jnp.any(~pm, axis=1),
                       jnp.any(gm, axis=1), jnp.any(~gm, axis=1)],
                      axis=1).astype(jnp.int32)               # (B, 4)

    # ---- packed lane-dense i-side table: cols [ri, ci, pred, gt, valid, 0..] ----
    idx_i = jnp.arange(n_pad_i, dtype=jnp.int32)
    valid_i = (idx_i < N).astype(jnp.float32)
    ri = (idx_i // W).astype(jnp.float32) * valid_i
    ci = (idx_i % W).astype(jnp.float32) * valid_i
    pred_ip = jnp.pad(pred, ((0, 0), (0, n_pad_i - N)))
    gt_ip = jnp.pad(gt, ((0, 0), (0, n_pad_i - N)))
    i_cols = jnp.stack([jnp.broadcast_to(ri, (B, n_pad_i)),
                        jnp.broadcast_to(ci, (B, n_pad_i)),
                        pred_ip, gt_ip,
                        jnp.broadcast_to(valid_i, (B, n_pad_i))],
                       axis=-1)                               # (B, n_pad_i, 5)
    i_dtype = jnp.bfloat16 if use_mxu else jnp.float32
    i_tbl = jnp.pad(i_cols, ((0, 0), (0, 0), (0, 128 - 5))).astype(i_dtype)

    # ---- j-side table (B, 8, n_pad_j): rows [pred, gt, |pj|^2, pad_pen, rj, cj, 0, 0]
    idx_j = jnp.arange(n_pad_j, dtype=jnp.int32)
    valid_j = (idx_j < N).astype(jnp.float32)
    rj = (idx_j // W).astype(jnp.float32) * valid_j
    cj = (idx_j % W).astype(jnp.float32) * valid_j
    sq_j = rj * rj + cj * cj
    pad_pen = (1.0 - valid_j) * _BIG
    zb = jnp.zeros((B, n_pad_j), jnp.float32)
    j_tbl = jnp.stack([jnp.pad(pred, ((0, 0), (0, n_pad_j - N))),
                       jnp.pad(gt, ((0, 0), (0, n_pad_j - N))),
                       jnp.broadcast_to(sq_j, (B, n_pad_j)),
                       jnp.broadcast_to(pad_pen, (B, n_pad_j)),
                       jnp.broadcast_to(rj, (B, n_pad_j)),
                       jnp.broadcast_to(cj, (B, n_pad_j)),
                       zb, zb], axis=1)                       # (B, 8, n_pad_j)

    # ---- MXU RHS (128, n_pad_j) bf16: rows [-2*rj, -2*cj, 0...] ----
    if use_mxu:
        j_rhs = (jnp.zeros((128, n_pad_j), jnp.float32)
                 .at[0].set(-2.0 * rj).at[1].set(-2.0 * cj)).astype(jnp.bfloat16)
        rhs_spec = pl.BlockSpec((128, tj), lambda b, ii, jj, fl: (0, jj))
        rhs_buf_bytes = 128 * tj * 2
    else:
        j_rhs = jnp.zeros((8, 128), jnp.float32)              # unused dummy, fetched once
        rhs_spec = pl.BlockSpec((8, 128), lambda b, ii, jj, fl: (0, 0))
        rhs_buf_bytes = 8 * 128 * 4

    kernel = functools.partial(_hausdorff_kernel, alpha=float(alpha),
                               n_j=n_j, use_mxu=use_mxu)

    # ---- VMEM budget: computed from the actual blocks, capped for v7x (64 MiB)
    itm = 2 if use_mxu else 4
    vmem_bytes = (2 * ti * tj * 4                      # two accumulators
                  + 2 * ti * 128 * itm                 # i-side table (double buffered)
                  + 2 * rhs_buf_bytes                  # MXU RHS / dummy
                  + 2 * 8 * tj * 4                     # j-side table
                  + 2 * 8 * 128 * 4)                   # output block
    vmem_limit = int(min(max(vmem_bytes + (8 << 20), 24 << 20), 56 << 20))

    partials = pl.pallas_call(
        kernel,
        out_shape=jax.ShapeDtypeStruct((B, n_i, 8, 128), jnp.float32),
        grid_spec=pltpu.PrefetchScalarGridSpec(
            num_scalar_prefetch=1,
            grid=(B, n_i, n_j),
            in_specs=[
                pl.BlockSpec((1, ti, 128), lambda b, ii, jj, fl: (b, ii, 0)),
                pl.BlockSpec((1, 8, tj), lambda b, ii, jj, fl: (b, 0, jj)),
                rhs_spec,
            ],
            out_specs=pl.BlockSpec((1, 1, 8, 128),
                                   lambda b, ii, jj, fl: (b, ii, 0, 0)),
            scratch_shapes=[pltpu.VMEM((ti, tj), jnp.float32),
                            pltpu.VMEM((ti, tj), jnp.float32)],
        ),
        compiler_params=pltpu.CompilerParams(
            dimension_semantics=("parallel", "parallel", "arbitrary"),
            vmem_limit_bytes=vmem_limit,
        ),
    )(flags, i_tbl, j_tbl, j_rhs)

    # Per-(b, i-chunk) partial sums -> mean, in f32 to match reference numerics.
    return jnp.sum(partials[:, :, 0, 0]) / jnp.float32(B * N)


def _reference(logits, gt, alpha=2.0):
    """Pure numpy reference (brute-force exact EDT), mirrors the PyTorch module."""
    import numpy as np

    logits = np.asarray(logits, dtype=np.float64)
    gt = np.asarray(gt, dtype=np.float64)
    B, C, H, W = logits.shape
    pred = np.argmax(logits, axis=1)[:, None, :, :].astype(np.float64)  # (B,1,H,W)

    def edt_bruteforce(mask):
        out = np.zeros(mask.shape, dtype=np.float64)
        bg = np.argwhere(~mask)
        if bg.size == 0:
            return out
        ys, xs = np.nonzero(mask)
        for y, x in zip(ys, xs):
            d = np.min((bg[:, 0] - y) ** 2 + (bg[:, 1] - x) ** 2)
            out[y, x] = np.sqrt(d)
        return out

    def field_of(img):
        f = np.zeros_like(img)
        for b in range(B):
            fg = img[b, 0] > 0.5
            if fg.any():
                f[b, 0] = edt_bruteforce(fg) + edt_bruteforce(~fg)
        return f

    pdt = field_of(pred)
    gdt = field_of(gt)
    err = (pred - gt) ** 2
    dist = pdt ** alpha + gdt ** alpha
    return float((err * dist).mean())


if __name__ == "__main__":
    key = jax.random.PRNGKey(0)
    k1, k2 = jax.random.split(key)

    # ---- main case: B=2, C=4, 16x16 ----
    B, C, H, W = 2, 4, 16, 16
    logits = jax.random.normal(k1, (B, C, H, W), dtype=jnp.float32)
    gt = (jax.random.uniform(k2, (B, 1, H, W)) > 0.5).astype(jnp.float32)

    loss = jax.block_until_ready(hausdorff_dt_loss(logits, gt, alpha=2.0))
    ref = _reference(logits, gt, alpha=2.0)
    assert abs(float(loss) - ref) <= 1e-3 * max(1.0, abs(ref)), (float(loss), ref)

    # ---- multi i-/j-chunk path with lane/sublane padding (small tiles forced) ----
    k3, k4 = jax.random.split(k2)
    B2, C2, H2, W2 = 2, 3, 16, 23
    logits2 = jax.random.normal(k3, (B2, C2, H2, W2), dtype=jnp.float32)
    gt2 = (jax.random.uniform(k4, (B2, 1, H2, W2)) > 0.5).astype(jnp.float32)
    loss2 = jax.block_until_ready(
        hausdorff_dt_loss(logits2, gt2, alpha=2.0, ti_max=128, tj_max=128))
    ref2 = _reference(logits2, gt2, alpha=2.0)
    assert abs(float(loss2) - ref2) <= 1e-3 * max(1.0, abs(ref2)), (float(loss2), ref2)

    # ---- pure-VPU f32 fallback path (used for very large images) ----
    loss3 = jax.block_until_ready(
        hausdorff_dt_loss(logits, gt, alpha=2.0, use_mxu=False))
    assert abs(float(loss3) - ref) <= 1e-3 * max(1.0, abs(ref)), (float(loss3), ref)

    print("KERNEL_OK")
</pallas_src>

<mosaic_0001>
module attributes {stable_mosaic.version = 11 : i64} {
  func.func @_hausdorff_kernel(%arg0: i32, %arg1: i32, %arg2: i32, %arg3: memref<2x4xi32, #tpu.memory_space<smem>>, %arg4: memref<1x256x128xbf16, #tpu.memory_space<vmem>>, %arg5: memref<1x8x256xf32, #tpu.memory_space<vmem>>, %arg6: memref<128x256xbf16, #tpu.memory_space<vmem>>, %arg7: memref<1x1x8x128xf32, #tpu.memory_space<vmem>>, %arg8: memref<256x256xf32, #tpu.memory_space<vmem>>, %arg9: memref<256x256xf32, #tpu.memory_space<vmem>>) attributes {dimension_semantics = [#tpu.dimension_semantics<parallel>, #tpu.dimension_semantics<parallel>, #tpu.dimension_semantics<arbitrary>], iteration_bounds = array<i64: 2, 1, 1>, scalar_prefetch = 1 : i64, scratch_operands = 2 : i64, tpu.core_type = #tpu.core_type<tc>, window_params = [{transform_indices = @transform_0, window_bounds = array<i64: 1, 256, 128>}, {transform_indices = @transform_1, window_bounds = array<i64: 1, 8, 256>}, {transform_indices = @transform_2, window_bounds = array<i64: 128, 256>}, {transform_indices = @transform_3, window_bounds = array<i64: 1, 1, 8, 128>}]} {
    %c0 = arith.constant 0 : index
    %c0_0 = arith.constant 0 : index
    %c0_1 = arith.constant 0 : index
    %0 = vector.load %arg4[%c0, %c0_0, %c0_1] : memref<1x256x128xbf16, #tpu.memory_space<vmem>>, vector<1x256x1xbf16>
    %1 = vector.shape_cast %0 : vector<1x256x1xbf16> to vector<256x1xbf16>
    %2 = arith.extf %1 : vector<256x1xbf16> to vector<256x1xf32>
    %c0_2 = arith.constant 0 : index
    %c0_3 = arith.constant 0 : index
    %c1 = arith.constant 1 : index
    %3 = vector.load %arg4[%c0_2, %c0_3, %c1] : memref<1x256x128xbf16, #tpu.memory_space<vmem>>, vector<1x256x1xbf16>
    %4 = vector.shape_cast %3 : vector<1x256x1xbf16> to vector<256x1xbf16>
    %5 = arith.extf %4 : vector<256x1xbf16> to vector<256x1xf32>
    %c0_4 = arith.constant 0 : index
    %c0_5 = arith.constant 0 : index
    %c2 = arith.constant 2 : index
    %6 = vector.load %arg4[%c0_4, %c0_5, %c2] : memref<1x256x128xbf16, #tpu.memory_space<vmem>>, vector<1x256x1xbf16>
    %7 = vector.shape_cast %6 : vector<1x256x1xbf16> to vector<256x1xbf16>
    %8 = arith.extf %7 : vector<256x1xbf16> to vector<256x1xf32>
    %c0_6 = arith.constant 0 : index
    %c0_7 = arith.constant 0 : index
    %c3 = arith.constant 3 : index
    %9 = vector.load %arg4[%c0_6, %c0_7, %c3] : memref<1x256x128xbf16, #tpu.memory_space<vmem>>, vector<1x256x1xbf16>
    %10 = vector.shape_cast %9 : vector<1x256x1xbf16> to vector<256x1xbf16>
    %11 = arith.extf %10 : vector<256x1xbf16> to vector<256x1xf32>
    %cst = arith.constant 5.000000e-01 : f32
    %12 = vector.broadcast %cst : f32 to vector<256x1xf32>
    %13 = arith.cmpf ogt, %8, %12 : vector<256x1xf32>
    %cst_8 = arith.constant 5.000000e-01 : f32
    %14 = vector.broadcast %cst_8 : f32 to vector<256x1xf32>
    %15 = arith.cmpf ogt, %11, %14 : vector<256x1xf32>
    %c0_9 = arith.constant 0 : index
    %c0_10 = arith.constant 0 : index
    %c0_11 = arith.constant 0 : index
    %16 = vector.load %arg5[%c0_9, %c0_10, %c0_11] : memref<1x8x256xf32, #tpu.memory_space<vmem>>, vector<1x1x256xf32>
    %17 = vector.shape_cast %16 : vector<1x1x256xf32> to vector<1x256xf32>
    %cst_12 = arith.constant 5.000000e-01 : f32
    %18 = vector.broadcast %cst_12 : f32 to vector<1x256xf32>
    %19 = arith.cmpf ogt, %17, %18 : vector<1x256xf32>
    %c0_13 = arith.constant 0 : index
    %c1_14 = arith.constant 1 : index
    %c0_15 = arith.constant 0 : index
    %20 = vector.load %arg5[%c0_13, %c1_14, %c0_15] : memref<1x8x256xf32, #tpu.memory_space<vmem>>, vector<1x1x256xf32>
    %21 = vector.shape_cast %20 : vector<1x1x256xf32> to vector<1x256xf32>
    %cst_16 = arith.constant 5.000000e-01 : f32
    %22 = vector.broadcast %cst_16 : f32 to vector<1x256xf32>
    %23 = arith.cmpf ogt, %21, %22 : vector<1x256xf32>
    %c0_17 = arith.constant 0 : index
    %c2_18 = arith.constant 2 : index
    %c0_19 = arith.constant 0 : index
    %24 = vector.load %arg5[%c0_17, %c2_18, %c0_19] : memref<1x8x256xf32, #tpu.memory_space<vmem>>, vector<1x1x256xf32>
    %25 = vector.shape_cast %24 : vector<1x1x256xf32> to vector<1x256xf32>
    %c0_20 = arith.constant 0 : index
    %c3_21 = arith.constant 3 : index
    %c0_22 = arith.constant 0 : index
    %26 = vector.load %arg5[%c0_20, %c3_21, %c0_22] : memref<1x8x256xf32, #tpu.memory_space<vmem>>, vector<1x1x256xf32>
    %27 = vector.shape_cast %26 : vector<1x1x256xf32> to vector<1x256xf32>
    %cst_23 = arith.constant 0.000000e+00 : f32
    %cst_24 = arith.constant 1.000000e+30 : f32
    %28 = vector.broadcast %cst_23 : f32 to vector<1x256xf32>
    %29 = vector.broadcast %cst_24 : f32 to vector<1x256xf32>
    %30 = arith.select %19, %28, %29 : vector<1x256xi1>, vector<1x256xf32>
    %31 = arith.addf %30, %27 : vector<1x256xf32>
    %cst_25 = arith.constant 1.000000e+30 : f32
    %cst_26 = arith.constant 0.000000e+00 : f32
    %32 = vector.broadcast %cst_25 : f32 to vector<1x256xf32>
    %33 = vector.broadcast %cst_26 : f32 to vector<1x256xf32>
    %34 = arith.select %19, %32, %33 : vector<1x256xi1>, vector<1x256xf32>
    %35 = arith.addf %34, %27 : vector<1x256xf32>
    %cst_27 = arith.constant 0.000000e+00 : f32
    %cst_28 = arith.constant 1.000000e+30 : f32
    %36 = vector.broadcast %cst_27 : f32 to vector<1x256xf32>
    %37 = vector.broadcast %cst_28 : f32 to vector<1x256xf32>
    %38 = arith.select %23, %36, %37 : vector<1x256xi1>, vector<1x256xf32>
    %39 = arith.addf %38, %27 : vector<1x256xf32>
    %cst_29 = arith.constant 1.000000e+30 : f32
    %cst_30 = arith.constant 0.000000e+00 : f32
    %40 = vector.broadcast %cst_29 : f32 to vector<1x256xf32>
    %41 = vector.broadcast %cst_30 : f32 to vector<1x256xf32>
    %42 = arith.select %23, %40, %41 : vector<1x256xi1>, vector<1x256xf32>
    %43 = arith.addf %42, %27 : vector<1x256xf32>
    %44 = vector.shape_cast %13 : vector<256x1xi1> to vector<256x1xi1>
    %45 = vector.broadcast %44 : vector<256x1xi1> to vector<256x256xi1>
    %46 = vector.shape_cast %35 : vector<1x256xf32> to vector<1x256xf32>
    %47 = vector.broadcast %46 : vector<1x256xf32> to vector<256x256xf32>
    %48 = vector.shape_cast %31 : vector<1x256xf32> to vector<1x256xf32>
    %49 = vector.broadcast %48 : vector<1x256xf32> to vector<256x256xf32>
    %50 = arith.select %45, %47, %49 : vector<256x256xi1>, vector<256x256xf32>
    %51 = vector.shape_cast %15 : vector<256x1xi1> to vector<256x1xi1>
    %52 = vector.broadcast %51 : vector<256x1xi1> to vector<256x256xi1>
    %53 = vector.shape_cast %43 : vector<1x256xf32> to vector<1x256xf32>
    %54 = vector.broadcast %53 : vector<1x256xf32> to vector<256x256xf32>
    %55 = vector.shape_cast %39 : vector<1x256xf32> to vector<1x256xf32>
    %56 = vector.broadcast %55 : vector<1x256xf32> to vector<256x256xf32>
    %57 = arith.select %52, %54, %56 : vector<256x256xi1>, vector<256x256xf32>
    %58 = arith.mulf %2, %2 : vector<256x1xf32>
    %59 = arith.mulf %5, %5 : vector<256x1xf32>
    %60 = arith.addf %58, %59 : vector<256x1xf32>
    %c0_31 = arith.constant 0 : index
    %c0_32 = arith.constant 0 : index
    %c0_33 = arith.constant 0 : index
    %61 = vector.load %arg4[%c0_31, %c0_32, %c0_33] : memref<1x256x128xbf16, #tpu.memory_space<vmem>>, vector<1x256x128xbf16>
    %62 = vector.shape_cast %61 : vector<1x256x128xbf16> to vector<256x128xbf16>
    %c0_34 = arith.constant 0 : index
    %c0_35 = arith.constant 0 : index
    %63 = vector.load %arg6[%c0_34, %c0_35] : memref<128x256xbf16, #tpu.memory_space<vmem>>, vector<128x256xbf16>
    %cst_36 = arith.constant dense<0.000000e+00> : vector<256x256xf32>
    %64 = tpu.matmul %62, %63, %cst_36 {dimension_numbers = #tpu.dot_dimension_numbers<[1], [0], [0], [1], [0, 0, 1, 1], [], []>} : vector<256x128xbf16>, vector<128x256xbf16>, vector<256x256xf32> -> vector<256x256xf32>
    %65 = vector.broadcast %60 : vector<256x1xf32> to vector<256x256xf32>
    %66 = vector.broadcast %25 : vector<1x256xf32> to vector<256x256xf32>
    %67 = arith.addf %65, %66 : vector<256x256xf32>
    %68 = arith.addf %67, %64 : vector<256x256xf32>
    %69 = arith.addf %68, %50 : vector<256x256xf32>
    %70 = arith.addf %68, %57 : vector<256x256xf32>
    %c0_i32 = arith.constant 0 : i32
    %71 = arith.cmpi eq, %arg2, %c0_i32 : i32
    %72 = arith.extui %71 : i1 to i32
    %c0_i32_37 = arith.constant 0 : i32
    %73 = arith.cmpi ne, %72, %c0_i32_37 : i32
    scf.if %73 {
      %c0_42 = arith.constant 0 : index
      %c0_43 = arith.constant 0 : index
      %80 = vector.load %arg8[%c0_42, %c0_43] : memref<256x256xf32, #tpu.memory_space<vmem>>, vector<256x256xf32>
      tpu.vector_store %arg8[%c0_42, %c0_43], %69 {strides = array<i32>} : memref<256x256xf32, #tpu.memory_space<vmem>>, vector<256x256xf32>,
      %c0_44 = arith.constant 0 : index
      %c0_45 = arith.constant 0 : index
      %81 = vector.load %arg9[%c0_44, %c0_45] : memref<256x256xf32, #tpu.memory_space<vmem>>, vector<256x256xf32>
      tpu.vector_store %arg9[%c0_44, %c0_45], %70 {strides = array<i32>} : memref<256x256xf32, #tpu.memory_space<vmem>>, vector<256x256xf32>,
    } else {
    }
    %c0_i32_38 = arith.constant 0 : i32
    %74 = arith.cmpi sgt, %arg2, %c0_i32_38 : i32
    %75 = arith.extui %74 : i1 to i32
    %c0_i32_39 = arith.constant 0 : i32
    %76 = arith.cmpi ne, %75, %c0_i32_39 : i32
    scf.if %76 {
      %c0_42 = arith.constant 0 : index
      %c0_43 = arith.constant 0 : index
      %80 = vector.load %arg8[%c0_42, %c0_43] : memref<256x256xf32, #tpu.memory_space<vmem>>, vector<256x256xf32>
      %81 = arith.minimumf %80, %69 : vector<256x256xf32>
      %c0_44 = arith.constant 0 : index
      %c0_45 = arith.constant 0 : index
      %82 = vector.load %arg8[%c0_44, %c0_45] : memref<256x256xf32, #tpu.memory_space<vmem>>, vector<256x256xf32>
      tpu.vector_store %arg8[%c0_44, %c0_45], %81 {strides = array<i32>} : memref<256x256xf32, #tpu.memory_space<vmem>>, vector<256x256xf32>,
      %c0_46 = arith.constant 0 : index
      %c0_47 = arith.constant 0 : index
      %83 = vector.load %arg9[%c0_46, %c0_47] : memref<256x256xf32, #tpu.memory_space<vmem>>, vector<256x256xf32>
      %84 = arith.minimumf %83, %70 : vector<256x256xf32>
      %c0_48 = arith.constant 0 : index
      %c0_49 = arith.constant 0 : index
      %85 = vector.load %arg9[%c0_48, %c0_49] : memref<256x256xf32, #tpu.memory_space<vmem>>, vector<256x256xf32>
      tpu.vector_store %arg9[%c0_48, %c0_49], %84 {strides = array<i32>} : memref<256x256xf32, #tpu.memory_space<vmem>>, vector<256x256xf32>,
    } else {
    }
    %c0_i32_40 = arith.constant 0 : i32
    %77 = arith.cmpi eq, %arg2, %c0_i32_40 : i32
    %78 = arith.extui %77 : i1 to i32
    %c0_i32_41 = arith.constant 0 : i32
    %79 = arith.cmpi ne, %78, %c0_i32_41 : i32
    scf.if %79 {
      %c0_42 = arith.constant 0 : index
      %c0_43 = arith.constant 0 : index
      %80 = vector.load %arg8[%c0_42, %c0_43] : memref<256x256xf32, #tpu.memory_space<vmem>>, vector<256x256xf32>
      %cst_44 = arith.constant dense<0x7F800000> : vector<256xf32>
      %81 = vector.multi_reduction <minimumf>, %80, %cst_44 [1] : vector<256x256xf32> to vector<256xf32>
      %82 = vector.shape_cast %81 : vector<256xf32> to vector<256x1xf32>
      %c0_45 = arith.constant 0 : index
      %c0_46 = arith.constant 0 : index
      %83 = vector.load %arg9[%c0_45, %c0_46] : memref<256x256xf32, #tpu.memory_space<vmem>>, vector<256x256xf32>
      %cst_47 = arith.constant dense<0x7F800000> : vector<256xf32>
      %84 = vector.multi_reduction <minimumf>, %83, %cst_47 [1] : vector<256x256xf32> to vector<256xf32>
      %85 = vector.shape_cast %84 : vector<256xf32> to vector<256x1xf32>
      %86 = arith.index_cast %arg0 : i32 to index
      %c0_48 = arith.constant 0 : index
      %87 = memref.load %arg3[%86, %c0_48] : memref<2x4xi32, #tpu.memory_space<smem>>
      %c0_i32_49 = arith.constant 0 : i32
      %88 = arith.cmpi sgt, %87, %c0_i32_49 : i32
      %89 = arith.index_cast %arg0 : i32 to index
      %c1_50 = arith.constant 1 : index
      %90 = memref.load %arg3[%89, %c1_50] : memref<2x4xi32, #tpu.memory_space<smem>>
      %c0_i32_51 = arith.constant 0 : i32
      %91 = arith.cmpi sgt, %90, %c0_i32_51 : i32
      %92 = arith.index_cast %arg0 : i32 to index
      %c2_52 = arith.constant 2 : index
      %93 = memref.load %arg3[%92, %c2_52] : memref<2x4xi32, #tpu.memory_space<smem>>
      %c0_i32_53 = arith.constant 0 : i32
      %94 = arith.cmpi sgt, %93, %c0_i32_53 : i32
      %95 = arith.index_cast %arg0 : i32 to index
      %c3_54 = arith.constant 3 : index
      %96 = memref.load %arg3[%95, %c3_54] : memref<2x4xi32, #tpu.memory_space<smem>>
      %c0_i32_55 = arith.constant 0 : i32
      %97 = arith.cmpi sgt, %96, %c0_i32_55 : i32
      %cst_56 = arith.constant dense<true> : vector<256x1xi1>
      %98 = arith.xori %13, %cst_56 : vector<256x1xi1>
      %99 = vector.broadcast %91 : i1 to vector<256x1xi1>
      %100 = arith.ori %98, %99 : vector<256x1xi1>
      %101 = vector.broadcast %88 : i1 to vector<256x1xi1>
      %102 = arith.andi %101, %100 : vector<256x1xi1>
      %cst_57 = arith.constant dense<true> : vector<256x1xi1>
      %103 = arith.xori %15, %cst_57 : vector<256x1xi1>
      %104 = vector.broadcast %97 : i1 to vector<256x1xi1>
      %105 = arith.ori %103, %104 : vector<256x1xi1>
      %106 = vector.broadcast %94 : i1 to vector<256x1xi1>
      %107 = arith.andi %106, %105 : vector<256x1xi1>
      %cst_58 = arith.constant 0.000000e+00 : f32
      %108 = vector.broadcast %cst_58 : f32 to vector<256x1xf32>
      %109 = arith.select %102, %82, %108 : vector<256x1xi1>, vector<256x1xf32>
      %cst_59 = arith.constant 0.000000e+00 : f32
      %110 = vector.broadcast %cst_59 : f32 to vector<256x1xf32>
      %111 = arith.select %107, %85, %110 : vector<256x1xi1>, vector<256x1xf32>
      %112 = arith.addf %109, %111 : vector<256x1xf32>
      %113 = arith.subf %8, %11 : vector<256x1xf32>
      %114 = arith.mulf %113, %113 : vector<256x1xf32>
      %c0_60 = arith.constant 0 : index
      %c0_61 = arith.constant 0 : index
      %c4 = arith.constant 4 : index
      %115 = vector.load %arg4[%c0_60, %c0_61, %c4] : memref<1x256x128xbf16, #tpu.memory_space<vmem>>, vector<1x256x1xbf16>
      %116 = vector.shape_cast %115 : vector<1x256x1xbf16> to vector<256x1xbf16>
      %117 = arith.extf %116 : vector<256x1xbf16> to vector<256x1xf32>
      %cst_62 = arith.constant 5.000000e-01 : f32
      %118 = vector.broadcast %cst_62 : f32 to vector<256x1xf32>
      %119 = arith.cmpf ogt, %117, %118 : vector<256x1xf32>
      %120 = arith.mulf %114, %112 : vector<256x1xf32>
      %cst_63 = arith.constant 0.000000e+00 : f32
      %121 = vector.broadcast %cst_63 : f32 to vector<256x1xf32>
      %122 = arith.select %119, %120, %121 : vector<256x1xi1>, vector<256x1xf32>
      %123 = vector.shape_cast %122 : vector<256x1xf32> to vector<1x256x1xf32>
      %cst_64 = arith.constant dense<0.000000e+00> : vector<1xf32>
      %124 = vector.multi_reduction <add>, %123, %cst_64 [1, 2] : vector<1x256x1xf32> to vector<1xf32>
      %125 = vector.shape_cast %124 : vector<1xf32> to vector<1x1x1xf32>
      %126 = vector.extract %125[0, 0, 0] : f32 from vector<1x1x1xf32>
      %127 = vector.broadcast %126 : f32 to vector<1x1x8x128xf32>
      %c0_65 = arith.constant 0 : index
      %c0_66 = arith.constant 0 : index
      %c0_67 = arith.constant 0 : index
      %c0_68 = arith.constant 0 : index
      %128 = vector.load %arg7[%c0_65, %c0_66, %c0_67, %c0_68] : memref<1x1x8x128xf32, #tpu.memory_space<vmem>>, vector<1x1x8x128xf32>
      tpu.vector_store %arg7[%c0_65, %c0_66, %c0_67, %c0_68], %127 {strides = array<i32>} : memref<1x1x8x128xf32, #tpu.memory_space<vmem>>, vector<1x1x8x128xf32>,
    } else {
    }
    return
  }
  func.func @transform_0(%arg0: i32, %arg1: i32, %arg2: i32, %arg3: memref<2x4xi32, #tpu.memory_space<smem>>) -> (i32, i32, i32) {
    %c0_i32 = arith.constant 0 : i32
    %c0_i32_0 = arith.constant 0 : i32
    return %arg0, %arg1, %c0_i32 : i32, i32, i32
  }
  func.func @transform_1(%arg0: i32, %arg1: i32, %arg2: i32, %arg3: memref<2x4xi32, #tpu.memory_space<smem>>) -> (i32, i32, i32) {
    %c0_i32 = arith.constant 0 : i32
    %c0_i32_0 = arith.constant 0 : i32
    return %arg0, %c0_i32, %arg2 : i32, i32, i32
  }
  func.func @transform_2(%arg0: i32, %arg1: i32, %arg2: i32, %arg3: memref<2x4xi32, #tpu.memory_space<smem>>) -> (i32, i32) {
    %c0_i32 = arith.constant 0 : i32
    %c0_i32_0 = arith.constant 0 : i32
    return %c0_i32, %arg2 : i32, i32
  }
  func.func @transform_3(%arg0: i32, %arg1: i32, %arg2: i32, %arg3: memref<2x4xi32, #tpu.memory_space<smem>>) -> (i32, i32, i32, i32) {
    %c0_i32 = arith.constant 0 : i32
    %c0_i32_0 = arith.constant 0 : i32
    %c0_i32_1 = arith.constant 0 : i32
    return %arg0, %arg1, %c0_i32, %c0_i32_0 : i32, i32, i32, i32
  }
}

</mosaic_0001>

<bundles_post_ra>
// kernel: tpu_custom_call.1
= control target key start
LH: loop header
LB: loop body
LE: loop exit
PB: predicated region body
PF: predicated region fallthrough
CT: control target
= control target key end

     0   :  { %s8194_s0 = inlined_call_operand.hbm [shape: s32[2,4], index: 0, kind: input, shape index: {}]   ;;  %s8195_s1 = inlined_call_operand.hbm [shape: bf16[2,256,128], index: 1, kind: input, shape index: {}]   ;;  %s8196_s2 = inlined_call_operand.hbm [shape: f32[2,8,256], index: 2, kind: input, shape index: {}]   ;;  %s8197_s3 = inlined_call_operand.hbm [shape: bf16[128,256], index: 3, kind: input, shape index: {}]   ;;  %s8198_s4 = inlined_call_operand.hbm [shape: f32[2,1,8,128], index: 4, kind: output, shape index: {}]  }
   0x1   :  { %8417 = sst [smem:[#allocation229_spill]] %s8195_s1  ;;  %s4324_s17 = scalar_lea.hbm %s8194_s0, 32 }
   0x2   :  { %8418 = sst [smem:[#allocation230_spill]] %s8197_s3  ;;  %p4325_p0 = scmp.ne.s32.totalorder %s8194_s0, %s4324_s17 }
   0x3   :  { %p4328_p1 = scmp.lt.u32.totalorder %s4324_s17, %s8194_s0 }
   0x5   :  { %p4330_p2 = pnand %p4328_p1, %p4325_p0 }
   0x7   :  { %4333 = shalt.err (!%p4330_p2)  }
   0x8   :  { %s4516_s22 = smov [#allocation5]  }
   0x9   :  { %10 = dma.hbm_to_smem %s8194_s0, 32, %s4516_s22, [#allocation4] }
   0xa   :  { %4474 = dma.done.wait [#allocation4], 32 }
   0xb   :  { %4475 = vsyncadd [#allocation4], 4294967264 }
   0xc   :  { %12 = sfence }
   0xd   :  { %13 = vsyncpa [#allocation7], 0 }
   0xe   :  { %15 = vsyncpa [#allocation7 + $0x1], 0 }
   0xf   :  { %16 = vsyncpa [#allocation10], 0 }
  0x10   :  { %18 = vsyncpa [#allocation10 + $0x1], 0 }
  0x11   :  { %19 = vsyncpa [#allocation8], 0 }
  0x12   :  { %21 = vsyncpa [#allocation8 + $0x1], 0  ;;  %s4571_s25 = smov 0   ;;  %s4573_s26 = smov 0  }
  0x13   :  { %s4575_s27 = smov 0   ;;  %s4577_s28 = smov 0  }
  0x14   :  { %s4579_s29 = smov 0   ;;  %s4581_s0 = smov 0  }
  0x15 LB: > { %s4602_s30 = sadd.s32 4294967295, %s4514_s0   ;;  %s3936_s5 = sadd.s32 4294967294, %s4514_s0   ;;  %s4514_s0 = sphi %s4581_s0, %s27_s0   ;;  %s4510_s29 = sphi %s4579_s29, %s9275_s29   ;;  %s4506_s28 = sphi %s4577_s28, %s9274_s28   ;;  %s4502_s27 = sphi %s4575_s27, %s9273_s27   ;;  %s4498_s26 = sphi %s4573_s26, %s9272_s26   ;;  %s4494_s25 = sphi %s4571_s25, %s9271_s25  }
  0x16   : > { %p68_p3 = scmp.ne.s32.totalorder %s4498_s26, %s4494_s25  ;;  %p8199_p4 = scmp.eq.s32.totalorder %s4602_s30, 0 }
  0x17   : > { %p154_p6 = scmp.eq.s32.totalorder %s3936_s5, 1  ;;  %p3937_p8 = scmp.ge.s32.totalorder %s4514_s0, 1 }
  0x18   : > { %p4611_p7 = por %p8199_p4, %p68_p3  ;;  %p161_p10 = scmp.lt.s32.totalorder %s4514_s0, 3 }
  0x19   : > { %p4616_p9 = por %p154_p6, %p68_p3  ;;  %s4517_s9 = smov [#allocation11]  }
  0x1a   : > { %s8419_s6 = scalar_select %p4611_p7, 1, 0 }
  0x1b   : > { %s8420_s7 = scalar_select %p4616_p9, 1, 0 }
  0x1c   : > { %p4621_p11 = pnand %p3937_p8, %p161_p10  ;;  %s176_s10 = sshll.u32 %s4517_s9, 4  ;;  %s177_s10 = int_to_ptr.vmem [resolvable:$true] %s176_s10 }
  0x1d   : > { %s46_s12 = sadd.s32 1, %s4510_s29  ;;  %s8423_s3 = sld [smem:[#allocation230_spill]] }
  0x1e   : > { %s8421_s8 = scalar_select %p4621_p11, 1, 0 }
  0x1f   : > { %p4100_p12 = pneg %p4621_p11 }
  0x21   : > { %p4630_p0 = pnand %p4100_p12, %p8199_p4 }
  0x23   : > { %s4334_s15 = scalar_lea.hbm %s8423_s3, 2048  ;;  %p4336_p2 = pneg %p4630_p0 }
  0x24   : > { %p4335_p1 = scmp.ne.s32.totalorder %s8423_s3, %s4334_s15  ;;  %p4341_p8 = scmp.lt.u32.totalorder %s4334_s15, %s8423_s3 }
  0x26   : > { %p4337_p3 = pnand %p4336_p2, %p4335_p1 }
  0x28   : > { %p4338_p6 = pneg %p4337_p3 }
  0x2a   : > { %p4343_p10 = pnand %p4341_p8, %p4338_p6 }
  0x2c   : > { %4346 = shalt.err (!%p4343_p10)
}
  0x2d   : > { %s4347_s20 = scalar_lea.vmem %s177_s10, 2048  ;;  %p4355_p5 = scmp.lt.s32.totalorder %s177_s10, %s177_s10 }
  0x2e   : > { %p4348_p12 = scmp.ne.s32.totalorder %s177_s10, %s4347_s20  ;;  %p4356_p9 = scmp.lt.s32.totalorder %s4347_s20, %s4347_s20 }
  0x30   : > { %p4350_p13 = pnand %p4348_p12, %p4336_p2  ;;  %p4357_p7 = por %p4356_p9, %p4355_p5 }
  0x32   : > { %p4351_p4 = pneg %p4350_p13 }
  0x34   : > { %p4358_p11 = pnand %p4357_p7, %p4351_p4 }
  0x36   : > { %4361 = shalt.err (!%p4358_p11)
}
  0x37   : > { %s4518_s21 = smov 128   ;;  %s4519_s22 = smov 8  }
  0x38   : > { %4103 = dma.hbm_to_vmem [thread:$0]  (!%p4630_p0), %s8423_s3, 2048, %s177_s10, [#allocation10], %s4518_s21, %s4518_s21, %s4519_s22  }
  0x39   : > { %p48_p4 = scmp.ge.s32.totalorder %s46_s12, 2  ;;  %s55_s5 = sadd.s32 1, %s4502_s27 }
  0x3a   : > { %p62_p5 = scmp.ne.s32.totalorder %s4502_s27, %s4498_s26  ;;  %p63_p7 = scmp.eq.s32.totalorder %s4514_s0, 0 }
  0x3b   : > { %s9277_s12 = smov (%p48_p4, %s46_s12), 0  ;;  %p8426_p11 = scmp.eq.s32.totalorder %s4602_s30, 1 }
  0x3c   : > { %8424 = sst [smem:[#allocation18_spill]] %s9277_s12  ;;  %p4657_p9 = por %p63_p7, %p62_p5 }
  0x3d   : > { %p4663_p13 = por %p8426_p11, %p62_p5  ;;  %s50_s13 = ssub.s32 %s4510_s29, %s9277_s12 }
  0x3e   : > { %p4116_p0 = scmp.lt.s32.totalorder %s4514_s0, 2  ;;  %p53_p1 = scmp.eq.s32.totalorder %s50_s13, 0 }
  0x3f   : > { %s8427_s11 = scalar_select %p4663_p13, 1, 0 }
  0x40   : > { %s4671_s10 = sand.u32 1, %s4502_s27   ;;  %s3991_s16 = sshll.u32 %s4510_s29, 11 }
  0x41   : > { %s3940_s14 = sshll.u32 %s4671_s10, 7  ;;  %s8428_s1 = sld [smem:[#allocation229_spill]] }
  0x42   : > { %s4675_s15 = scalar_select %p53_p1, %s4502_s27, %s55_s5  }
  0x43   : > { %s194_s20 = scalar_lea.vmem [#allocation6], %s3940_s14  ;;  %p4687_p2 = pnand %p4116_p0, %p4657_p9 }
  0x44   : > { %s203_s21 = sshll.u32 %s194_s20, 4  ;;  %s191_s24 = scalar_lea.sflag [#allocation7], %s4671_s10  ;;  %s4683_s21 = int_to_ptr.vmem [resolvable:$true] %s203_s21 }
  0x45   : > { %p4364_p6 = pneg %p4687_p2 }
  0x47   : > { %s4681_s19 = scalar_lea.hbm %s8428_s1, %s3991_s16  ;;  %s4367_s9 = scalar_lea.hbm %s8428_s1, 4096 }
  0x48   : > { %s4362_s5 = scalar_lea.hbm %s4681_s19, 2048  ;;  %p4368_p12 = scmp.lt.u32.totalorder %s4681_s19, %s8428_s1 }
  0x49   : > { %p4363_p3 = scmp.ne.s32.totalorder %s4681_s19, %s4362_s5  ;;  %p4369_p4 = scmp.lt.u32.totalorder %s4367_s9, %s4362_s5 }
  0x4a   : > { %p4371_p7 = scmp.lt.u32.totalorder %s4362_s5, %s4681_s19 }
  0x4b   : > { %p4365_p8 = pnand %p4364_p6, %p4363_p3  ;;  %p4370_p5 = por %p4369_p4, %p4368_p12 }
  0x4d   : > { %p4366_p10 = pneg %p4365_p8  ;;  %p4372_p9 = por %p4371_p7, %p4370_p5 }
  0x4f   : > { %p4373_p11 = pnand %p4372_p9, %p4366_p10 }
  0x51   : > { %4376 = shalt.err (!%p4373_p11)
}
  0x52   : > { %s4377_s18 = scalar_lea.vmem %s4683_s21, 2048  ;;  %s4520_s20 = smov [#allocation6]  }
  0x53   : > { %p4378_p0 = scmp.ne.s32.totalorder %s4683_s21, %s4377_s18  ;;  %s4382_s13 = sshll.u32 %s4520_s20, 4  ;;  %s4383_s13 = int_to_ptr.vmem [resolvable:$false] %s4382_s13 }
  0x54   : > { %s4384_s14 = scalar_lea.vmem %s4383_s13, 4096  ;;  %p4385_p8 = scmp.lt.s32.totalorder %s4683_s21, %s4383_s13 }
  0x55   : > { %p4380_p1 = pnand %p4378_p0, %p4364_p6  ;;  %p4386_p12 = scmp.lt.s32.totalorder %s4384_s14, %s4377_s18 }
  0x57   : > { %p4381_p3 = pneg %p4380_p1  ;;  %p4387_p4 = por %p4386_p12, %p4385_p8 }
  0x59   : > { %p4388_p5 = pnand %p4387_p4, %p4381_p3 }
  0x5b   : > { %4391 = shalt.err (!%p4388_p5)
}
  0x5c   : > { %s4521_s5 = smov 64   ;;  %s4522_s9 = smov 4  }
  0x5d   : > { %4107 = dma.hbm_to_vmem [thread:$0]  (!%p4687_p2), %s4681_s19, 2048, %s4683_s21, %s191_s24, %s4521_s5, %s4521_s5, %s4522_s9  }
  0x5e   : > { %s3943_s16 = sshll.u32 %s4671_s10, 4  ;;  %s3992_s17 = sshll.u32 %s4510_s29, 8 }
  0x5f   : > { %s4725_s13 = scalar_lea.hbm %s8196_s2, %s3992_s17  ;;  %s217_s14 = scalar_lea.vmem [#allocation9], %s3943_s16 }
  0x60   : > { %s227_s23 = sshll.u32 %s217_s14, 4  ;;  %s8430_s1 = sand.u32 1, %s4514_s0   ;;  %s228_s23 = int_to_ptr.vmem [resolvable:$true] %s227_s23 }
  0x61   : > { %s214_s3 = scalar_lea.sflag [#allocation10], %s8430_s1  ;;  %s4392_s12 = scalar_lea.hbm %s4725_s13, 256 }
  0x62   : > { %p4393_p10 = scmp.ne.s32.totalorder %s4725_s13, %s4392_s12  ;;  %s4397_s21 = scalar_lea.hbm %s8196_s2, 512 }
  0x63   : > { %p4398_p11 = scmp.lt.u32.totalorder %s4725_s13, %s8196_s2  ;;  %p4399_p0 = scmp.lt.u32.totalorder %s4397_s21, %s4392_s12 }
  0x64   : > { %p4395_p7 = pnand %p4393_p10, %p4364_p6  ;;  %p4401_p3 = scmp.lt.u32.totalorder %s4392_s12, %s4725_s13 }
  0x65   : > { %p4400_p1 = por %p4399_p0, %p4398_p11 }
  0x66   : > { %p4396_p9 = pneg %p4395_p7 }
  0x67   : > { %p4402_p8 = por %p4401_p3, %p4400_p1 }
  0x69   : > { %p4403_p12 = pnand %p4402_p8, %p4396_p9 }
  0x6b   : > { %4406 = shalt.err (!%p4403_p12)
}
  0x6c   : > { %s4407_s1 = scalar_lea.vmem %s228_s23, 256  ;;  %s4523_s9 = smov [#allocation9]  }
  0x6d   : > { %p4408_p4 = scmp.ne.s32.totalorder %s228_s23, %s4407_s1  ;;  %s4412_s16 = sshll.u32 %s4523_s9, 4  ;;  %s4413_s16 = int_to_ptr.vmem [resolvable:$false] %s4412_s16 }
  0x6e   : > { %s4414_s17 = scalar_lea.vmem %s4413_s16, 512  ;;  %p4415_p7 = scmp.lt.s32.totalorder %s228_s23, %s4413_s16 }
  0x6f   : > { %p4410_p5 = pnand %p4408_p4, %p4364_p6  ;;  %p4416_p13 = scmp.lt.s32.totalorder %s4414_s17, %s4407_s1 }
  0x71   : > { %p4411_p10 = pneg %p4410_p5  ;;  %p4417_p0 = por %p4416_p13, %p4415_p7 }
  0x73   : > { %p4418_p11 = pnand %p4417_p0, %p4411_p10 }
  0x75   : > { %4421 = shalt.err (!%p4418_p11)
}
  0x76   : > { %4110 = dma.hbm_to_vmem [thread:$0]  (!%p4687_p2), %s4725_s13, 256, %s228_s23, %s214_s3  }
  0x77   : > { %p8431_p9 = scmp.ne.s32.totalorder %s8421_s8, 0 }
  0x79   : > { %236 = sbr.rel (%p8431_p9) target bundleno = 1768 (0x6e8), region = 32 }
  0x80   : > { %s4751_s12 = sand.u32 1, %s4498_s26   ;;  %p8432_p13 = scmp.ne.s32.totalorder %s8419_s6, 0 }
  0x81   : > { %s3947_s20 = sshll.u32 %s4751_s12, 7  ;;  %s239_s18 = scalar_lea.sflag [#allocation7], %s4751_s12 }
  0x82   : > { %s4755_s14 = scalar_lea.vmem [#allocation6], %s3947_s20 }
  0x83   : > { %4477 = dma.done.wait (%p8432_p13), %s239_s18, 2048  }
  0x84   : > { %4479 = vsyncadd (%p8432_p13), %s239_s18, 4294965248  ;;  %s247_s3 = sand.u32 1, %s4602_s30   ;;  %s3948_s8 = sshll.u32 %s4751_s12, 4 }
  0x85   : > { %s248_s22 = scalar_lea.sflag [#allocation10], %s247_s3  ;;  %s4763_s23 = scalar_lea.vmem [#allocation9], %s3948_s8 }
  0x86   : > { %4481 = dma.done.wait (%p8432_p13), %s248_s22, 256  }
  0x87   : > { %4483 = vsyncadd (%p8432_p13), %s248_s22, 4294967040  ;;  %p8433_p2 = scmp.eq.s32.totalorder %s4602_s30, 0 }
  0x89   : > { %4485 = dma.done.wait (%p8433_p2), [#allocation10], 2048   ;;  %p8434_p6 = pmov %p8433_p2 }
  0x8a   : > { %v4524_v0 = vmov 2   ;;  %v8218_v1 = vmov 0   ;;  %v4776_v2 = vld [vmem:[%s4755_s14 + $0x8] sm:$0xff]   ;;  %v4779_v3 = vld [vmem:[%s4755_s14] sm:$0xff]   ;;  %v4782_v4 = vld [vmem:[%s4755_s14 + $0x10] sm:$0xff]   ;;  %vm8321_vm8 = vmmov 1  }
  0x8b   : > { %4487 = vsyncadd (%p8434_p6), [#allocation10], 4294965248  ;;  %4183 = vset.pattern.permute.xlu1 %v4524_v0  ;;  %4182 = vset.pattern.permute.xlu0 %v4524_v0  ;;  %v4785_v5 = vunpack.c.l.bf16 %v4776_v2  ;;  %v4788_v6 = vunpack.c.l.bf16 %v4779_v3  ;;  %v4791_v7 = vunpack.c.h.bf16 %v4776_v2  ;;  %v4794_v8 = vunpack.c.h.bf16 %v4779_v3  ;;  %v4817_v13 = vld [vmem:[%s4755_s14 + $0x18] sm:$0xff]   ;;  %v4840_v18 = vld [vmem:[%s4755_s14 + $0x20] sm:$0xff]   ;;  %s4530_s30 = smov 127   ;;  %s6984_s6 = sshll.u32 %s4506_s28, 7 }
  0x8c   : > { %1276 = vmatprep.mubr.bf16.mxu0 %v8218_v1  ;;  %1356 = vmatprep.mubr.bf16.mxu1 %v8218_v1  ;;  %v4797_v9 = vunpack.c.h.bf16 %v4782_v4  ;;  %v4800_v10 = vunpack.c.l.bf16 %v4782_v4  ;;  %v4834_v16 = vunpack.c.h.bf16 %v4817_v13  ;;  %v4837_v17 = vunpack.c.l.bf16 %v4817_v13  ;;  %v4268_v19 = vld [vmem:[#allocation11 + $0x4] ss:$8 sps:$4 sm:$0xff]   ;;  %v4270_v23 = vld [vmem:[#allocation11] ss:$8 sps:$4 sm:$0xff]   ;;  %v4866_v26 = vld [vmem:[%s4755_s14 + $0x30] sm:$0xff]   ;;  %s2716_s13 = sadd.s32 3, %s6984_s6 }
  0x8d   : > { %8435 = vst [vmem:[#allocation19_spill] sm:$0xff] %v4785_v5  ;;  %8436 = vst [vmem:[#allocation20_spill] sm:$0xff] %v4788_v6  ;;  %vm8206_vm0 = vcmp.gt.f32.partialorder %v4785_v5, 0.5  ;;  %vm8208_vm1 = vcmp.gt.f32.partialorder %v4788_v6, 0.5  ;;  %vm8205_vm2 = vcmp.gt.f32.partialorder %v4791_v7, 0.5  ;;  %vm8207_vm3 = vcmp.gt.f32.partialorder %v4794_v8, 0.5  ;;  %1244 = vmatprep.subr.bf16.mxu0 %v4268_v19  ;;  %4072 = vmatprep.subr.bf16.mxu1 %v4268_v19 }
  0x8e   : > { %8437 = vst [vmem:[#allocation21_spill] sm:$0xff] %v4791_v7  ;;  %8438 = vst [vmem:[#allocation22_spill] sm:$0xff] %v4794_v8  ;;  %v4809_v11 = vsel %vm8206_vm0, 1, %v8218_v1  ;;  %v4814_v12 = vsel %vm8208_vm1, 1, %v8218_v1  ;;  %v4824_v14 = vsel %vm8205_vm2, 1, %v8218_v1  ;;  %v4829_v15 = vsel %vm8207_vm3, 1, %v8218_v1  ;;  %1245 = vmatpush1.bf16.msra.mxu0 %v4270_v23  ;;  %4080 = vmatpush1.bf16.msra.mxu1 %v4270_v23 }
  0x8f   : > { %8439 = vst [vmem:[#allocation23_spill] sm:$0xff] %v4797_v9  ;;  %8440 = vst [vmem:[#allocation24_spill] sm:$0xff] %v4800_v10  ;;  %439 = vperm.xlu1 %4183, %v4809_v11   ;;  %433 = vperm.xlu0 %4182, %v4814_v12   ;;  %vm356_vm4 = vcmp.gt.f32.partialorder %v4797_v9, 0.5  ;;  %vm8204_vm5 = vcmp.gt.f32.partialorder %v4800_v10, 0.5  ;;  %v4855_v22 = vld [vmem:[%s4755_s14 + $0x28] sm:$0xff]   ;;  %vm358_vm6 = vcmp.gt.f32.partialorder %v4834_v16, 0.5  ;;  %v4860_v24 = vunpack.c.h.bf16 %v4840_v18 }
  0x90   : > { %8441 = vst [vmem:[#allocation25_spill] sm:$0xff] %v4834_v16  ;;  %8442 = vst [vmem:[#allocation26_spill] sm:$0xff] %v4837_v17  ;;  %v4847_v20 = vsel %vm356_vm4, 1, %v8218_v1  ;;  %v4852_v21 = vsel %vm8204_vm5, 1, %v8218_v1  ;;  %vm357_vm7 = vcmp.gt.f32.partialorder %v4837_v17, 0.5  ;;  %v4863_v25 = vunpack.c.l.bf16 %v4840_v18  ;;  %v4901_v35 = vld [vmem:[%s4755_s14 + $0x38] sm:$0xff]  }
  0x91   : > { %8443 = vst [vmem:[#allocation27_spill] sm:$0xff] %v4860_v24  ;;  %vm4871_vm9 = vmxor %vm356_vm4, %vm8321_vm8  ;;  %v8445_v27 = vmov 0  ;;  %v4271_v28 = vld [vmem:[#allocation11 + $0x14] ss:$8 sps:$4 sm:$0xff]   ;;  %v4878_v29 = vunpack.c.h.bf16 %v4855_v22  ;;  %v4273_v30 = vld [vmem:[#allocation11 + $0x10] ss:$8 sps:$4 sm:$0xff]   ;;  %v4898_v34 = vunpack.c.l.bf16 %v4855_v22  ;;  %v4913_v38 = vunpack.c.h.bf16 %v4866_v26 }
  0x92   : > { %8444 = vst [vmem:[#allocation28_spill] sm:$0xff] %v4863_v25  ;;  %v8446_v27 = vsel %vm4871_vm9, 4294967295, %v8445_v27  ;;  %v4883_v31 = vsel %vm358_vm6, 1, %v8218_v1  ;;  %vm4888_vm10 = vmxor %vm358_vm6, %vm8321_vm8  ;;  %v8449_v32 = vmov 0  ;;  %v4895_v33 = vsel %vm357_vm7, 1, %v8218_v1  ;;  %1246 = vmatprep.subr.bf16.mxu0 %v4271_v28  ;;  %4073 = vmatprep.subr.bf16.mxu1 %v4271_v28  ;;  %v4916_v39 = vld [vmem:[%s4755_s14 + $0x40] sm:$0xff]  }
  0x93   : > { %442 = vperm.xlu1 %4183, %v4824_v14   ;;  %436 = vperm.xlu0 %4182, %v4829_v15   ;;  %8447 = vst [vmem:[#allocation29_spill] sm:$0xff] %v8446_v27  ;;  %8448 = vst [vmem:[#allocation30_spill] sm:$0xff] %v4878_v29  ;;  %v8450_v32 = vsel %vm4888_vm10, 4294967295, %v8449_v32  ;;  %v4274_v36 = vld [vmem:[#allocation11 + $0x24] ss:$8 sps:$4 sm:$0xff]   ;;  %v8453_v37 = vmov 0  ;;  %v4924_v42 = vunpack.c.l.bf16 %v4866_v26  ;;  %v4935_v44 = vunpack.c.h.bf16 %v4901_v35 }
  0x94   : > { %8451 = vst [vmem:[#allocation31_spill] sm:$0xff] %v8450_v32  ;;  %8452 = vst [vmem:[#allocation32_spill] sm:$0xff] %v4898_v34  ;;  %vm360_vm12 = vcmp.gt.f32.partialorder %v4860_v24, 0.5  ;;  %vm359_vm13 = vcmp.gt.f32.partialorder %v4863_v25, 0.5  ;;  %v4276_v40 = vld [vmem:[#allocation11 + $0x20] ss:$8 sps:$4 sm:$0xff]   ;;  %1247 = vmatpush1.bf16.msra.mxu0 %v4273_v30  ;;  %4081 = vmatpush1.bf16.msra.mxu1 %v4273_v30  ;;  %v4953_v49 = vunpack.c.l.bf16 %v4901_v35  ;;  %v4964_v52 = vunpack.c.h.bf16 %v4916_v39 }
  0x95   : > { %vm4906_vm11 = vmxor %vm357_vm7, %vm8321_vm8  ;;  %8456 = vst [vmem:[#allocation34_spill] sm:$0xff] %v4913_v38  ;;  %v8457_v41 = vmov 0  ;;  %v8461_v43 = vmov 0  ;;  %vm362_vm4 = vcmp.gt.f32.partialorder %v4878_v29, 0.5  ;;  %v4938_v45 = vld [vmem:[%s4755_s14 + $0x48] sm:$0xff]   ;;  %v4941_v46 = vsel %vm360_vm12, 1, %v8218_v1  ;;  %1248 = vmatprep.subr.bf16.mxu0 %v4274_v36  ;;  %4074 = vmatprep.subr.bf16.mxu1 %v4274_v36 }
  0x96   : > { %v8454_v37 = vsel %vm4906_vm11, 4294967295, %v8453_v37  ;;  %vm4919_vm14 = vmxor %vm360_vm12, %vm8321_vm8  ;;  %8460 = vst [vmem:[#allocation36_spill] sm:$0xff] %v4924_v42  ;;  %v4944_v47 = vsel %vm359_vm13, 1, %v8218_v1  ;;  %v8465_v48 = vmov 0  ;;  %vm361_vm7 = vcmp.gt.f32.partialorder %v4898_v34, 0.5  ;;  %v4967_v53 = vld [vmem:[%s4755_s14 + $0x50] sm:$0xff]  }
  0x97   : > { %448 = vperm.xlu1 %4183, %v4847_v20   ;;  %445 = vperm.xlu0 %4182, %v4852_v21   ;;  %8455 = vst [vmem:[#allocation33_spill] sm:$0xff] %v8454_v37  ;;  %v8458_v41 = vsel %vm4919_vm14, 4294967295, %v8457_v41  ;;  %vm4929_vm15 = vmxor %vm359_vm13, %vm8321_vm8  ;;  %v4277_v50 = vld [vmem:[#allocation11 + $0x34] ss:$8 sps:$4 sm:$0xff]   ;;  %v8469_v51 = vmov 0  ;;  %vm364_vm13 = vcmp.gt.f32.partialorder %v4913_v38, 0.5  ;;  %v4981_v56 = vunpack.c.l.bf16 %v4916_v39 }
  0x98   : > { %8459 = vst [vmem:[#allocation35_spill] sm:$0xff] %v8458_v41  ;;  %v8462_v43 = vsel %vm4929_vm15, 4294967295, %v8461_v43  ;;  %8464 = vst [vmem:[#allocation38_spill] sm:$0xff] %v4935_v44  ;;  %v4970_v54 = vsel %vm362_vm4, 1, %v8218_v1  ;;  %v8473_v55 = vmov 0  ;;  %vm363_vm2 = vcmp.gt.f32.partialorder %v4924_v42, 0.5  ;;  %1249 = vmatpush1.bf16.msra.mxu0 %v4276_v40  ;;  %4082 = vmatpush1.bf16.msra.mxu1 %v4276_v40 }
  0x99   : > { %8463 = vst [vmem:[#allocation37_spill] sm:$0xff] %v8462_v43  ;;  %vm4947_vm6 = vmxor %vm362_vm4, %vm8321_vm8  ;;  %v4984_v57 = vld [vmem:[%s4755_s14 + $0x58] sm:$0xff]   ;;  %v4991_v59 = vsel %vm361_vm7, 1, %v8218_v1  ;;  %v8477_v60 = vmov 0  ;;  %vm8209_vm0 = vcmp.gt.f32.partialorder %v4935_v44, 0.5  ;;  %v5002_v61 = vunpack.c.h.bf16 %v4938_v45  ;;  %v5016_v0 = vld [vmem:[%s4755_s14 + $0x60] sm:$0xff]   ;;  %1250 = vmatprep.subr.bf16.mxu0 %v4277_v50  ;;  %4075 = vmatprep.subr.bf16.mxu1 %v4277_v50 }
  0x9a   : > { %v8466_v48 = vsel %vm4947_vm6, 4294967295, %v8465_v48  ;;  %8468 = vst [vmem:[#allocation40_spill] sm:$0xff] %v4953_v49  ;;  %vm4958_vm12 = vmxor %vm361_vm7, %vm8321_vm8  ;;  %v4279_v58 = vld [vmem:[#allocation11 + $0x30] ss:$8 sps:$4 sm:$0xff]   ;;  %v5005_v62 = vunpack.c.l.bf16 %v4938_v45  ;;  %v8482_v63 = vmov 0  ;;  %vm8212_vm3 = vcmp.gt.f32.partialorder %v4953_v49, 0.5 }
  0x9b   : > { %454 = vperm.xlu1 %4183, %v4883_v31   ;;  %451 = vperm.xlu0 %4182, %v4895_v33   ;;  %8467 = vst [vmem:[#allocation39_spill] sm:$0xff] %v8466_v48  ;;  %v8470_v51 = vsel %vm4958_vm12, 4294967295, %v8469_v51  ;;  %8472 = vst [vmem:[#allocation42_spill] sm:$0xff] %v4964_v52  ;;  %v383_v19 = vld [vmem:[%s4763_s23] ss:$8 sm:$0x3]  ;;  %v5028_v30 = vunpack.c.h.bf16 %v4967_v53  ;;  %v5079_v48 = vunpack.c.l.bf16 %v4984_v57 }
  0x9c   : > { %8471 = vst [vmem:[#allocation41_spill] sm:$0xff] %v8470_v51  ;;  %vm4975_vm5 = vmxor %vm364_vm13, %vm8321_vm8  ;;  %v4280_v23 = vld [vmem:[#allocation11 + $0x44] ss:$8 sps:$4 sm:$0xff]   ;;  %v8485_v28 = vmov 0  ;;  %v4282_v40 = vld [vmem:[#allocation11 + $0x40] ss:$8 sps:$4 sm:$0xff]   ;;  %1251 = vmatpush1.bf16.msra.mxu0 %v4279_v58  ;;  %4083 = vmatpush1.bf16.msra.mxu1 %v4279_v58 }
  0x9d   : > { %v8474_v55 = vsel %vm4975_vm5, 4294967295, %v8473_v55  ;;  %8476 = vst [vmem:[#allocation44_spill] sm:$0xff] %v4981_v56  ;;  %vm4996_vm4 = vmxor %vm363_vm2, %vm8321_vm8  ;;  %v5031_v36 = vld [vmem:[%s4763_s23 + $0x3] ss:$8 sm:$0x3]  ;;  %v5036_v50 = vsel %vm364_vm13, 1, %v8218_v1  ;;  %1252 = vmatprep.subr.bf16.mxu0 %v4280_v23  ;;  %4076 = vmatprep.subr.bf16.mxu1 %v4280_v23 }
  0x9e   : > { %8475 = vst [vmem:[#allocation43_spill] sm:$0xff] %v8474_v55  ;;  %v8478_v60 = vsel %vm4996_vm4, 4294967295, %v8477_v60  ;;  %8480 = vst [vmem:[#allocation46_spill] sm:$0xff] %v5002_v61  ;;  %v5052_v55 = vunpack.c.l.bf16 %v4967_v53  ;;  %vm8239_vm13 = vcmp.gt.f32.partialorder %v5002_v61, 0.5  ;;  %v8498_v58 = vmov 0  ;;  %v5112_v37 = vld [vmem:[%s4755_s14 + $0x70] sm:$0xff]  }
  0x9f   : > { %460 = vperm.xlu1 %4183, %v4941_v46   ;;  %457 = vperm.xlu0 %4182, %v4944_v47   ;;  %8479 = vst [vmem:[#allocation45_spill] sm:$0xff] %v8478_v60  ;;  %8481 = vst [vmem:[#allocation47_spill] sm:$0xff] %v5005_v62  ;;  %v5069_v60 = vld [vmem:[%s4755_s14 + $0x68] sm:$0xff]   ;;  %v8244_v41 = vmov 0.0   ;;  %v4283_v32 = vld [vmem:[#allocation11 + $0x54] ss:$8 sps:$4 sm:$0xff]   ;;  %v5171_v34 = vunpack.c.l.bf16 %v5112_v37 }
  0xa0   : > { %vm5010_vm7 = vmxor %vm8209_vm0, %vm8321_vm8  ;;  %vm8220_vm0 = vcmp.gt.f32.partialorder %v4964_v52, 0.5  ;;  %8488 = vst [vmem:[#allocation50_spill] sm:$0xff] %v5028_v30  ;;  %v8506_v23 = vmov 0  ;;  %1253 = vmatpush1.bf16.msra.mxu0 %v4282_v40  ;;  %4084 = vmatpush1.bf16.msra.mxu1 %v4282_v40  ;;  %v8514_v27 = vmov 0   ;;  %v5146_v38 = vunpack.c.l.bf16 %v5069_v60  ;;  %v4286_v42 = vld [vmem:[#allocation11 + $0x64] ss:$8 sps:$4 sm:$0xff]  }
  0xa1   : > { %v8483_v63 = vsel %vm5010_vm7, 4294967295, %v8482_v63  ;;  %vm5022_vm1 = vmxor %vm8212_vm3, %vm8321_vm8  ;;  %8489 = vst [vmem:[#allocation51_spill] sm:$0xff] %v5031_v36  ;;  %vm8240_vm7 = vcmp.gt.f32.partialorder %v4981_v56, 0.5  ;;  %1254 = vmatprep.subr.bf16.mxu0 %v4283_v32  ;;  %4077 = vmatprep.subr.bf16.mxu1 %v4283_v32  ;;  %v8525_v29 = vmov 0  ;;  %v8529_v32 = vmov 0  ;;  %s2717_s10 = sld [smem:[#allocation5 + %s2716_s13]]  ;;  %s8147_s13 = scalar_lea.hbm %s8198_s4, %s6984_s6 }
  0xa2   : > { %8484 = vst [vmem:[#allocation48_spill] sm:$0xff] %v8483_v63  ;;  %v8486_v28 = vsel %vm5022_vm1, 4294967295, %v8485_v28  ;;  %v5041_v63 = vsel %vm363_vm2, 1, %v8218_v1  ;;  %vm5046_vm3 = vmxor %vm8220_vm0, %vm8321_vm8  ;;  %v8494_v1 = vmov 0  ;;  %vm8245_vm0 = vcmp.gt.f32.partialorder %v5005_v62, 0.5  ;;  %s2713_s19 = sadd.s32 2, %s6984_s6 }
  0xa3   : > { %8487 = vst [vmem:[#allocation49_spill] sm:$0xff] %v8486_v28  ;;  %v8490_v28 = vmov 0  ;;  %8493 = vst [vmem:[#allocation53_spill] sm:$0xff] %v5052_v55  ;;  %466 = vperm.xlu1 %4183, %v4970_v54   ;;  %463 = vperm.xlu0 %4182, %v4991_v59   ;;  %v8550_v16 = vmov 0  ;;  %s2714_s21 = sld [smem:[#allocation5 + %s2713_s19]]  ;;  %s2710_s28 = sadd.s32 1, %s6984_s6 }
  0xa4   : > { %v8491_v28 = vsel %vm5046_vm3, 4294967295, %v8490_v28  ;;  %vm5059_vm2 = vmxor %vm8240_vm7, %vm8321_vm8  ;;  %vm384_vm3 = vcmp.gt.f32.partialorder %v383_v19, 0.5  ;;  %8501 = vst [vmem:[#allocation57_spill] sm:$0xff] %v5079_v48  ;;  %v8502_v19 = vmov 0  ;;  %vm8250_vm7 = vcmp.gt.f32.partialorder %v5028_v30, 0.5  ;;  %s2711_s1 = sld [smem:[#allocation5 + %s2710_s28]] }
  0xa5   : > { %8492 = vst [vmem:[#allocation52_spill] sm:$0xff] %v8491_v28  ;;  %v8495_v1 = vsel %vm5059_vm2, 4294967295, %v8494_v1  ;;  %v5066_v28 = vunpack.c.h.bf16 %v4984_v57  ;;  %vm5074_vm1 = vmxor %vm8239_vm13, %vm8321_vm8  ;;  %v394_v43 = vsel %vm384_vm3, 1e+30, %v8244_v41  ;;  %s2708_s9 = sld [smem:[#allocation5 + %s6984_s6]]  ;;  %s4531_s20 = smov 2  }
  0xa6   : > { %8496 = vst [vmem:[#allocation54_spill] sm:$0xff] %v8495_v1  ;;  %v8499_v58 = vsel %vm5074_vm1, 4294967295, %v8498_v58  ;;  %v8243_v1 = vmov 1e+30   ;;  %vm5086_vm13 = vmxor %vm8245_vm0, %vm8321_vm8  ;;  %v5098_v41 = vadd.f32 %v5031_v36, %v394_v43  ;;  %vm8260_vm0 = vcmp.gt.f32.partialorder %v5052_v55, 0.5  ;;  %s4532_s18 = smov 124  }
  0xa7   : > { %8497 = vst [vmem:[#allocation55_spill] sm:$0xff] %v5066_v28  ;;  %8500 = vst [vmem:[#allocation56_spill] sm:$0xff] %v8499_v58  ;;  %v392_v51 = vsel %vm384_vm3, 0.0, %v8243_v1  ;;  %v8503_v19 = vsel %vm5086_vm13, 4294967295, %v8502_v19  ;;  %v5092_v58 = vunpack.c.h.bf16 %v5016_v0  ;;  %472 = vperm.xlu1 %4183, %v5036_v50   ;;  %469 = vperm.xlu0 %4182, %v5041_v63   ;;  %v8510_v43 = vmov 0  ;;  %p2718_p1 = scmp.gt.s32.totalorder %s2717_s10, 0 }
  0xa8   : > { %8504 = vst [vmem:[#allocation58_spill] sm:$0xff] %v8503_v19  ;;  %v5095_v1 = vadd.f32 %v5031_v36, %v392_v51  ;;  %vm5103_vm3 = vmxor %vm8250_vm7, %vm8321_vm8  ;;  %v5109_v19 = vunpack.c.l.bf16 %v5016_v0  ;;  %v4285_v51 = vld [vmem:[#allocation11 + $0x50] ss:$8 sps:$4 sm:$0xff]   ;;  %vm8515_vm1 = vcmp.gt.f32.partialorder %v4935_v44, 0.5  ;;  %vm8516_vm13 = vcmp.gt.f32.partialorder %v4953_v49, 0.5  ;;  %s3799_s10 = scalar_lea.sflag [#allocation8], %s4751_s12 }
  0xa9   : > { %8505 = vst [vmem:[#allocation59_spill] sm:$0xff] %v5092_v58  ;;  %v8507_v23 = vsel %vm5103_vm3, 4294967295, %v8506_v23  ;;  %vm5119_vm7 = vmxor %vm8260_vm0, %vm8321_vm8  ;;  %vm8274_vm3 = vcmp.gt.f32.partialorder %v5066_v28, 0.5  ;;  %v5130_v40 = vsel %vm8515_vm1, 1, %v8514_v27  ;;  %v5135_v36 = vsel %vm8516_vm13, 1, %v8514_v27  ;;  %v5149_v44 = vld [vmem:[%s4755_s14 + $0x78] sm:$0xff]   ;;  %1255 = vmatpush1.bf16.msra.mxu0 %v4285_v51  ;;  %4085 = vmatpush1.bf16.msra.mxu1 %v4285_v51 }
  0xaa   : > { %8508 = vst [vmem:[#allocation60_spill] sm:$0xff] %v8507_v23  ;;  %8509 = vst [vmem:[#allocation61_spill] sm:$0xff] %v5109_v19  ;;  %v8511_v43 = vsel %vm5119_vm7, 4294967295, %v8510_v43  ;;  %v5125_v23 = vunpack.c.h.bf16 %v5069_v60  ;;  %vm8282_vm7 = vcmp.gt.f32.partialorder %v5079_v48, 0.5  ;;  %v8521_v49 = vmov 0  ;;  %1256 = vmatprep.subr.bf16.mxu0 %v4286_v42  ;;  %4078 = vmatprep.subr.bf16.mxu1 %v4286_v42  ;;  %p2715_p3 = scmp.gt.s32.totalorder %s2714_s21, 0 }
  0xab   : > { %8512 = vst [vmem:[#allocation62_spill] sm:$0xff] %v8511_v43  ;;  %vm5140_vm0 = vmxor %vm8274_vm3, %vm8321_vm8  ;;  %v8517_v43 = vmov 0  ;;  %vm8283_vm13 = vcmp.gt.f32.partialorder %v5092_v58, 0.5  ;;  %478 = vperm.xlu1 %4183, %v5130_v40   ;;  %475 = vperm.xlu0 %4182, %v5135_v36   ;;  %v5205_v25 = vunpack.c.l.bf16 %v5149_v44  ;;  %v4291_v42 = vld [vmem:[#allocation11 + $0x70] ss:$8 sps:$4 sm:$0xff]   ;;  %p2712_p8 = scmp.gt.s32.totalorder %s2711_s1, 0 }
  0xac   : > { %8513 = vst [vmem:[#allocation63_spill] sm:$0xff] %v5125_v23  ;;  %v8518_v43 = vsel %vm5140_vm0, 4294967295, %v8517_v43  ;;  %8520 = vst [vmem:[#allocation65_spill] sm:$0xff] %v5146_v38  ;;  %vm8290_vm0 = vcmp.gt.f32.partialorder %v5109_v19, 0.5  ;;  %s2821_s24 = scalar_select %p2718_p1, 1, 0 }
  0xad   : > { %8519 = vst [vmem:[#allocation64_spill] sm:$0xff] %v8518_v43  ;;  %vm5154_vm1 = vmxor %vm8282_vm7, %vm8321_vm8  ;;  %v5160_v43 = vunpack.c.h.bf16 %v5112_v37  ;;  %s2856_s5 = scalar_select %p2715_p3, 1, 0 }
  0xae   : > { %v8522_v49 = vsel %vm5154_vm1, 4294967295, %v8521_v49  ;;  %vm5165_vm3 = vmxor %vm8283_vm13, %vm8321_vm8  ;;  %8528 = vst [vmem:[#allocation69_spill] sm:$0xff] %v5171_v34  ;;  %vm8300_vm13 = vcmp.gt.f32.partialorder %v5125_v23, 0.5  ;;  %vm8534_vm1 = vcmp.gt.f32.partialorder %v4981_v56, 0.5  ;;  %v8539_v56 = vmov 0  ;;  %p2709_p12 = scmp.gt.s32.totalorder %s2708_s9, 0 }
  0xaf   : > { %8523 = vst [vmem:[#allocation66_spill] sm:$0xff] %v8522_v49  ;;  %8524 = vst [vmem:[#allocation67_spill] sm:$0xff] %v5160_v43  ;;  %v8526_v29 = vsel %vm5165_vm3, 4294967295, %v8525_v29  ;;  %v4288_v49 = vld [vmem:[#allocation11 + $0x60] ss:$8 sps:$4 sm:$0xff]   ;;  %vm8533_vm3 = vcmp.gt.f32.partialorder %v4964_v52, 0.5 }
  0xb0   : > { %8527 = vst [vmem:[#allocation68_spill] sm:$0xff] %v8526_v29  ;;  %vm5178_vm7 = vmxor %vm8290_vm0, %vm8321_vm8  ;;  %v5184_v29 = vunpack.c.h.bf16 %v5149_v44  ;;  %v5189_v51 = vsel %vm8533_vm3, 1, %v8514_v27  ;;  %v5194_v24 = vsel %vm8534_vm1, 1, %v8514_v27  ;;  %v4289_v52 = vld [vmem:[#allocation11 + $0x74] ss:$8 sps:$4 sm:$0xff]   ;;  %vm8307_vm1 = vcmp.gt.f32.partialorder %v5160_v43, 0.5  ;;  %1257 = vmatpush1.bf16.msra.mxu0 %v4288_v49  ;;  %4086 = vmatpush1.bf16.msra.mxu1 %v4288_v49 }
  0xb1   : > { %v8530_v32 = vsel %vm5178_vm7, 4294967295, %v8529_v32  ;;  %vm5199_vm0 = vmxor %vm8300_vm13, %vm8321_vm8  ;;  %vm8304_vm7 = vcmp.gt.f32.partialorder %v5146_v38, 0.5  ;;  %8538 = vst [vmem:[#allocation73_spill] sm:$0xff] %v5205_v25  ;;  %484 = vperm.xlu1 %4183, %v5189_v51   ;;  %481 = vperm.xlu0 %4182, %v5194_v24   ;;  %s2751_s16 = scalar_select %p2712_p8, 1, 0 }
  0xb2   : > { %8531 = vst [vmem:[#allocation70_spill] sm:$0xff] %v8530_v32  ;;  %8532 = vst [vmem:[#allocation71_spill] sm:$0xff] %v5184_v29  ;;  %v8535_v32 = vmov 0  ;;  %1258 = vmatprep.subr.bf16.mxu0 %v4289_v52  ;;  %4079 = vmatprep.subr.bf16.mxu1 %v4289_v52  ;;  %s2786_s17 = scalar_select %p2709_p12, 1, 0 }
  0xb3   : > { %v8536_v32 = vsel %vm5199_vm0, 4294967295, %v8535_v32  ;;  %vm5210_vm3 = vmxor %vm8304_vm7, %vm8321_vm8  ;;  %vm8315_vm0 = vcmp.gt.f32.partialorder %v5171_v34, 0.5  ;;  %p9267_p5 = scmp.ne.s32.totalorder %s8427_s11, 0  ;;  %s4533_s21 = smov [#allocation12]  }
  0xb4   : > { %8537 = vst [vmem:[#allocation72_spill] sm:$0xff] %v8536_v32  ;;  %v8540_v56 = vsel %vm5210_vm3, 4294967295, %v8539_v56  ;;  %vm5218_vm13 = vmxor %vm8307_vm1, %vm8321_vm8  ;;  %v8542_v32 = vmov 0  ;;  %vm8320_vm1 = vcmp.gt.f32.partialorder %v5184_v29, 0.5  ;;  %vm8549_vm3 = vcmp.gt.f32.partialorder %v5005_v62, 0.5  ;;  %1259 = vmatpush1.bf16.msra.mxu0 %v4291_v42  ;;  %4087 = vmatpush1.bf16.msra.mxu1 %v4291_v42 }
  0xb5   : > { %8541 = vst [vmem:[#allocation74_spill] sm:$0xff] %v8540_v56  ;;  %v8543_v32 = vsel %vm5218_vm13, 4294967295, %v8542_v32  ;;  %vm5228_vm7 = vmxor %vm8315_vm0, %vm8321_vm8  ;;  %v8545_v56 = vmov 0  ;;  %vm8548_vm13 = vcmp.gt.f32.partialorder %v5002_v61, 0.5  ;;  %v5241_v49 = vsel %vm8549_vm3, 1, %v8514_v27 }
  0xb6   : > { %8544 = vst [vmem:[#allocation75_spill] sm:$0xff] %v8543_v32  ;;  %v8546_v56 = vsel %vm5228_vm7, 4294967295, %v8545_v56  ;;  %v5236_v32 = vsel %vm8548_vm13, 1, %v8514_v27  ;;  %vm5246_vm2 = vmxor %vm8320_vm1, %vm8321_vm8  ;;  %vm8325_vm0 = vcmp.gt.f32.partialorder %v5205_v25, 0.5  ;;  %487 = vperm.xlu0 %4182, %v5241_v49   ;;  %vm8556_vm3 = vcmp.gt.f32.partialorder %v5028_v30, 0.5 }
  0xb7   : > { %8547 = vst [vmem:[#allocation76_spill] sm:$0xff] %v8546_v56  ;;  %v8551_v16 = vsel %vm5246_vm2, 4294967295, %v8550_v16  ;;  %vm5254_vm13 = vmxor %vm8325_vm0, %vm8321_vm8  ;;  %v8553_v56 = vmov 0  ;;  %490 = vperm.xlu1 %4183, %v5236_v32   ;;  %vm8557_vm1 = vcmp.gt.f32.partialorder %v5052_v55, 0.5  ;;  %1277 = vmatmul.mubr.bf16.vlgmr.msra.gmra.mrb[0].mxu0 %v4779_v3  ;;  %vm8558_vm8 = vcmp.gt.f32.partialorder %v5066_v28, 0.5 }
  0xb8   : > { %8552 = vst [vmem:[#allocation77_spill] sm:$0xff] %v8551_v16  ;;  %v8554_v56 = vsel %vm5254_vm13, 4294967295, %v8553_v56  ;;  %v5263_v16 = vsel %vm8556_vm3, 1, %v8514_v27  ;;  %v5268_v52 = vsel %vm8557_vm1, 1, %v8514_v27  ;;  %1286 = vmatprep.mubr.bf16.mxu0 %v8514_v27  ;;  %v5277_v42 = vsel %vm8558_vm8, 1, %v8514_v27  ;;  %1357 = vmatmul.mubr.bf16.vlgmr.msra.gmra.mrb[0].mxu1 %v4916_v39 }
  0xb9   : > { %8555 = vst [vmem:[#allocation78_spill] sm:$0xff] %v8554_v56  ;;  %vm8559_vm3 = vcmp.gt.f32.partialorder %v5079_v48, 0.5  ;;  %vm8560_vm1 = vcmp.gt.f32.partialorder %v5092_v58, 0.5  ;;  %vm8561_vm0 = vcmp.gt.f32.partialorder %v5109_v19, 0.5  ;;  %vm8562_vm8 = vcmp.gt.f32.partialorder %v5125_v23, 0.5  ;;  %1366 = vmatprep.mubr.bf16.mxu1 %v8514_v27 }
  0xba   : > { %493 = vperm.xlu0 %4182, %v5268_v52   ;;  %v5282_v56 = vsel %vm8559_vm3, 1, %v8514_v27  ;;  %v5289_v3 = vsel %vm8560_vm1, 1, %v8514_v27  ;;  %v5294_v28 = vsel %vm8561_vm0, 1, %v8514_v27  ;;  %v5303_v48 = vsel %vm8562_vm8, 1, %v8514_v27 }
  0xbb   : > { %496 = vperm.xlu1 %4183, %v5263_v16   ;;  %vm8563_vm3 = vcmp.gt.f32.partialorder %v5146_v38, 0.5  ;;  %vm8564_vm0 = vcmp.gt.f32.partialorder %v5160_v43, 0.5  ;;  %vm8565_vm1 = vcmp.gt.f32.partialorder %v5171_v34, 0.5  ;;  %vm8566_vm8 = vcmp.gt.f32.partialorder %v5184_v29, 0.5 }
  0xbc   : > { %v5308_v58 = vsel %vm8563_vm3, 1, %v8514_v27  ;;  %v5320_v23 = vsel %vm8565_vm1, 1, %v8514_v27  ;;  %v5331_v43 = vsel %vm8566_vm8, 1, %v8514_v27  ;;  %vm8567_vm3 = vcmp.gt.f32.partialorder %v5205_v25, 0.5 }
  0xbd   : > { %v5336_v34 = vsel %vm8567_vm3, 1, %v8514_v27 }
  0xbe   : > { %499 = vperm.xlu0 %4182, %v5282_v56  }
  0xbf   : > { %502 = vperm.xlu1 %4183, %v5277_v42   ;;  %1287 = vmatmul.mubr.bf16.gmra.mrb[4].mxu0 %v4776_v2  ;;  %v5315_v2 = vsel %vm8564_vm0, 1, %v8514_v27 }
  0xc0   : > { %1296 = vmatprep.mubr.bf16.mxu0 %v8514_v27  ;;  %1367 = vmatmul.mubr.bf16.gmra.mrb[4].mxu1 %v4938_v45 }
  0xc1   : > { %1376 = vmatprep.mubr.bf16.mxu1 %v8514_v27 }
  0xc2   : > { %505 = vperm.xlu0 %4182, %v5294_v28  }
  0xc3   : > { %508 = vperm.xlu1 %4183, %v5289_v3  }
  0xc6   : > { %511 = vperm.xlu0 %4182, %v5308_v58  }
  0xc7   : > { %514 = vperm.xlu1 %4183, %v5303_v48   ;;  %1297 = vmatmul.mubr.bf16.gmra.mrb[8].mxu0 %v4782_v4  ;;  %v4529_v4 = vmov 3  }
  0xc8   : > { %1306 = vmatprep.mubr.bf16.mxu0 %v8514_v27  ;;  %1377 = vmatmul.mubr.bf16.gmra.mrb[8].mxu1 %v4967_v53 }
  0xc9   : > { %1386 = vmatprep.mubr.bf16.mxu1 %v8514_v27 }
  0xca   : > { %517 = vperm.xlu0 %4182, %v5320_v23  }
  0xcb   : > { %520 = vperm.xlu1 %4183, %v5315_v2  }
  0xce   : > { %523 = vperm.xlu0 %4182, %v5336_v34  }
  0xcf   : > { %526 = vperm.xlu1 %4183, %v5331_v43   ;;  %1307 = vmatmul.mubr.bf16.gmra.mrb[12].mxu0 %v4817_v13 }
  0xd0   : > { %1316 = vmatprep.mubr.bf16.mxu0 %v8514_v27  ;;  %1387 = vmatmul.mubr.bf16.gmra.mrb[12].mxu1 %v4984_v57 }
  0xd1   : > { %1396 = vmatprep.mubr.bf16.mxu1 %v8514_v27 }
  0xd2   : > { %4184 = vset.pattern.permute.xlu0 %v4529_v4 }
  0xd3   : > { %4185 = vset.pattern.permute.xlu1 %v4529_v4  ;;  %647 = vperm.xlu0 %4184, %v4814_v12  }
  0xd4   : > { %650 = vperm.xlu1 %4185, %v4829_v15  }
  0xd7   : > { %656 = vperm.xlu0 %4184, %v4824_v14   ;;  %1317 = vmatmul.mubr.bf16.gmra.mrb[16].mxu0 %v4840_v18  ;;  %v5406_v18 = vmul.f32 %v4794_v8, %v4794_v8 }
  0xd8   : > { %653 = vperm.xlu1 %4185, %v4809_v11   ;;  %1326 = vmatprep.mubr.bf16.mxu0 %v8514_v27  ;;  %v561_v11 = vlaneseq }
  0xd9   : > { %1397 = vmatmul.mubr.bf16.gmra.mrb[16].mxu1 %v5016_v0  ;;  %v8580_v0 = vld [vmem:[#allocation25_spill] sm:$0xff] }
  0xda   : > { %1406 = vmatprep.mubr.bf16.mxu1 %v8514_v27  ;;  %v562_v12 = vshrl.u32 %v561_v11, 7 }
  0xdb   : > { %662 = vperm.xlu0 %4184, %v4847_v20  }
  0xdc   : > { %659 = vperm.xlu1 %4185, %v4852_v21   ;;  %v5390_v13 = vsub.s32 0, %v562_v12  ;;  %v5394_v14 = vsub.s32 1, %v562_v12 }
  0xde   : > { %v5398_v15 = vrot.slane %v5098_v41, %v5390_v13  ;;  %v5412_v20 = vrot.slane %v5098_v41, %v5394_v14  ;;  %v5416_v21 = vrot.slane %v5095_v1, %v5390_v13 }
  0xdf   : > { %668 = vperm.xlu0 %4184, %v4883_v31   ;;  %1327 = vmatmul.mubr.bf16.gmra.mrb[20].mxu0 %v4855_v22  ;;  %v5420_v22 = vrot.slane %v5095_v1, %v5394_v14  ;;  %v5424_v31 = vmul.f32 %v4785_v5, %v4785_v5  ;;  %v8605_v5 = vld [vmem:[#allocation44_spill] sm:$0xff] }
  0xe0   : > { %665 = vperm.xlu1 %4185, %v4895_v33   ;;  %1336 = vmatprep.mubr.bf16.mxu0 %v8514_v27  ;;  %v5622_v8 = vmul.f32 %v8605_v5, %v8605_v5 }
  0xe1   : > { %1407 = vmatmul.mubr.bf16.gmra.mrb[20].mxu1 %v5069_v60 }
  0xe2   : > { %1416 = vmatprep.mubr.bf16.mxu1 %v8514_v27 }
  0xe3   : > { %674 = vperm.xlu0 %4184, %v4941_v46  }
  0xe4   : > { %671 = vperm.xlu1 %4185, %v4944_v47  }
  0xe7   : > { %680 = vperm.xlu0 %4184, %v4970_v54   ;;  %1337 = vmatmul.mubr.bf16.gmra.mrb[24].mxu0 %v4866_v26 }
  0xe8   : > { %677 = vperm.xlu1 %4185, %v4991_v59   ;;  %1346 = vmatprep.mubr.bf16.mxu0 %v8514_v27 }
  0xe9   : > { %1417 = vmatmul.mubr.bf16.gmra.mrb[24].mxu1 %v5112_v37 }
  0xea   : > { %1426 = vmatprep.mubr.bf16.mxu1 %v8514_v27 }
  0xeb   : > { %686 = vperm.xlu0 %4184, %v5036_v50  }
  0xec   : > { %683 = vperm.xlu1 %4185, %v5041_v63  }
  0xef   : > { %692 = vperm.xlu0 %4184, %v5130_v40   ;;  %1347 = vmatmul.mubr.bf16.gmra.mrb[28].mxu0 %v4901_v35  ;;  %v5444_v35 = vmul.f32 %v4791_v7, %v4791_v7 }
  0xf0   : > { %689 = vperm.xlu1 %4185, %v5135_v36  }
  0xf1   : > { %1427 = vmatmul.mubr.bf16.gmra.mrb[28].mxu1 %v5149_v44  ;;  %v5454_v44 = vmul.f32 %v4800_v10, %v4800_v10 }
  0xf3   : > { %698 = vperm.xlu0 %4184, %v5189_v51  }
  0xf4   : > { %695 = vperm.xlu1 %4185, %v5194_v24  }
  0xf7   : > { %704 = vperm.xlu0 %4184, %v5236_v32  }
  0xf8   : > { %701 = vperm.xlu1 %4185, %v5241_v49   ;;  %v8586_v49 = vld [vmem:[#allocation27_spill] sm:$0xff] }
  0xfb   : > { %710 = vperm.xlu0 %4184, %v5263_v16   ;;  %v5402_v16 = vmul.f32 %v4788_v6, %v4788_v6 }
  0xfc   : > { %707 = vperm.xlu1 %4185, %v5268_v52   ;;  %v5534_v52 = vmul.f32 %v8586_v49, %v8586_v49 }
  0xff   : > { %716 = vperm.xlu0 %4184, %v5277_v42  }
 0x100   : > { %713 = vperm.xlu1 %4185, %v5282_v56   ;;  %v5482_v56 = vmul.f32 %v4837_v17, %v4837_v17 }
 0x103   : > { %722 = vperm.xlu0 %4184, %v5289_v3  }
 0x104   : > { %719 = vperm.xlu1 %4185, %v5294_v28   ;;  %v5506_v28 = vmul.f32 %v8580_v0, %v8580_v0 }
 0x107   : > { %728 = vperm.xlu0 %4184, %v5303_v48   ;;  %v5478_v48 = vmul.f32 %v4797_v9, %v4797_v9 }
 0x108   : > { %725 = vperm.xlu1 %4185, %v5308_v58   ;;  %v8581_v58 = vld [vmem:[#allocation28_spill] sm:$0xff] }
 0x10b   : > { %734 = vperm.xlu0 %4184, %v5315_v2   ;;  %v8587_v2 = vld [vmem:[#allocation32_spill] sm:$0xff] }
 0x10c   : > { %731 = vperm.xlu1 %4185, %v5320_v23   ;;  %v5510_v23 = vmul.f32 %v8581_v58, %v8581_v58  ;;  %v5538_v4 = vmul.f32 %v8587_v2, %v8587_v2  ;;  %v8599_v58 = vld [vmem:[#allocation40_spill] sm:$0xff] }
 0x10d   : > { %v5594_v0 = vmul.f32 %v8599_v58, %v8599_v58 }
 0x10e   : > { %v440_v24 = vpop.permute.xlu1 %439  ;;  %v434_v26 = vpop.permute.xlu0 %433 }
 0x10f   : > { %740 = vperm.xlu0 %4184, %v5331_v43   ;;  %vm530_vm0 = vcmp.eq.s32.totalorder %v440_v24, 1  ;;  %vm528_vm1 = vcmp.eq.s32.totalorder %v434_v26, 1 }
 0x110   : > { %737 = vperm.xlu1 %4185, %v5336_v34   ;;  %v5428_v33 = vsel %vm528_vm1, %v5398_v15, %v5416_v21  ;;  %v5432_v34 = vsel %vm528_vm1, %v5412_v20, %v5420_v22  ;;  %v5440_v1 = vsel %vm530_vm0, %v5398_v15, %v5416_v21  ;;  %v5450_v37 = vsel %vm530_vm0, %v5412_v20, %v5420_v22 }
 0x111   : > { %8568 = vst [vmem:[#allocation79_spill] sm:$0xff] %v5428_v33  ;;  %8569 = vst [vmem:[#allocation80_spill] sm:$0xff] %v5432_v34  ;;  %v8663_v33 = vmov 0.0  }
 0x112   : > { %8570 = vst [vmem:[#allocation81_spill] sm:$0xff] %v5440_v1  ;;  %8571 = vst [vmem:[#allocation82_spill] sm:$0xff] %v5450_v37  ;;  %v443_v39 = vpop.permute.xlu1 %442  ;;  %v437_v41 = vpop.permute.xlu0 %436 }
 0x113   : > { %926 = vrot.lane.b32.xlu0 %v5406_v18, %s4530_s30  ;;  %vm531_vm8 = vcmp.eq.s32.totalorder %v443_v39, 1  ;;  %vm529_vm3 = vcmp.eq.s32.totalorder %v437_v41, 1  ;;  %v8592_v39 = vld [vmem:[#allocation30_spill] sm:$0xff] }
 0x114   : > { %924 = vrot.lane.b32.xlu1 %v5402_v16, %s4530_s30  ;;  %4187 = vset.pattern.permute.xlu0 %v8514_v27  ;;  %v5458_v45 = vsel %vm531_vm8, %v5398_v15, %v5416_v21  ;;  %v5462_v46 = vsel %vm531_vm8, %v5412_v20, %v5420_v22  ;;  %v5470_v47 = vsel %vm529_vm3, %v5412_v20, %v5420_v22 }
 0x115   : > { %4186 = vset.pattern.permute.xlu1 %v8514_v27  ;;  %8572 = vst [vmem:[#allocation83_spill] sm:$0xff] %v5458_v45  ;;  %8573 = vst [vmem:[#allocation84_spill] sm:$0xff] %v5462_v46  ;;  %v5466_v27 = vsel %vm529_vm3, %v5398_v15, %v5416_v21  ;;  %v5562_v41 = vmul.f32 %v8592_v39, %v8592_v39 }
 0x116   : > { %8574 = vst [vmem:[#allocation85_spill] sm:$0xff] %v5466_v27  ;;  %8575 = vst [vmem:[#allocation86_spill] sm:$0xff] %v5470_v47  ;;  %v449_v53 = vpop.permute.xlu1 %448  ;;  %v446_v54 = vpop.permute.xlu0 %445  ;;  %v8662_v27 = vmov 1e+30  }
 0x117   : > { %930 = vrot.lane.b32.xlu0 %v5444_v35, %s4530_s30  ;;  %vm533_vm0 = vcmp.eq.s32.totalorder %v449_v53, 1  ;;  %vm532_vm1 = vcmp.eq.s32.totalorder %v446_v54, 1 }
 0x118   : > { %928 = vrot.lane.b32.xlu1 %v5424_v31, %s4530_s30  ;;  %v5486_v57 = vsel %vm533_vm0, %v5398_v15, %v5416_v21  ;;  %v5490_v59 = vsel %vm533_vm0, %v5412_v20, %v5420_v22  ;;  %v5496_v60 = vsel %vm532_vm1, %v5398_v15, %v5416_v21  ;;  %v5500_v63 = vsel %vm532_vm1, %v5412_v20, %v5420_v22 }
 0x119   : > { %8576 = vst [vmem:[#allocation87_spill] sm:$0xff] %v5486_v57  ;;  %8577 = vst [vmem:[#allocation88_spill] sm:$0xff] %v5490_v59 }
 0x11a   : > { %8578 = vst [vmem:[#allocation89_spill] sm:$0xff] %v5496_v60  ;;  %8579 = vst [vmem:[#allocation90_spill] sm:$0xff] %v5500_v63  ;;  %v455_v36 = vpop.permute.xlu1 %454  ;;  %v452_v50 = vpop.permute.xlu0 %451  ;;  %v3951_v63 = vld [vmem:[%s4763_s23 + $0x1] ss:$8 sm:$0x3] }
 0x11b   : > { %934 = vrot.lane.b32.xlu0 %v5478_v48, %s4530_s30  ;;  %vm535_vm8 = vcmp.eq.s32.totalorder %v455_v36, 1  ;;  %vm534_vm3 = vcmp.eq.s32.totalorder %v452_v50, 1  ;;  %v8593_v36 = vld [vmem:[#allocation36_spill] sm:$0xff] }
 0x11c   : > { %932 = vrot.lane.b32.xlu1 %v5454_v44, %s4530_s30  ;;  %v5514_v43 = vsel %vm535_vm8, %v5398_v15, %v5416_v21  ;;  %v5518_v40 = vsel %vm535_vm8, %v5412_v20, %v5420_v22  ;;  %v5524_v32 = vsel %vm534_vm3, %v5398_v15, %v5416_v21  ;;  %v5528_v51 = vsel %vm534_vm3, %v5412_v20, %v5420_v22 }
 0x11d   : > { %8582 = vst [vmem:[#allocation91_spill] sm:$0xff] %v5514_v43  ;;  %8583 = vst [vmem:[#allocation92_spill] sm:$0xff] %v5518_v40  ;;  %v5566_v50 = vmul.f32 %v8593_v36, %v8593_v36 }
 0x11e   : > { %8584 = vst [vmem:[#allocation93_spill] sm:$0xff] %v5524_v32  ;;  %8585 = vst [vmem:[#allocation94_spill] sm:$0xff] %v5528_v51  ;;  %v461_v42 = vpop.permute.xlu1 %460  ;;  %v458_v3 = vpop.permute.xlu0 %457 }
 0x11f   : > { %938 = vrot.lane.b32.xlu0 %v5506_v28, %s4530_s30  ;;  %vm537_vm0 = vcmp.eq.s32.totalorder %v461_v42, 1  ;;  %vm536_vm1 = vcmp.eq.s32.totalorder %v458_v3, 1 }
 0x120   : > { %936 = vrot.lane.b32.xlu1 %v5482_v56, %s4530_s30  ;;  %v5542_v11 = vsel %vm537_vm0, %v5398_v15, %v5416_v21  ;;  %v5546_v12 = vsel %vm537_vm0, %v5412_v20, %v5420_v22  ;;  %v5552_v24 = vsel %vm536_vm1, %v5398_v15, %v5416_v21  ;;  %v5556_v26 = vsel %vm536_vm1, %v5412_v20, %v5420_v22 }
 0x121   : > { %8588 = vst [vmem:[#allocation95_spill] sm:$0xff] %v5542_v11  ;;  %8589 = vst [vmem:[#allocation96_spill] sm:$0xff] %v5546_v12 }
 0x122   : > { %8590 = vst [vmem:[#allocation97_spill] sm:$0xff] %v5552_v24  ;;  %8591 = vst [vmem:[#allocation98_spill] sm:$0xff] %v5556_v26  ;;  %v467_v53 = vpop.permute.xlu1 %466  ;;  %v464_v54 = vpop.permute.xlu0 %463 }
 0x123   : > { %942 = vrot.lane.b32.xlu0 %v5534_v52, %s4530_s30  ;;  %vm539_vm8 = vcmp.eq.s32.totalorder %v467_v53, 1  ;;  %vm538_vm3 = vcmp.eq.s32.totalorder %v464_v54, 1  ;;  %v8598_v54 = vld [vmem:[#allocation34_spill] sm:$0xff] }
 0x124   : > { %940 = vrot.lane.b32.xlu1 %v5510_v23, %s4530_s30  ;;  %v5570_v42 = vsel %vm539_vm8, %v5398_v15, %v5416_v21  ;;  %v5574_v3 = vsel %vm539_vm8, %v5412_v20, %v5420_v22  ;;  %v5580_v39 = vsel %vm538_vm3, %v5398_v15, %v5416_v21  ;;  %v5584_v53 = vsel %vm538_vm3, %v5412_v20, %v5420_v22 }
 0x125   : > { %8594 = vst [vmem:[#allocation99_spill] sm:$0xff] %v5570_v42  ;;  %8595 = vst [vmem:[#allocation100_spill] sm:$0xff] %v5574_v3  ;;  %v5590_v36 = vmul.f32 %v8598_v54, %v8598_v54  ;;  %v5650_v42 = vmul.f32 %v5005_v62, %v5005_v62 }
 0x126   : > { %8596 = vst [vmem:[#allocation101_spill] sm:$0xff] %v5580_v39  ;;  %8597 = vst [vmem:[#allocation102_spill] sm:$0xff] %v5584_v53  ;;  %v473_v2 = vpop.permute.xlu1 %472  ;;  %v470_v49 = vpop.permute.xlu0 %469 }
 0x127   : > { %946 = vrot.lane.b32.xlu0 %v5562_v41, %s4530_s30  ;;  %vm541_vm0 = vcmp.eq.s32.totalorder %v473_v2, 1  ;;  %vm540_vm1 = vcmp.eq.s32.totalorder %v470_v49, 1  ;;  %v8604_v2 = vld [vmem:[#allocation38_spill] sm:$0xff] }
 0x128   : > { %944 = vrot.lane.b32.xlu1 %v5538_v4, %s4530_s30  ;;  %v5598_v17 = vsel %vm541_vm0, %v5398_v15, %v5416_v21  ;;  %v5602_v9 = vsel %vm541_vm0, %v5412_v20, %v5420_v22  ;;  %v5608_v54 = vsel %vm540_vm1, %v5398_v15, %v5416_v21  ;;  %v5612_v49 = vsel %vm540_vm1, %v5412_v20, %v5420_v22 }
 0x129   : > { %8600 = vst [vmem:[#allocation103_spill] sm:$0xff] %v5598_v17  ;;  %8601 = vst [vmem:[#allocation104_spill] sm:$0xff] %v5602_v9  ;;  %v5618_v58 = vmul.f32 %v8604_v2, %v8604_v2 }
 0x12a   : > { %8602 = vst [vmem:[#allocation105_spill] sm:$0xff] %v5608_v54  ;;  %8603 = vst [vmem:[#allocation106_spill] sm:$0xff] %v5612_v49  ;;  %v479_v10 = vpop.permute.xlu1 %478  ;;  %v476_v7 = vpop.permute.xlu0 %475 }
 0x12b   : > { %950 = vrot.lane.b32.xlu0 %v5590_v36, %s4530_s30  ;;  %vm543_vm8 = vcmp.eq.s32.totalorder %v479_v10, 1  ;;  %vm542_vm3 = vcmp.eq.s32.totalorder %v476_v7, 1  ;;  %v8610_v10 = vld [vmem:[#allocation42_spill] sm:$0xff] }
 0x12c   : > { %948 = vrot.lane.b32.xlu1 %v5566_v50, %s4530_s30  ;;  %v5628_v6 = vsel %vm542_vm3, %v5398_v15, %v5416_v21  ;;  %v5632_v9 = vsel %vm542_vm3, %v5412_v20, %v5420_v22  ;;  %v5636_v2 = vsel %vm543_vm8, %v5398_v15, %v5416_v21  ;;  %v5640_v7 = vsel %vm543_vm8, %v5412_v20, %v5420_v22 }
 0x12d   : > { %8606 = vst [vmem:[#allocation107_spill] sm:$0xff] %v5628_v6  ;;  %8607 = vst [vmem:[#allocation108_spill] sm:$0xff] %v5632_v9  ;;  %v5646_v5 = vmul.f32 %v8610_v10, %v8610_v10 }
 0x12e   : > { %8608 = vst [vmem:[#allocation109_spill] sm:$0xff] %v5636_v2  ;;  %8609 = vst [vmem:[#allocation110_spill] sm:$0xff] %v5640_v7  ;;  %v8635_v7 = vld [vmem:[#allocation69_spill] sm:$0xff]  ;;  %v5818_v2 = vmul.f32 %v5205_v25, %v5205_v25 }
 0x12f   : > { %954 = vrot.lane.b32.xlu0 %v5618_v58, %s4530_s30 }
 0x130   : > { %952 = vrot.lane.b32.xlu1 %v5594_v0, %s4530_s30  ;;  %v485_v17 = vpop.permute.xlu1 %484  ;;  %v482_v3 = vpop.permute.xlu0 %481 }
 0x131   : > { %vm545_vm0 = vcmp.eq.s32.totalorder %v485_v17, 1  ;;  %vm544_vm1 = vcmp.eq.s32.totalorder %v482_v3, 1  ;;  %v5674_v3 = vmul.f32 %v5002_v61, %v5002_v61 }
 0x132   : > { %v5654_v12 = vsel %vm545_vm0, %v5398_v15, %v5416_v21  ;;  %v5658_v11 = vsel %vm545_vm0, %v5412_v20, %v5420_v22  ;;  %v5664_v10 = vsel %vm544_vm1, %v5398_v15, %v5416_v21  ;;  %v5668_v17 = vsel %vm544_vm1, %v5412_v20, %v5420_v22 }
 0x133   : > { %8611 = vst [vmem:[#allocation111_spill] sm:$0xff] %v5654_v12  ;;  %8612 = vst [vmem:[#allocation112_spill] sm:$0xff] %v5658_v11  ;;  %958 = vrot.lane.b32.xlu0 %v5646_v5, %s4530_s30  ;;  %v5678_v12 = vmul.f32 %v5052_v55, %v5052_v55 }
 0x134   : > { %956 = vrot.lane.b32.xlu1 %v5622_v8, %s4530_s30  ;;  %8613 = vst [vmem:[#allocation113_spill] sm:$0xff] %v5664_v10  ;;  %8614 = vst [vmem:[#allocation114_spill] sm:$0xff] %v5668_v17  ;;  %v5762_v17 = vmul.f32 %v5146_v38, %v5146_v38  ;;  %v5790_v10 = vmul.f32 %v8635_v7, %v8635_v7 }
 0x135   : > { %v488_v11 = vpop.permute.xlu0 %487 }
 0x136   : > { %v491_v62 = vpop.permute.xlu1 %490  ;;  %vm546_vm3 = vcmp.eq.s32.totalorder %v488_v11, 1  ;;  %v5702_v11 = vmul.f32 %v5028_v30, %v5028_v30 }
 0x137   : > { %vm547_vm8 = vcmp.eq.s32.totalorder %v491_v62, 1  ;;  %v5692_v61 = vsel %vm546_vm3, %v5398_v15, %v5416_v21  ;;  %v5696_v62 = vsel %vm546_vm3, %v5412_v20, %v5420_v22  ;;  %962 = vrot.lane.b32.xlu0 %v5674_v3, %s4530_s30 }
 0x138   : > { %v5682_v40 = vsel %vm547_vm8, %v5398_v15, %v5416_v21  ;;  %v5686_v43 = vsel %vm547_vm8, %v5412_v20, %v5420_v22  ;;  %960 = vrot.lane.b32.xlu1 %v5650_v42, %s4530_s30  ;;  %8617 = vst [vmem:[#allocation117_spill] sm:$0xff] %v5692_v61  ;;  %8618 = vst [vmem:[#allocation118_spill] sm:$0xff] %v5696_v62  ;;  %v5734_v61 = vmul.f32 %v5109_v19, %v5109_v19 }
 0x139   : > { %8615 = vst [vmem:[#allocation115_spill] sm:$0xff] %v5682_v40  ;;  %8616 = vst [vmem:[#allocation116_spill] sm:$0xff] %v5686_v43  ;;  %v494_v43 = vpop.permute.xlu0 %493  ;;  %v8619_v40 = vld [vmem:[#allocation57_spill] sm:$0xff] }
 0x13a   : > { %v497_v55 = vpop.permute.xlu1 %496  ;;  %vm548_vm1 = vcmp.eq.s32.totalorder %v494_v43, 1  ;;  %v5706_v59 = vmul.f32 %v8619_v40, %v8619_v40  ;;  %v8624_v43 = vld [vmem:[#allocation55_spill] sm:$0xff] }
 0x13b   : > { %vm549_vm0 = vcmp.eq.s32.totalorder %v497_v55, 1  ;;  %v5720_v30 = vsel %vm548_vm1, %v5398_v15, %v5416_v21  ;;  %v5724_v55 = vsel %vm548_vm1, %v5412_v20, %v5420_v22  ;;  %966 = vrot.lane.b32.xlu0 %v5702_v11, %s4530_s30  ;;  %v5730_v40 = vmul.f32 %v8624_v43, %v8624_v43 }
 0x13c   : > { %v5710_v57 = vsel %vm549_vm0, %v5398_v15, %v5416_v21  ;;  %v5714_v62 = vsel %vm549_vm0, %v5412_v20, %v5420_v22  ;;  %964 = vrot.lane.b32.xlu1 %v5678_v12, %s4530_s30  ;;  %8622 = vst [vmem:[#allocation121_spill] sm:$0xff] %v5720_v30  ;;  %8623 = vst [vmem:[#allocation122_spill] sm:$0xff] %v5724_v55 }
 0x13d   : > { %8620 = vst [vmem:[#allocation119_spill] sm:$0xff] %v5710_v57  ;;  %8621 = vst [vmem:[#allocation120_spill] sm:$0xff] %v5714_v62  ;;  %v500_v62 = vpop.permute.xlu0 %499 }
 0x13e   : > { %v503_v57 = vpop.permute.xlu1 %502  ;;  %vm550_vm3 = vcmp.eq.s32.totalorder %v500_v62, 1  ;;  %v8629_v62 = vld [vmem:[#allocation59_spill] sm:$0xff] }
 0x13f   : > { %vm551_vm8 = vcmp.eq.s32.totalorder %v503_v57, 1  ;;  %v5748_v43 = vsel %vm550_vm3, %v5398_v15, %v5416_v21  ;;  %v5752_v57 = vsel %vm550_vm3, %v5412_v20, %v5420_v22  ;;  %970 = vrot.lane.b32.xlu0 %v5730_v40, %s4530_s30  ;;  %v5758_v19 = vmul.f32 %v8629_v62, %v8629_v62 }
 0x140   : > { %v5738_v30 = vsel %vm551_vm8, %v5398_v15, %v5416_v21  ;;  %v5742_v55 = vsel %vm551_vm8, %v5412_v20, %v5420_v22  ;;  %968 = vrot.lane.b32.xlu1 %v5706_v59, %s4530_s30  ;;  %8627 = vst [vmem:[#allocation125_spill] sm:$0xff] %v5748_v43  ;;  %8628 = vst [vmem:[#allocation126_spill] sm:$0xff] %v5752_v57 }
 0x141   : > { %8625 = vst [vmem:[#allocation123_spill] sm:$0xff] %v5738_v30  ;;  %8626 = vst [vmem:[#allocation124_spill] sm:$0xff] %v5742_v55  ;;  %v506_v55 = vpop.permute.xlu0 %505 }
 0x142   : > { %v509_v30 = vpop.permute.xlu1 %508  ;;  %vm552_vm1 = vcmp.eq.s32.totalorder %v506_v55, 1  ;;  %v8634_v55 = vld [vmem:[#allocation63_spill] sm:$0xff] }
 0x143   : > { %vm553_vm0 = vcmp.eq.s32.totalorder %v509_v30, 1  ;;  %v5776_v62 = vsel %vm552_vm1, %v5398_v15, %v5416_v21  ;;  %v5780_v30 = vsel %vm552_vm1, %v5412_v20, %v5420_v22  ;;  %974 = vrot.lane.b32.xlu0 %v5758_v19, %s4530_s30  ;;  %v5786_v38 = vmul.f32 %v8634_v55, %v8634_v55 }
 0x144   : > { %v5766_v43 = vsel %vm553_vm0, %v5398_v15, %v5416_v21  ;;  %v5770_v57 = vsel %vm553_vm0, %v5412_v20, %v5420_v22  ;;  %972 = vrot.lane.b32.xlu1 %v5734_v61, %s4530_s30  ;;  %8632 = vst [vmem:[#allocation129_spill] sm:$0xff] %v5776_v62  ;;  %8633 = vst [vmem:[#allocation130_spill] sm:$0xff] %v5780_v30 }
 0x145   : > { %8630 = vst [vmem:[#allocation127_spill] sm:$0xff] %v5766_v43  ;;  %8631 = vst [vmem:[#allocation128_spill] sm:$0xff] %v5770_v57  ;;  %v512_v57 = vpop.permute.xlu0 %511 }
 0x146   : > { %v515_v43 = vpop.permute.xlu1 %514  ;;  %vm554_vm3 = vcmp.eq.s32.totalorder %v512_v57, 1  ;;  %v8640_v57 = vld [vmem:[#allocation67_spill] sm:$0xff] }
 0x147   : > { %vm555_vm8 = vcmp.eq.s32.totalorder %v515_v43, 1  ;;  %v5804_v55 = vsel %vm554_vm3, %v5398_v15, %v5416_v21  ;;  %v5808_v43 = vsel %vm554_vm3, %v5412_v20, %v5420_v22  ;;  %978 = vrot.lane.b32.xlu0 %v5786_v38, %s4530_s30  ;;  %v5814_v7 = vmul.f32 %v8640_v57, %v8640_v57 }
 0x148   : > { %v5794_v62 = vsel %vm555_vm8, %v5398_v15, %v5416_v21  ;;  %v5798_v30 = vsel %vm555_vm8, %v5412_v20, %v5420_v22  ;;  %976 = vrot.lane.b32.xlu1 %v5762_v17, %s4530_s30  ;;  %8638 = vst [vmem:[#allocation133_spill] sm:$0xff] %v5804_v55  ;;  %8639 = vst [vmem:[#allocation134_spill] sm:$0xff] %v5808_v43 }
 0x149   : > { %8636 = vst [vmem:[#allocation131_spill] sm:$0xff] %v5794_v62  ;;  %8637 = vst [vmem:[#allocation132_spill] sm:$0xff] %v5798_v30  ;;  %v518_v30 = vpop.permute.xlu0 %517 }
 0x14a   : > { %v521_v62 = vpop.permute.xlu1 %520  ;;  %vm556_vm1 = vcmp.eq.s32.totalorder %v518_v30, 1  ;;  %v5842_v30 = vmul.f32 %v5184_v29, %v5184_v29 }
 0x14b   : > { %vm557_vm0 = vcmp.eq.s32.totalorder %v521_v62, 1  ;;  %v5832_v57 = vsel %vm556_vm1, %v5398_v15, %v5416_v21  ;;  %v5836_v62 = vsel %vm556_vm1, %v5412_v20, %v5420_v22  ;;  %982 = vrot.lane.b32.xlu0 %v5814_v7, %s4530_s30 }
 0x14c   : > { %v5822_v55 = vsel %vm557_vm0, %v5398_v15, %v5416_v21  ;;  %v5826_v43 = vsel %vm557_vm0, %v5412_v20, %v5420_v22  ;;  %980 = vrot.lane.b32.xlu1 %v5790_v10, %s4530_s30  ;;  %8643 = vst [vmem:[#allocation137_spill] sm:$0xff] %v5832_v57  ;;  %8644 = vst [vmem:[#allocation138_spill] sm:$0xff] %v5836_v62  ;;  %vm387_vm0 = vcmp.gt.f32.partialorder %v3951_v63, 0.5 }
 0x14d   : > { %8641 = vst [vmem:[#allocation135_spill] sm:$0xff] %v5822_v55  ;;  %8642 = vst [vmem:[#allocation136_spill] sm:$0xff] %v5826_v43  ;;  %v524_v43 = vpop.permute.xlu0 %523  ;;  %v396_v34 = vsel %vm387_vm0, 0.0, %v8662_v27 }
 0x14e   : > { %v527_v25 = vpop.permute.xlu1 %526  ;;  %vm558_vm3 = vcmp.eq.s32.totalorder %v524_v43, 1 }
 0x14f   : > { %vm559_vm8 = vcmp.eq.s32.totalorder %v527_v25, 1  ;;  %v5848_v55 = vsel %vm558_vm3, %v5398_v15, %v5416_v21  ;;  %v5852_v62 = vsel %vm558_vm3, %v5412_v20, %v5420_v22  ;;  %986 = vrot.lane.b32.xlu0 %v5842_v30, %s4530_s30 }
 0x150   : > { %984 = vrot.lane.b32.xlu1 %v5818_v2, %s4530_s30  ;;  %8645 = vst [vmem:[#allocation139_spill] sm:$0xff] %v5848_v55  ;;  %8646 = vst [vmem:[#allocation140_spill] sm:$0xff] %v5852_v62  ;;  %v5856_v57 = vsel %vm559_vm8, %v5398_v15, %v5416_v21  ;;  %v5860_v29 = vsel %vm559_vm8, %v5412_v20, %v5420_v22 }
 0x151   : > { %8647 = vst [vmem:[#allocation141_spill] sm:$0xff] %v5856_v57  ;;  %8648 = vst [vmem:[#allocation142_spill] sm:$0xff] %v5860_v29 }
 0x152   : > { %v5866_v43 = vpop.permute.xlu0 %647 }
 0x153   : > { %v5864_v25 = vpop.permute.xlu1 %650 }
 0x156   : > { %v5870_v9 = vpop.permute.xlu0 %656 }
 0x157   : > { %v5868_v55 = vpop.permute.xlu1 %653 }
 0x15a   : > { %v5874_v6 = vpop.permute.xlu0 %662 }
 0x15b   : > { %v5872_v62 = vpop.permute.xlu1 %659  ;;  %vm747_vm13 = vcmp.eq.s32.totalorder %v5874_v6, 1 }
 0x15c   : > { %vm8721_vm7 = vcmp.eq.s32.totalorder %v5872_v62, 1 }
 0x15e   : > { %v5878_v20 = vpop.permute.xlu0 %668 }
 0x15f   : > { %v5876_v15 = vpop.permute.xlu1 %665 }
 0x162   : > { %v5882_v22 = vpop.permute.xlu0 %674 }
 0x163   : > { %v5880_v21 = vpop.permute.xlu1 %671  ;;  %vm751_vm2 = vcmp.eq.s32.totalorder %v5882_v22, 1 }
 0x166   : > { %v5886_v57 = vpop.permute.xlu0 %680 }
 0x167   : > { %v5884_v29 = vpop.permute.xlu1 %677 }
 0x16a   : > { %v5890_v54 = vpop.permute.xlu0 %686 }
 0x16b   : > { %v5888_v49 = vpop.permute.xlu1 %683  ;;  %8649 = vst [vmem:[#allocation143_spill] sm:$0xff] %v5890_v54 }
 0x16e   : > { %v5894_v39 = vpop.permute.xlu0 %692 }
 0x16f   : > { %v5892_v53 = vpop.permute.xlu1 %689  ;;  %8651 = vst [vmem:[#allocation145_spill] sm:$0xff] %v5894_v39 }
 0x170   : > { %8650 = vst [vmem:[#allocation144_spill] sm:$0xff] %v5892_v53 }
 0x172   : > { %v5898_v24 = vpop.permute.xlu0 %698  ;;  %v8725_v62 = vld [vmem:[#allocation143_spill] sm:$0xff] }
 0x173   : > { %v5896_v26 = vpop.permute.xlu1 %695  ;;  %8653 = vst [vmem:[#allocation147_spill] sm:$0xff] %v5898_v24 }
 0x174   : > { %8652 = vst [vmem:[#allocation146_spill] sm:$0xff] %v5896_v26  ;;  %v8664_v26 = vld [vmem:[#allocation51_spill] sm:$0xff] }
 0x176   : > { %v5902_v51 = vpop.permute.xlu0 %704 }
 0x177   : > { %v5900_v46 = vpop.permute.xlu1 %701  ;;  %8655 = vst [vmem:[#allocation149_spill] sm:$0xff] %v5902_v51  ;;  %v397_v51 = vadd.f32 %v8664_v26, %v396_v34 }
 0x178   : > { %8654 = vst [vmem:[#allocation148_spill] sm:$0xff] %v5900_v46  ;;  %v398_v46 = vsel %vm387_vm0, 1e+30, %v8663_v33  ;;  %vm743_vm0 = vcmp.eq.s32.totalorder %v5864_v25, 1 }
 0x179   : > { %v5935_v27 = vrot.slane %v397_v51, %v5394_v14 }
 0x17a   : > { %v5906_v45 = vpop.permute.xlu0 %710 }
 0x17b   : > { %v5904_v32 = vpop.permute.xlu1 %707  ;;  %8657 = vst [vmem:[#allocation151_spill] sm:$0xff] %v5906_v45 }
 0x17c   : > { %8656 = vst [vmem:[#allocation150_spill] sm:$0xff] %v5904_v32  ;;  %v399_v32 = vadd.f32 %v8664_v26, %v398_v46 }
 0x17e   : > { %v5911_v37 = vpop.permute.xlu0 %716  ;;  %v5929_v63 = vrot.slane %v399_v32, %v5394_v14 }
 0x17f   : > { %v5909_v60 = vpop.permute.xlu1 %713  ;;  %8659 = vst [vmem:[#allocation153_spill] sm:$0xff] %v5911_v37 }
 0x180   : > { %8658 = vst [vmem:[#allocation152_spill] sm:$0xff] %v5909_v60  ;;  %v5926_v60 = vrot.slane %v399_v32, %v5390_v13 }
 0x182   : > { %v5915_v47 = vpop.permute.xlu0 %722 }
 0x183   : > { %v5913_v1 = vpop.permute.xlu1 %719  ;;  %8661 = vst [vmem:[#allocation155_spill] sm:$0xff] %v5915_v47 }
 0x184   : > { %8660 = vst [vmem:[#allocation154_spill] sm:$0xff] %v5913_v1  ;;  %v5932_v1 = vrot.slane %v397_v51, %v5390_v13 }
 0x186   : > { %v5923_v45 = vpop.permute.xlu0 %728 }
 0x187   : > { %v5921_v24 = vpop.permute.xlu1 %725  ;;  %8666 = vst [vmem:[#allocation156_spill] sm:$0xff] %v5923_v45 }
 0x188   : > { %8665 = vst [vmem:[#allocation51_spill] sm:$0xff] %v5921_v24 }
 0x18a   : > { %v735_v34 = vpop.permute.xlu0 %734  ;;  %v5939_v46 = vpop.f32.mrb[0].mxu0 }
 0x18b   : > { %v5937_v33 = vpop.permute.xlu1 %731  ;;  %vm771_vm1 = vcmp.eq.s32.totalorder %v735_v34, 1  ;;  %8668 = vst [vmem:[#allocation158_spill] sm:$0xff] %v5939_v46  ;;  %v5949_v24 = vpop.f32.mrb[1].mxu0 }
 0x18c   : > { %8667 = vst [vmem:[#allocation157_spill] sm:$0xff] %v5937_v33  ;;  %v5943_v26 = vsel %vm771_vm1, %v5926_v60, %v5932_v1  ;;  %v5947_v32 = vsel %vm771_vm1, %v5929_v63, %v5935_v27  ;;  %8671 = vst [vmem:[#allocation161_spill] sm:$0xff] %v5949_v24  ;;  %v5951_v45 = vpop.f32.mrb[2].mxu0  ;;  %vm742_vm1 = vcmp.eq.s32.totalorder %v5866_v43, 1 }
 0x18d   : > { %8669 = vst [vmem:[#allocation159_spill] sm:$0xff] %v5943_v26  ;;  %8670 = vst [vmem:[#allocation160_spill] sm:$0xff] %v5947_v32  ;;  %v5953_v33 = vpop.f32.mrb[3].mxu0  ;;  %v6142_v25 = vsel %vm742_vm1, %v5929_v63, %v5935_v27 }
 0x18e   : > { %8672 = vst [vmem:[#allocation162_spill] sm:$0xff] %v5951_v45  ;;  %v741_v47 = vpop.permute.xlu0 %740  ;;  %8673 = vst [vmem:[#allocation163_spill] sm:$0xff] %v5953_v33 }
 0x18f   : > { %v738_v51 = vpop.permute.xlu1 %737  ;;  %vm773_vm3 = vcmp.eq.s32.totalorder %v741_v47, 1 }
 0x190   : > { %vm772_vm8 = vcmp.eq.s32.totalorder %v738_v51, 1  ;;  %v5965_v32 = vsel %vm773_vm3, %v5926_v60, %v5932_v1  ;;  %v5969_v45 = vsel %vm773_vm3, %v5929_v63, %v5935_v27  ;;  %vm744_vm3 = vcmp.eq.s32.totalorder %v5868_v55, 1 }
 0x191   : > { %v5957_v34 = vsel %vm772_vm8, %v5926_v60, %v5932_v1  ;;  %v5961_v26 = vsel %vm772_vm8, %v5929_v63, %v5935_v27  ;;  %8676 = vst [vmem:[#allocation166_spill] sm:$0xff] %v5965_v32  ;;  %8677 = vst [vmem:[#allocation167_spill] sm:$0xff] %v5969_v45  ;;  %vm745_vm8 = vcmp.eq.s32.totalorder %v5870_v9, 1  ;;  %v6165_v6 = vsel %vm744_vm3, %v5926_v60, %v5932_v1 }
 0x192   : > { %8674 = vst [vmem:[#allocation164_spill] sm:$0xff] %v5957_v34  ;;  %8675 = vst [vmem:[#allocation165_spill] sm:$0xff] %v5961_v26  ;;  %v927_v47 = vpop.permute.xlu0 %926  ;;  %v5974_v37 = vpop.f32.mrb[4].mxu0  ;;  %v6151_v43 = vsel %vm745_vm8, %v5926_v60, %v5932_v1 }
 0x193   : > { %v925_v51 = vpop.permute.xlu1 %924  ;;  %v1021_v24 = vadd.f32 %v927_v47, %v5406_v18  ;;  %v5978_v54 = vpop.f32.mrb[5].mxu0 }
 0x194   : > { %v1020_v33 = vadd.f32 %v925_v51, %v5402_v16  ;;  %v5980_v16 = vpop.f32.mrb[6].mxu0 }
 0x195   : > { %1444 = vperm.xlu0 %4187, %v1021_v24   ;;  %v5983_v24 = vpop.f32.mrb[7].mxu0 }
 0x196   : > { %1439 = vperm.xlu1 %4186, %v1020_v33   ;;  %v931_v46 = vpop.permute.xlu0 %930 }
 0x197   : > { %v929_v34 = vpop.permute.xlu1 %928  ;;  %v1023_v32 = vadd.f32 %v931_v46, %v5444_v35 }
 0x198   : > { %v1022_v26 = vadd.f32 %v929_v34, %v5424_v31 }
 0x19a   : > { %1449 = vperm.xlu1 %4186, %v1022_v26   ;;  %v935_v53 = vpop.permute.xlu0 %934  ;;  %v5986_v34 = vpop.f32.mrb[8].mxu0 }
 0x19b   : > { %v933_v39 = vpop.permute.xlu1 %932  ;;  %v1025_v18 = vadd.f32 %v935_v53, %v5478_v48  ;;  %v5988_v35 = vpop.f32.mrb[9].mxu0 }
 0x19c   : > { %v1024_v45 = vadd.f32 %v933_v39, %v5454_v44  ;;  %v5991_v39 = vpop.f32.mrb[10].mxu0 }
 0x19d   : > { %v5994_v53 = vpop.f32.mrb[11].mxu0 }
 0x19e   : > { %1459 = vperm.xlu0 %4187, %v1024_v45   ;;  %1454 = vperm.xlu1 %4186, %v1023_v32   ;;  %v939_v33 = vpop.permute.xlu0 %938 }
 0x19f   : > { %v937_v31 = vpop.permute.xlu1 %936  ;;  %v1027_v44 = vadd.f32 %v939_v33, %v5506_v28 }
 0x1a0   : > { %v1026_v26 = vadd.f32 %v937_v31, %v5482_v56 }
 0x1a2   : > { %1469 = vperm.xlu0 %4187, %v1026_v26   ;;  %1464 = vperm.xlu1 %4186, %v1025_v18   ;;  %v943_v46 = vpop.permute.xlu0 %942  ;;  %v5996_v32 = vpop.f32.mrb[12].mxu0 }
 0x1a3   : > { %v941_v45 = vpop.permute.xlu1 %940  ;;  %v1029_v56 = vadd.f32 %v943_v46, %v5534_v52  ;;  %v5999_v51 = vpop.f32.mrb[13].mxu0 }
 0x1a4   : > { %v1028_v48 = vadd.f32 %v941_v45, %v5510_v23  ;;  %v6002_v31 = vpop.f32.mrb[14].mxu0 }
 0x1a5   : > { %v6004_v33 = vpop.f32.mrb[15].mxu0 }
 0x1a6   : > { %1479 = vperm.xlu0 %4187, %v1028_v48   ;;  %1474 = vperm.xlu1 %4186, %v1027_v44   ;;  %v947_v18 = vpop.permute.xlu0 %946  ;;  %8678 = vst [vmem:[#allocation168_spill] sm:$0xff] %v6004_v33 }
 0x1a7   : > { %v945_v47 = vpop.permute.xlu1 %944  ;;  %v1031_v23 = vadd.f32 %v947_v18, %v5562_v41 }
 0x1a8   : > { %v1030_v28 = vadd.f32 %v945_v47, %v5538_v4 }
 0x1aa   : > { %1489 = vperm.xlu0 %4187, %v1030_v28   ;;  %1484 = vperm.xlu1 %4186, %v1029_v56   ;;  %v951_v45 = vpop.permute.xlu0 %950  ;;  %v6008_v48 = vpop.f32.mrb[16].mxu0 }
 0x1ab   : > { %v949_v26 = vpop.permute.xlu1 %948  ;;  %v6010_v52 = vpop.f32.mrb[17].mxu0  ;;  %v1033_v4 = vadd.f32 %v951_v45, %v5590_v36 }
 0x1ac   : > { %v1032_v44 = vadd.f32 %v949_v26, %v5566_v50  ;;  %v6013_v46 = vpop.f32.mrb[18].mxu0 }
 0x1ad   : > { %v6016_v28 = vpop.f32.mrb[19].mxu0 }
 0x1ae   : > { %1499 = vperm.xlu0 %4187, %v1032_v44   ;;  %1494 = vperm.xlu1 %4186, %v1031_v23   ;;  %v955_v33 = vpop.permute.xlu0 %954 }
 0x1af   : > { %v953_v47 = vpop.permute.xlu1 %952  ;;  %v1035_v41 = vadd.f32 %v955_v33, %v5618_v58  ;;  %v6031_v58 = vpop.f32.mrb[0].mxu1 }
 0x1b0   : > { %v1034_v56 = vadd.f32 %v953_v47, %v5594_v0  ;;  %8681 = vst [vmem:[#allocation171_spill] sm:$0xff] %v6031_v58 }
 0x1b2   : > { %1509 = vperm.xlu0 %4187, %v1034_v56   ;;  %1504 = vperm.xlu1 %4186, %v1033_v4   ;;  %v959_v18 = vpop.permute.xlu0 %958  ;;  %v6020_v44 = vpop.f32.mrb[20].mxu0 }
 0x1b3   : > { %v957_v50 = vpop.permute.xlu1 %956  ;;  %v6022_v23 = vpop.f32.mrb[21].mxu0  ;;  %v1037_v36 = vadd.f32 %v959_v18, %v5646_v5 }
 0x1b4   : > { %v1036_v26 = vadd.f32 %v957_v50, %v5622_v8  ;;  %v6025_v45 = vpop.f32.mrb[22].mxu0  ;;  %v6036_v5 = vpop.f32.mrb[1].mxu1 }
 0x1b5   : > { %8679 = vst [vmem:[#allocation169_spill] sm:$0xff] %v6025_v45  ;;  %v6028_v56 = vpop.f32.mrb[23].mxu0  ;;  %8683 = vst [vmem:[#allocation173_spill] sm:$0xff] %v6036_v5  ;;  %v6040_v45 = vpop.f32.mrb[2].mxu1 }
 0x1b6   : > { %1519 = vperm.xlu0 %4187, %v1036_v26   ;;  %1514 = vperm.xlu1 %4186, %v1035_v41   ;;  %v963_v47 = vpop.permute.xlu0 %962  ;;  %8680 = vst [vmem:[#allocation170_spill] sm:$0xff] %v6028_v56  ;;  %8685 = vst [vmem:[#allocation175_spill] sm:$0xff] %v6040_v45 }
 0x1b7   : > { %v961_v0 = vpop.permute.xlu1 %960  ;;  %v1039_v8 = vadd.f32 %v963_v47, %v5674_v3  ;;  %v6045_v3 = vpop.f32.mrb[3].mxu1 }
 0x1b8   : > { %v1038_v4 = vadd.f32 %v961_v0, %v5650_v42  ;;  %8687 = vst [vmem:[#allocation177_spill] sm:$0xff] %v6045_v3 }
 0x1ba   : > { %1529 = vperm.xlu0 %4187, %v1038_v4   ;;  %1524 = vperm.xlu1 %4186, %v1037_v36   ;;  %v967_v50 = vpop.permute.xlu0 %966  ;;  %v6034_v26 = vpop.f32.mrb[24].mxu0 }
 0x1bb   : > { %v965_v33 = vpop.permute.xlu1 %964  ;;  %8682 = vst [vmem:[#allocation172_spill] sm:$0xff] %v6034_v26  ;;  %v6038_v18 = vpop.f32.mrb[25].mxu0  ;;  %v1041_v42 = vadd.f32 %v967_v50, %v5702_v11 }
 0x1bc   : > { %v1040_v41 = vadd.f32 %v965_v33, %v5678_v12  ;;  %8684 = vst [vmem:[#allocation174_spill] sm:$0xff] %v6038_v18  ;;  %v6043_v36 = vpop.f32.mrb[26].mxu0  ;;  %v6050_v33 = vpop.f32.mrb[4].mxu1  ;;  %v8776_v18 = vld [vmem:[#allocation163_spill] sm:$0xff] }
 0x1bd   : > { %8686 = vst [vmem:[#allocation176_spill] sm:$0xff] %v6043_v36  ;;  %v6048_v4 = vpop.f32.mrb[27].mxu0  ;;  %8689 = vst [vmem:[#allocation179_spill] sm:$0xff] %v6050_v33  ;;  %v6052_v5 = vpop.f32.mrb[5].mxu1  ;;  %v8775_v36 = vld [vmem:[#allocation162_spill] sm:$0xff] }
 0x1be   : > { %1539 = vperm.xlu0 %4187, %v1040_v41   ;;  %1534 = vperm.xlu1 %4186, %v1039_v8   ;;  %v971_v47 = vpop.permute.xlu0 %970  ;;  %8688 = vst [vmem:[#allocation178_spill] sm:$0xff] %v6048_v4  ;;  %8690 = vst [vmem:[#allocation180_spill] sm:$0xff] %v6052_v5  ;;  %v6055_v41 = vpop.f32.mrb[6].mxu1  ;;  %v8774_v4 = vld [vmem:[#allocation161_spill] sm:$0xff] }
 0x1bf   : > { %v969_v0 = vpop.permute.xlu1 %968  ;;  %v1043_v8 = vadd.f32 %v971_v47, %v5730_v40  ;;  %8691 = vst [vmem:[#allocation181_spill] sm:$0xff] %v6055_v41  ;;  %v6060_v58 = vpop.f32.mrb[7].mxu1 }
 0x1c0   : > { %v1042_v12 = vadd.f32 %v969_v0, %v5706_v59  ;;  %8693 = vst [vmem:[#allocation183_spill] sm:$0xff] %v6060_v58  ;;  %v6064_v0 = vpop.f32.mrb[8].mxu1 }
 0x1c1   : > { %8695 = vst [vmem:[#allocation185_spill] sm:$0xff] %v6064_v0  ;;  %v6069_v40 = vpop.f32.mrb[9].mxu1 }
 0x1c2   : > { %1549 = vperm.xlu0 %4187, %v1042_v12   ;;  %1544 = vperm.xlu1 %4186, %v1041_v42   ;;  %v975_v50 = vpop.permute.xlu0 %974  ;;  %v6058_v45 = vpop.f32.mrb[28].mxu0  ;;  %8697 = vst [vmem:[#allocation187_spill] sm:$0xff] %v6069_v40 }
 0x1c3   : > { %v973_v11 = vpop.permute.xlu1 %972  ;;  %8692 = vst [vmem:[#allocation182_spill] sm:$0xff] %v6058_v45  ;;  %v6062_v59 = vpop.f32.mrb[29].mxu0  ;;  %v1045_v42 = vadd.f32 %v975_v50, %v5758_v19 }
 0x1c4   : > { %v1044_v3 = vadd.f32 %v973_v11, %v5734_v61  ;;  %8694 = vst [vmem:[#allocation184_spill] sm:$0xff] %v6062_v59  ;;  %v6067_v12 = vpop.f32.mrb[30].mxu0  ;;  %v6074_v5 = vpop.f32.mrb[10].mxu1  ;;  %v8764_v59 = vld [vmem:[#allocation156_spill] sm:$0xff] }
 0x1c5   : > { %8696 = vst [vmem:[#allocation186_spill] sm:$0xff] %v6067_v12  ;;  %v6072_v11 = vpop.f32.mrb[31].mxu0  ;;  %8699 = vst [vmem:[#allocation189_spill] sm:$0xff] %v6074_v5  ;;  %v6076_v58 = vpop.f32.mrb[11].mxu1 }
 0x1c6   : > { %1559 = vperm.xlu0 %4187, %v1044_v3   ;;  %1554 = vperm.xlu1 %4186, %v1043_v8   ;;  %v979_v41 = vpop.permute.xlu0 %978  ;;  %8698 = vst [vmem:[#allocation188_spill] sm:$0xff] %v6072_v11  ;;  %8700 = vst [vmem:[#allocation190_spill] sm:$0xff] %v6076_v58  ;;  %v6079_v8 = vpop.f32.mrb[12].mxu1  ;;  %v8742_v11 = vld [vmem:[#allocation148_spill] sm:$0xff] }
 0x1c7   : > { %v977_v47 = vpop.permute.xlu1 %976  ;;  %v1047_v3 = vadd.f32 %v979_v41, %v5786_v38  ;;  %8701 = vst [vmem:[#allocation191_spill] sm:$0xff] %v6079_v8  ;;  %v6082_v0 = vpop.f32.mrb[13].mxu1 }
 0x1c8   : > { %v1046_v61 = vadd.f32 %v977_v47, %v5762_v17  ;;  %8702 = vst [vmem:[#allocation192_spill] sm:$0xff] %v6082_v0  ;;  %v6084_v33 = vpop.f32.mrb[14].mxu1  ;;  %v8733_v0 = vld [vmem:[#allocation146_spill] sm:$0xff] }
 0x1c9   : > { %8703 = vst [vmem:[#allocation193_spill] sm:$0xff] %v6084_v33  ;;  %v6087_v47 = vpop.f32.mrb[15].mxu1 }
 0x1ca   : > { %1569 = vperm.xlu0 %4187, %v1046_v61   ;;  %1564 = vperm.xlu1 %4186, %v1045_v42   ;;  %v983_v50 = vpop.permute.xlu0 %982  ;;  %8704 = vst [vmem:[#allocation194_spill] sm:$0xff] %v6087_v47  ;;  %v6090_v41 = vpop.f32.mrb[16].mxu1 }
 0x1cb   : > { %v981_v19 = vpop.permute.xlu1 %980  ;;  %v1049_v17 = vadd.f32 %v983_v50, %v5814_v7  ;;  %8705 = vst [vmem:[#allocation195_spill] sm:$0xff] %v6090_v41  ;;  %v6092_v8 = vpop.f32.mrb[17].mxu1  ;;  %v8730_v41 = vld [vmem:[#allocation147_spill] sm:$0xff] }
 0x1cc   : > { %v1048_v40 = vadd.f32 %v981_v19, %v5790_v10  ;;  %8706 = vst [vmem:[#allocation196_spill] sm:$0xff] %v6092_v8  ;;  %v6095_v19 = vpop.f32.mrb[18].mxu1  ;;  %v8729_v8 = vld [vmem:[#allocation145_spill] sm:$0xff] }
 0x1cd   : > { %8707 = vst [vmem:[#allocation197_spill] sm:$0xff] %v6095_v19  ;;  %v8728_v19 = vld [vmem:[#allocation144_spill] sm:$0xff] }
 0x1ce   : > { %1579 = vperm.xlu0 %4187, %v1048_v40   ;;  %1574 = vperm.xlu1 %4186, %v1047_v3   ;;  %v987_v42 = vpop.permute.xlu0 %986  ;;  %v6097_v40 = vpop.f32.mrb[19].mxu1 }
 0x1cf   : > { %v985_v61 = vpop.permute.xlu1 %984  ;;  %v1051_v10 = vadd.f32 %v987_v42, %v5842_v30  ;;  %8708 = vst [vmem:[#allocation198_spill] sm:$0xff] %v6097_v40  ;;  %v6099_v7 = vpop.f32.mrb[20].mxu1 }
 0x1d0   : > { %v1050_v38 = vadd.f32 %v985_v61, %v5818_v2  ;;  %8709 = vst [vmem:[#allocation199_spill] sm:$0xff] %v6099_v7  ;;  %v6101_v3 = vpop.f32.mrb[21].mxu1 }
 0x1d1   : > { %8710 = vst [vmem:[#allocation200_spill] sm:$0xff] %v6101_v3  ;;  %v6103_v50 = vpop.f32.mrb[22].mxu1 }
 0x1d2   : > { %1589 = vperm.xlu0 %4187, %v1050_v38   ;;  %1584 = vperm.xlu1 %4186, %v1049_v17   ;;  %8711 = vst [vmem:[#allocation201_spill] sm:$0xff] %v6103_v50  ;;  %v6105_v2 = vpop.f32.mrb[23].mxu1 }
 0x1d3   : > { %8712 = vst [vmem:[#allocation202_spill] sm:$0xff] %v6105_v2  ;;  %v6107_v61 = vpop.f32.mrb[24].mxu1 }
 0x1d4   : > { %8713 = vst [vmem:[#allocation203_spill] sm:$0xff] %v6107_v61  ;;  %v6109_v38 = vpop.f32.mrb[25].mxu1 }
 0x1d5   : > { %8714 = vst [vmem:[#allocation204_spill] sm:$0xff] %v6109_v38  ;;  %v6111_v17 = vpop.f32.mrb[26].mxu1 }
 0x1d6   : > { %1594 = vperm.xlu1 %4186, %v1051_v10   ;;  %8715 = vst [vmem:[#allocation205_spill] sm:$0xff] %v6111_v17  ;;  %v6113_v30 = vpop.f32.mrb[27].mxu1  ;;  %v3952_v10 = vld [vmem:[%s4763_s23 + $0x2] ss:$8 sm:$0x3]  ;;  %v6129_v17 = vsel %vm743_vm0, %v5926_v60, %v5932_v1 }
 0x1d7   : > { %8716 = vst [vmem:[#allocation206_spill] sm:$0xff] %v6113_v30  ;;  %v6115_v42 = vpop.f32.mrb[28].mxu1  ;;  %v6147_v9 = vrot.slane %v3952_v10, %v5390_v13  ;;  %v6159_v55 = vrot.slane %v3952_v10, %v5394_v14  ;;  %v6169_v13 = vsel %vm744_vm3, %v5929_v63, %v5935_v27  ;;  %v6177_v14 = vsel %vm747_vm13, %v5929_v63, %v5935_v27 }
 0x1d8   : > { %8717 = vst [vmem:[#allocation207_spill] sm:$0xff] %v6115_v42  ;;  %v6117_v40 = vpop.f32.mrb[29].mxu1  ;;  %v6133_v42 = vsel %vm743_vm0, %v5929_v63, %v5935_v27  ;;  %vm749_vm0 = vcmp.eq.s32.totalorder %v5878_v20, 1  ;;  %vm753_vm3 = vcmp.eq.s32.totalorder %v5886_v57, 1  ;;  %v6203_v30 = vsel %vm751_vm2, %v5926_v60, %v5932_v1 }
 0x1d9   : > { %8718 = vst [vmem:[#allocation208_spill] sm:$0xff] %v6117_v40  ;;  %v6119_v7 = vpop.f32.mrb[30].mxu1  ;;  %v6173_v40 = vsel %vm747_vm13, %v5926_v60, %v5932_v1  ;;  %v6188_v20 = vsel %vm749_vm0, %v5926_v60, %v5932_v1  ;;  %v6192_v22 = vsel %vm749_vm0, %v5929_v63, %v5935_v27  ;;  %vm8722_vm13 = vmmov %vm8721_vm7  ;;  %v6216_v57 = vsel %vm751_vm2, %v5929_v63, %v5935_v27 }
 0x1da   : > { %8719 = vst [vmem:[#allocation209_spill] sm:$0xff] %v6119_v7  ;;  %v6121_v3 = vpop.f32.mrb[31].mxu1  ;;  %v6137_v7 = vsel %vm742_vm1, %v5926_v60, %v5932_v1  ;;  %vm748_vm1 = vcmp.eq.s32.totalorder %v5876_v15, 1  ;;  %v6184_v15 = vsel %vm8721_vm7, %v5926_v60, %v5932_v1  ;;  %v6199_v10 = vsel %vm8722_vm13, %v5929_v63, %v5935_v27  ;;  %8723 = vst [vmem:[#allocation211_spill] sm:$0xff] %v6203_v30 }
 0x1db   : > { %8720 = vst [vmem:[#allocation210_spill] sm:$0xff] %v6121_v3  ;;  %v6155_v3 = vsel %vm745_vm8, %v5929_v63, %v5935_v27  ;;  %vm750_vm8 = vcmp.eq.s32.totalorder %v5880_v21, 1  ;;  %vm752_vm7 = vcmp.eq.s32.totalorder %v5884_v29, 1  ;;  %v6208_v38 = vsel %vm748_vm1, %v5926_v60, %v5932_v1  ;;  %8724 = vst [vmem:[#allocation212_spill] sm:$0xff] %v6216_v57  ;;  %v8778_v57 = vld [vmem:[#allocation157_spill] sm:$0xff] }
 0x1dc   : > { %v6212_v61 = vsel %vm748_vm1, %v5929_v63, %v5935_v27  ;;  %vm755_vm13 = vcmp.eq.s32.totalorder %v8725_v62, 1  ;;  %v6224_v29 = vsel %vm750_vm8, %v5926_v60, %v5932_v1  ;;  %v6228_v2 = vsel %vm753_vm3, %v5926_v60, %v5932_v1 }
 0x1dd   : > { %8726 = vst [vmem:[#allocation143_spill] sm:$0xff] %v6228_v2  ;;  %v6232_v50 = vsel %vm753_vm3, %v5929_v63, %v5935_v27  ;;  %vm756_vm2 = vcmp.eq.s32.totalorder %v8728_v19, 1  ;;  %v6239_v62 = vsel %vm750_vm8, %v5929_v63, %v5935_v27  ;;  %vm757_vm1 = vcmp.eq.s32.totalorder %v8729_v8, 1 }
 0x1de   : > { %8727 = vst [vmem:[#allocation213_spill] sm:$0xff] %v6232_v50  ;;  %vm759_vm0 = vcmp.eq.s32.totalorder %v8730_v41, 1  ;;  %v6245_v47 = vsel %vm752_vm7, %v5926_v60, %v5932_v1  ;;  %v6249_v33 = vsel %vm752_vm7, %v5929_v63, %v5935_v27  ;;  %v6253_v19 = vsel %vm755_vm13, %v5926_v60, %v5932_v1  ;;  %v8736_v41 = vld [vmem:[#allocation149_spill] sm:$0xff] }
 0x1df   : > { %8731 = vst [vmem:[#allocation144_spill] sm:$0xff] %v6253_v19  ;;  %v6257_v21 = vsel %vm755_vm13, %v5929_v63, %v5935_v27  ;;  %vm758_vm8 = vcmp.eq.s32.totalorder %v8733_v0, 1  ;;  %vm8734_vm3 = vcmp.eq.s32.totalorder %v5888_v49, 1  ;;  %vm761_vm5 = vcmp.eq.s32.totalorder %v8736_v41, 1 }
 0x1e0   : > { %8732 = vst [vmem:[#allocation145_spill] sm:$0xff] %v6257_v21  ;;  %v6264_v8 = vsel %vm8734_vm3, %v5926_v60, %v5932_v1  ;;  %vm8737_vm7 = vmmov %vm8734_vm3  ;;  %v6275_v5 = vsel %vm756_vm2, %v5926_v60, %v5932_v1  ;;  %v6279_v21 = vsel %vm756_vm2, %v5929_v63, %v5935_v27  ;;  %v6283_v19 = vsel %vm759_vm0, %v5926_v60, %v5932_v1 }
 0x1e1   : > { %8735 = vst [vmem:[#allocation147_spill] sm:$0xff] %v6264_v8  ;;  %v6271_v58 = vsel %vm8737_vm7, %v5929_v63, %v5935_v27  ;;  %8739 = vst [vmem:[#allocation149_spill] sm:$0xff] %v6275_v5  ;;  %vm760_vm13 = vcmp.eq.s32.totalorder %v8742_v11, 1  ;;  %v6288_v41 = vsel %vm757_vm1, %v5926_v60, %v5932_v1  ;;  %v6292_v49 = vsel %vm757_vm1, %v5929_v63, %v5935_v27  ;;  %v8746_v5 = vld [vmem:[#allocation150_spill] sm:$0xff] }
 0x1e2   : > { %8738 = vst [vmem:[#allocation146_spill] sm:$0xff] %v6271_v58  ;;  %8740 = vst [vmem:[#allocation214_spill] sm:$0xff] %v6279_v21  ;;  %v6296_v12 = vsel %vm759_vm0, %v5929_v63, %v5935_v27  ;;  %vm762_vm2 = vcmp.eq.s32.totalorder %v8746_v5, 1  ;;  %v8747_v21 = vld [vmem:[#allocation151_spill] sm:$0xff]  ;;  %v6304_v11 = vsel %vm758_vm8, %v5926_v60, %v5932_v1  ;;  %v6319_v5 = vsel %vm758_vm8, %v5929_v63, %v5935_v27 }
 0x1e3   : > { %8741 = vst [vmem:[#allocation215_spill] sm:$0xff] %v6283_v19  ;;  %8743 = vst [vmem:[#allocation148_spill] sm:$0xff] %v6288_v41  ;;  %vm763_vm3 = vcmp.eq.s32.totalorder %v8747_v21, 1  ;;  %v6308_v19 = vsel %vm761_vm5, %v5926_v60, %v5932_v1  ;;  %v8751_v41 = vld [vmem:[#allocation153_spill] sm:$0xff]  ;;  %v8753_v21 = vld [vmem:[#allocation152_spill] sm:$0xff]  ;;  %vm769_vm8 = vcmp.eq.s32.totalorder %v8764_v59, 1 }
 0x1e4   : > { %8744 = vst [vmem:[#allocation216_spill] sm:$0xff] %v6292_v49  ;;  %8745 = vst [vmem:[#allocation217_spill] sm:$0xff] %v6296_v12  ;;  %v6312_v49 = vsel %vm761_vm5, %v5929_v63, %v5935_v27  ;;  %vm765_vm0 = vcmp.eq.s32.totalorder %v8751_v41, 1  ;;  %vm764_vm1 = vcmp.eq.s32.totalorder %v8753_v21, 1  ;;  %v8754_v12 = vld [vmem:[#allocation155_spill] sm:$0xff]  ;;  %v6333_v41 = vsel %vm763_vm3, %v5926_v60, %v5932_v1 }
 0x1e5   : > { %8748 = vst [vmem:[#allocation150_spill] sm:$0xff] %v6304_v11  ;;  %8749 = vst [vmem:[#allocation151_spill] sm:$0xff] %v6308_v19  ;;  %vm767_vm7 = vcmp.eq.s32.totalorder %v8754_v12, 1  ;;  %v6325_v11 = vsel %vm760_vm13, %v5926_v60, %v5932_v1  ;;  %v6329_v19 = vsel %vm760_vm13, %v5929_v63, %v5935_v27  ;;  %v6337_v0 = vsel %vm763_vm3, %v5929_v63, %v5935_v27 }
 0x1e6   : > { %8750 = vst [vmem:[#allocation218_spill] sm:$0xff] %v6312_v49  ;;  %8752 = vst [vmem:[#allocation153_spill] sm:$0xff] %v6319_v5  ;;  %v6341_v49 = vsel %vm762_vm2, %v5926_v60, %v5932_v1  ;;  %v6345_v5 = vsel %vm762_vm2, %v5929_v63, %v5935_v27  ;;  %v6384_v2 = vsel %vm767_vm7, %v5929_v63, %v5935_v27  ;;  %vm770_vm2 = vcmp.eq.s32.totalorder %v8778_v57, 1 }
 0x1e7   : > { %8755 = vst [vmem:[#allocation152_spill] sm:$0xff] %v6325_v11  ;;  %8756 = vst [vmem:[#allocation155_spill] sm:$0xff] %v6329_v19  ;;  %v6349_v11 = vsel %vm765_vm0, %v5926_v60, %v5932_v1  ;;  %v6353_v19 = vsel %vm765_vm0, %v5929_v63, %v5935_v27  ;;  %v6390_v21 = vsel %vm769_vm8, %v5926_v60, %v5932_v1  ;;  %vm8988_vm0 = vmmov 1  }
 0x1e8   : > { %8757 = vst [vmem:[#allocation219_spill] sm:$0xff] %v6333_v41  ;;  %8758 = vst [vmem:[#allocation220_spill] sm:$0xff] %v6337_v0  ;;  %v8763_v41 = vld [vmem:[#allocation154_spill] sm:$0xff]  ;;  %v6361_v0 = vsel %vm767_vm7, %v5926_v60, %v5932_v1 }
 0x1e9   : > { %8759 = vst [vmem:[#allocation221_spill] sm:$0xff] %v6341_v49  ;;  %8760 = vst [vmem:[#allocation222_spill] sm:$0xff] %v6345_v5  ;;  %vm766_vm5 = vcmp.eq.s32.totalorder %v8763_v41, 1  ;;  %v8766_v49 = vld [vmem:[#allocation51_spill] sm:$0xff]  ;;  %v6374_v41 = vsel %vm764_vm1, %v5929_v63, %v5935_v27 }
 0x1ea   : > { %8761 = vst [vmem:[#allocation223_spill] sm:$0xff] %v6349_v11  ;;  %8762 = vst [vmem:[#allocation224_spill] sm:$0xff] %v6353_v19  ;;  %vm768_vm13 = vcmp.eq.s32.totalorder %v8766_v49, 1  ;;  %v6368_v11 = vsel %vm764_vm1, %v5926_v60, %v5932_v1 }
 0x1eb   : > { %8765 = vst [vmem:[#allocation154_spill] sm:$0xff] %v6361_v0  ;;  %8767 = vst [vmem:[#allocation156_spill] sm:$0xff] %v6368_v11 }
 0x1ec   : > { %8768 = vst [vmem:[#allocation51_spill] sm:$0xff] %v6374_v41  ;;  %8769 = vst [vmem:[#allocation225_spill] sm:$0xff] %v6384_v2  ;;  %v6394_v41 = vsel %vm766_vm5, %v5926_v60, %v5932_v1 }
 0x1ed   : > { %8770 = vst [vmem:[#allocation226_spill] sm:$0xff] %v6390_v21  ;;  %8771 = vst [vmem:[#allocation227_spill] sm:$0xff] %v6394_v41  ;;  %v6408_v21 = vsel %vm769_vm8, %v5929_v63, %v5935_v27 }
 0x214   : > { %v1445_v45 = vpop.permute.xlu0 %1444 }
 0x215   : > { %v1440_v5 = vpop.permute.xlu1 %1439  ;;  %v1610_v58 = vadd.f32 %v6147_v9, %v1445_v45  ;;  %v1611_v50 = vadd.f32 %v6159_v55, %v1445_v45  ;;  %v8773_v45 = vld [vmem:[#allocation158_spill] sm:$0xff] }
 0x216   : > { %v1608_v19 = vadd.f32 %v6147_v9, %v1440_v5  ;;  %v1609_v0 = vadd.f32 %v6159_v55, %v1440_v5  ;;  %v6398_v5 = vsel %vm766_vm5, %v5929_v63, %v5935_v27  ;;  %8777 = vst [vmem:[#allocation158_spill] sm:$0xff] %v6408_v21 }
 0x217   : > { %8772 = vst [vmem:[#allocation228_spill] sm:$0xff] %v6398_v5  ;;  %v1674_v2 = vadd.f32 %v1610_v58, %v8775_v36  ;;  %v1675_v8 = vadd.f32 %v1611_v50, %v8776_v18  ;;  %v6421_v58 = vsel %vm768_vm13, %v5929_v63, %v5935_v27 }
 0x218   : > { %v1672_v11 = vadd.f32 %v1608_v19, %v8773_v45  ;;  %v1673_v12 = vadd.f32 %v1609_v0, %v8774_v4  ;;  %v6415_v19 = vsel %vm768_vm13, %v5926_v60, %v5932_v1  ;;  %8780 = vst [vmem:[#allocation162_spill] sm:$0xff] %v6421_v58  ;;  %v8781_v45 = vld [vmem:[#allocation79_spill] sm:$0xff] }
 0x219   : > { %v1450_v41 = vpop.permute.xlu1 %1449  ;;  %8779 = vst [vmem:[#allocation161_spill] sm:$0xff] %v6415_v19  ;;  %v1802_v50 = vadd.f32 %v1674_v2, %v6129_v17  ;;  %v1803_v0 = vadd.f32 %v1675_v8, %v6133_v42  ;;  %v8782_v19 = vld [vmem:[#allocation80_spill] sm:$0xff]  ;;  %v6444_v17 = vsel %vm770_vm2, %v5926_v60, %v5932_v1  ;;  %v8852_v42 = vld [vmem:[#allocation185_spill] sm:$0xff] }
 0x21a   : > { %v1612_v18 = vadd.f32 %v6147_v9, %v1450_v41  ;;  %v1613_v36 = vadd.f32 %v6159_v55, %v1450_v41  ;;  %v1800_v4 = vadd.f32 %v1672_v11, %v6137_v7  ;;  %v1801_v59 = vadd.f32 %v1673_v12, %v6142_v25  ;;  %v8783_v41 = vld [vmem:[#allocation85_spill] sm:$0xff] }
 0x21b   : > { %v6430_v21 = vadd.f32 %v1672_v11, %v8781_v45  ;;  %v6433_v5 = vadd.f32 %v1673_v12, %v8782_v19  ;;  %v6438_v26 = vadd.f32 %v1674_v2, %v8783_v41  ;;  %v2614_v56 = vmin.f32 %v1802_v50, %v1803_v0  ;;  %v8785_v11 = vld [vmem:[#allocation86_spill] sm:$0xff] }
 0x21c   : > { %v1676_v49 = vadd.f32 %v1612_v18, %v5974_v37  ;;  %v1677_v58 = vadd.f32 %v1613_v36, %v5978_v54  ;;  %v2611_v30 = vmin.f32 %v1800_v4, %v1801_v59  ;;  %v6449_v37 = vadd.f32 %v1675_v8, %v8785_v11  ;;  %v8787_v54 = vld [vmem:[#allocation81_spill] sm:$0xff]  ;;  %v8789_v19 = vld [vmem:[#allocation82_spill] sm:$0xff] }
 0x21d   : > { %8784 = vst [vmem:[#allocation163_spill] sm:$0xff] %v6438_v26  ;;  %v1455_v7 = vpop.permute.xlu1 %1454  ;;  %v1460_v25 = vpop.permute.xlu0 %1459  ;;  %2615 = vmin.xlane.f32.xlu1 %v2614_v56  ;;  %v8865_v26 = vld [vmem:[#allocation191_spill] sm:$0xff] }
 0x21e   : > { %8786 = vst [vmem:[#allocation157_spill] sm:$0xff] %v6449_v37  ;;  %v6452_v12 = vadd.f32 %v1676_v49, %v8787_v54  ;;  %v1804_v2 = vadd.f32 %v1676_v49, %v6165_v6  ;;  %v6456_v18 = vadd.f32 %v1677_v58, %v8789_v19  ;;  %v1805_v36 = vadd.f32 %v1677_v58, %v6169_v13 }
 0x21f   : > { %2612 = vmin.xlane.f32.xlu0 %v2611_v30  ;;  %v1614_v1 = vadd.f32 %v6147_v9, %v1455_v7  ;;  %v1615_v60 = vadd.f32 %v6159_v55, %v1455_v7  ;;  %v1616_v4 = vadd.f32 %v6147_v9, %v1460_v25  ;;  %v1617_v8 = vadd.f32 %v6159_v55, %v1460_v25  ;;  %v8791_v7 = vld [vmem:[#allocation89_spill] sm:$0xff] }
 0x220   : > { %8788 = vst [vmem:[#allocation79_spill] sm:$0xff] %v6452_v12  ;;  %8790 = vst [vmem:[#allocation80_spill] sm:$0xff] %v6456_v18  ;;  %v2617_v59 = vmin.f32 %v1804_v2, %v1805_v36  ;;  %v6467_v6 = vsel %vm770_vm2, %v5929_v63, %v5935_v27 }
 0x221   : > { %v1678_v58 = vadd.f32 %v1614_v1, %v5980_v16  ;;  %v1679_v50 = vadd.f32 %v1615_v60, %v5983_v24  ;;  %v1680_v56 = vadd.f32 %v1616_v4, %v5986_v34  ;;  %v1681_v0 = vadd.f32 %v1617_v8, %v5988_v35  ;;  %v1465_v45 = vpop.permute.xlu1 %1464  ;;  %v1470_v49 = vpop.permute.xlu0 %1469  ;;  %v8792_v24 = vld [vmem:[#allocation90_spill] sm:$0xff]  ;;  %v8793_v8 = vld [vmem:[#allocation83_spill] sm:$0xff] }
 0x222   : > { %v1618_v57 = vadd.f32 %v6147_v9, %v1465_v45  ;;  %v1619_v63 = vadd.f32 %v6159_v55, %v1465_v45  ;;  %v1620_v27 = vadd.f32 %v6147_v9, %v1470_v49  ;;  %v1621_v41 = vadd.f32 %v6159_v55, %v1470_v49 }
 0x223   : > { %2618 = vmin.xlane.f32.xlu0 %v2617_v59  ;;  %v6482_v25 = vadd.f32 %v1680_v56, %v8791_v7  ;;  %v1808_v16 = vadd.f32 %v1680_v56, %v6184_v15  ;;  %v6486_v34 = vadd.f32 %v1681_v0, %v8792_v24  ;;  %v1809_v35 = vadd.f32 %v1681_v0, %v6199_v10  ;;  %v8794_v10 = vld [vmem:[#allocation93_spill] sm:$0xff]  ;;  %v8795_v56 = vld [vmem:[#allocation94_spill] sm:$0xff]  ;;  %v8797_v24 = vld [vmem:[#allocation84_spill] sm:$0xff] }
 0x224   : > { %v6490_v11 = vadd.f32 %v1618_v57, %v5991_v39  ;;  %v6493_v54 = vadd.f32 %v1619_v63, %v5994_v53  ;;  %v1684_v2 = vadd.f32 %v1620_v27, %v5996_v32  ;;  %v1685_v19 = vadd.f32 %v1621_v41, %v5999_v51 }
 0x225   : > { %v1475_v36 = vpop.permute.xlu1 %1474  ;;  %v1480_v1 = vpop.permute.xlu0 %1479  ;;  %v1806_v60 = vadd.f32 %v1678_v58, %v6151_v43  ;;  %v1807_v15 = vadd.f32 %v1679_v50, %v6155_v3  ;;  %v2623_v4 = vmin.f32 %v1808_v16, %v1809_v35  ;;  %v6500_v59 = vadd.f32 %v1678_v58, %v8793_v8 }
 0x226   : > { %v6503_v39 = vadd.f32 %v1684_v2, %v8794_v10  ;;  %v1812_v53 = vadd.f32 %v1684_v2, %v6208_v38  ;;  %v6507_v0 = vadd.f32 %v1685_v19, %v8795_v56  ;;  %v1813_v32 = vadd.f32 %v1685_v19, %v6212_v61  ;;  %v8796_v61 = vld [vmem:[#allocation168_spill] sm:$0xff]  ;;  %v8798_v19 = vld [vmem:[#allocation97_spill] sm:$0xff] }
 0x227   : > { %v1622_v51 = vadd.f32 %v6147_v9, %v1475_v36  ;;  %v1623_v43 = vadd.f32 %v6159_v55, %v1475_v36  ;;  %v1624_v3 = vadd.f32 %v6147_v9, %v1480_v1  ;;  %v2620_v45 = vmin.f32 %v1806_v60, %v1807_v15  ;;  %2624 = vmin.xlane.f32.xlu1 %v2623_v4  ;;  %v8799_v15 = vld [vmem:[#allocation98_spill] sm:$0xff] }
 0x228   : > { %v1625_v58 = vadd.f32 %v6159_v55, %v1480_v1  ;;  %v1810_v49 = vadd.f32 %v6490_v11, %v6173_v40  ;;  %v1811_v38 = vadd.f32 %v6493_v54, %v6177_v14  ;;  %v2629_v57 = vmin.f32 %v1812_v53, %v1813_v32 }
 0x229   : > { %v6519_v63 = vadd.f32 %v1622_v51, %v6002_v31  ;;  %v6522_v27 = vadd.f32 %v1623_v43, %v8796_v61  ;;  %v1688_v41 = vadd.f32 %v1624_v3, %v6008_v48  ;;  %2621 = vmin.xlane.f32.xlu0 %v2620_v45  ;;  %v1485_v7 = vpop.permute.xlu1 %1484  ;;  %v1490_v16 = vpop.permute.xlu0 %1489  ;;  %v6526_v35 = vadd.f32 %v1679_v50, %v8797_v24  ;;  %v8800_v3 = vld [vmem:[#allocation101_spill] sm:$0xff]  ;;  %v8801_v45 = vld [vmem:[#allocation102_spill] sm:$0xff]  ;;  %v8804_v61 = vld [vmem:[#allocation172_spill] sm:$0xff] }
 0x22a   : > { %v1689_v40 = vadd.f32 %v1625_v58, %v6010_v52  ;;  %v1626_v2 = vadd.f32 %v6147_v9, %v1485_v7  ;;  %v1627_v14 = vadd.f32 %v6159_v55, %v1485_v7  ;;  %v1628_v31 = vadd.f32 %v6147_v9, %v1490_v16 }
 0x22b   : > { %v6533_v36 = vadd.f32 %v1688_v41, %v8798_v19  ;;  %v1816_v1 = vadd.f32 %v1688_v41, %v6224_v29  ;;  %v2626_v48 = vmin.f32 %v1810_v49, %v1811_v38  ;;  %2630 = vmin.xlane.f32.xlu1 %v2629_v57  ;;  %v1629_v60 = vadd.f32 %v6159_v55, %v1490_v16  ;;  %v8802_v49 = vld [vmem:[#allocation169_spill] sm:$0xff] }
 0x22c   : > { %v6538_v50 = vadd.f32 %v1689_v40, %v8799_v15  ;;  %v1817_v52 = vadd.f32 %v1689_v40, %v6239_v62  ;;  %v6542_v4 = vadd.f32 %v1626_v2, %v6013_v46  ;;  %v6545_v8 = vadd.f32 %v1627_v14, %v6016_v28  ;;  %v8806_v14 = vld [vmem:[#allocation212_spill] sm:$0xff]  ;;  %v8807_v19 = vld [vmem:[#allocation105_spill] sm:$0xff] }
 0x22d   : > { %v1692_v10 = vadd.f32 %v1628_v31, %v6020_v44  ;;  %2627 = vmin.xlane.f32.xlu0 %v2626_v48  ;;  %v1693_v29 = vadd.f32 %v1629_v60, %v6022_v23  ;;  %v1495_v53 = vpop.permute.xlu1 %1494  ;;  %v1500_v56 = vpop.permute.xlu0 %1499  ;;  %v1814_v32 = vadd.f32 %v6519_v63, %v6188_v20  ;;  %v1815_v51 = vadd.f32 %v6522_v27, %v6192_v22  ;;  %v8803_v22 = vld [vmem:[#allocation170_spill] sm:$0xff]  ;;  %v8808_v48 = vld [vmem:[#allocation147_spill] sm:$0xff] }
 0x22e   : > { %v1630_v62 = vadd.f32 %v6147_v9, %v1495_v53  ;;  %v1631_v46 = vadd.f32 %v6159_v55, %v1495_v53  ;;  %v1632_v28 = vadd.f32 %v6147_v9, %v1500_v56  ;;  %v2635_v43 = vmin.f32 %v1816_v1, %v1817_v52 }
 0x22f   : > { %v6557_v44 = vadd.f32 %v1692_v10, %v8800_v3  ;;  %v1820_v23 = vadd.f32 %v1692_v10, %v6245_v47  ;;  %v6561_v58 = vadd.f32 %v1693_v29, %v8801_v45  ;;  %v1821_v20 = vadd.f32 %v1693_v29, %v6249_v33  ;;  %v8805_v47 = vld [vmem:[#allocation211_spill] sm:$0xff]  ;;  %v8809_v10 = vld [vmem:[#allocation174_spill] sm:$0xff] }
 0x230   : > { %v6565_v38 = vadd.f32 %v1630_v62, %v8802_v49  ;;  %v6568_v57 = vadd.f32 %v1631_v46, %v8803_v22  ;;  %v1696_v41 = vadd.f32 %v1632_v28, %v8804_v61  ;;  %v2632_v7 = vmin.f32 %v1814_v32, %v1815_v51  ;;  %2636 = vmin.xlane.f32.xlu1 %v2635_v43  ;;  %v8810_v51 = vld [vmem:[#allocation176_spill] sm:$0xff]  ;;  %v8811_v46 = vld [vmem:[#allocation178_spill] sm:$0xff]  ;;  %v8812_v43 = vld [vmem:[#allocation143_spill] sm:$0xff] }
 0x231   : > { %v1633_v16 = vadd.f32 %v6159_v55, %v1500_v56  ;;  %v1505_v24 = vpop.permute.xlu1 %1504  ;;  %v1510_v40 = vpop.permute.xlu0 %1509  ;;  %v1818_v2 = vadd.f32 %v6542_v4, %v8805_v47  ;;  %v1819_v33 = vadd.f32 %v6545_v8, %v8806_v14  ;;  %v2641_v31 = vmin.f32 %v1820_v23, %v1821_v20  ;;  %v8813_v23 = vld [vmem:[#allocation213_spill] sm:$0xff]  ;;  %v8814_v20 = vld [vmem:[#allocation106_spill] sm:$0xff] }
 0x232   : > { %v6577_v1 = vadd.f32 %v1696_v41, %v8807_v19  ;;  %v1824_v60 = vadd.f32 %v1696_v41, %v8808_v48  ;;  %2633 = vmin.xlane.f32.xlu0 %v2632_v7  ;;  %v1634_v15 = vadd.f32 %v6147_v9, %v1505_v24  ;;  %v1635_v52 = vadd.f32 %v6159_v55, %v1505_v24  ;;  %v8815_v22 = vld [vmem:[#allocation146_spill] sm:$0xff]  ;;  %v8818_v19 = vld [vmem:[#allocation107_spill] sm:$0xff] }
 0x233   : > { %v1697_v29 = vadd.f32 %v1633_v16, %v8809_v10  ;;  %v1636_v53 = vadd.f32 %v6147_v9, %v1510_v40  ;;  %v2638_v56 = vmin.f32 %v1818_v2, %v1819_v33  ;;  %v1637_v32 = vadd.f32 %v6159_v55, %v1510_v40  ;;  %v8816_v41 = vld [vmem:[#allocation182_spill] sm:$0xff]  ;;  %v8817_v16 = vld [vmem:[#allocation184_spill] sm:$0xff] }
 0x234   : > { %v6586_v62 = vadd.f32 %v1634_v15, %v8810_v51  ;;  %v6589_v28 = vadd.f32 %v1635_v52, %v8811_v46  ;;  %2642 = vmin.xlane.f32.xlu1 %v2641_v31  ;;  %v1822_v3 = vadd.f32 %v6565_v38, %v8812_v43  ;;  %v1823_v45 = vadd.f32 %v6568_v57, %v8813_v23  ;;  %v8819_v15 = vld [vmem:[#allocation149_spill] sm:$0xff]  ;;  %v8820_v10 = vld [vmem:[#allocation108_spill] sm:$0xff]  ;;  %v8822_v51 = vld [vmem:[#allocation186_spill] sm:$0xff] }
 0x235   : > { %v6596_v49 = vadd.f32 %v1697_v29, %v8814_v20  ;;  %v1825_v61 = vadd.f32 %v1697_v29, %v8815_v22  ;;  %v1700_v7 = vadd.f32 %v1636_v53, %v8816_v41  ;;  %v1701_v24 = vadd.f32 %v1637_v32, %v8817_v16  ;;  %v1515_v40 = vpop.permute.xlu1 %1514  ;;  %v1520_v47 = vpop.permute.xlu0 %1519  ;;  %v8821_v53 = vld [vmem:[#allocation214_spill] sm:$0xff]  ;;  %v8824_v20 = vld [vmem:[#allocation188_spill] sm:$0xff] }
 0x236   : > { %2639 = vmin.xlane.f32.xlu0 %v2638_v56  ;;  %v1638_v2 = vadd.f32 %v6147_v9, %v1515_v40  ;;  %v1640_v14 = vadd.f32 %v6147_v9, %v1520_v47  ;;  %v2644_v33 = vmin.f32 %v1822_v3, %v1823_v45  ;;  %v1639_v31 = vadd.f32 %v6159_v55, %v1515_v40  ;;  %v8823_v56 = vld [vmem:[#allocation171_spill] sm:$0xff]  ;;  %v8825_v16 = vld [vmem:[#allocation144_spill] sm:$0xff] }
 0x237   : > { %v6605_v48 = vadd.f32 %v1700_v7, %v8818_v19  ;;  %v1828_v52 = vadd.f32 %v1700_v7, %v8819_v15  ;;  %v6609_v29 = vadd.f32 %v1701_v24, %v8820_v10  ;;  %v1829_v32 = vadd.f32 %v1701_v24, %v8821_v53  ;;  %v8826_v7 = vld [vmem:[#allocation145_spill] sm:$0xff] }
 0x238   : > { %v1702_v46 = vadd.f32 %v1638_v2, %v8822_v51  ;;  %v1704_v43 = vadd.f32 %v1640_v14, %v8823_v56  ;;  %v2647_v23 = vmin.f32 %v1824_v60, %v1825_v61  ;;  %v1703_v22 = vadd.f32 %v1639_v31, %v8824_v20  ;;  %v8827_v10 = vld [vmem:[#allocation109_spill] sm:$0xff]  ;;  %v8828_v2 = vld [vmem:[#allocation148_spill] sm:$0xff]  ;;  %v8830_v61 = vld [vmem:[#allocation150_spill] sm:$0xff] }
 0x239   : > { %v1641_v3 = vadd.f32 %v6159_v55, %v1520_v47  ;;  %v1525_v45 = vpop.permute.xlu1 %1524  ;;  %v1530_v41 = vpop.permute.xlu0 %1529  ;;  %v1826_v40 = vadd.f32 %v6586_v62, %v8825_v16  ;;  %v1827_v19 = vadd.f32 %v6589_v28, %v8826_v7  ;;  %v2653_v15 = vmin.f32 %v1828_v52, %v1829_v32  ;;  %v8829_v14 = vld [vmem:[#allocation113_spill] sm:$0xff]  ;;  %v8831_v47 = vld [vmem:[#allocation110_spill] sm:$0xff]  ;;  %v8832_v56 = vld [vmem:[#allocation216_spill] sm:$0xff] }
 0x23a   : > { %v6621_v24 = vadd.f32 %v1702_v46, %v8827_v10  ;;  %v1830_v53 = vadd.f32 %v1702_v46, %v8828_v2  ;;  %v6625_v60 = vadd.f32 %v1704_v43, %v8829_v14  ;;  %v1832_v31 = vadd.f32 %v1704_v43, %v8830_v61  ;;  %2645 = vmin.xlane.f32.xlu0 %v2644_v33  ;;  %v8833_v16 = vld [vmem:[#allocation173_spill] sm:$0xff]  ;;  %v8834_v14 = vld [vmem:[#allocation114_spill] sm:$0xff]  ;;  %v8836_v61 = vld [vmem:[#allocation175_spill] sm:$0xff] }
 0x23b   : > { %2648 = vmin.xlane.f32.xlu1 %v2647_v23  ;;  %v6629_v51 = vadd.f32 %v1703_v22, %v8831_v47  ;;  %v1831_v20 = vadd.f32 %v1703_v22, %v8832_v56  ;;  %v1705_v7 = vadd.f32 %v1641_v3, %v8833_v16  ;;  %v1642_v52 = vadd.f32 %v6147_v9, %v1525_v45  ;;  %v8835_v33 = vld [vmem:[#allocation153_spill] sm:$0xff] }
 0x23c   : > { %v1643_v32 = vadd.f32 %v6159_v55, %v1525_v45  ;;  %v1644_v46 = vadd.f32 %v6147_v9, %v1530_v41  ;;  %v2650_v10 = vmin.f32 %v1826_v40, %v1827_v19  ;;  %v1645_v2 = vadd.f32 %v6159_v55, %v1530_v41  ;;  %v8838_v16 = vld [vmem:[#allocation177_spill] sm:$0xff]  ;;  %v8840_v45 = vld [vmem:[#allocation179_spill] sm:$0xff]  ;;  %v8841_v40 = vld [vmem:[#allocation180_spill] sm:$0xff] }
 0x23d   : > { %v6638_v43 = vadd.f32 %v1705_v7, %v8834_v14  ;;  %v1833_v23 = vadd.f32 %v1705_v7, %v8835_v33  ;;  %v6642_v47 = vadd.f32 %v1642_v52, %v8836_v61  ;;  %v1535_v22 = vpop.permute.xlu1 %1534  ;;  %v1540_v56 = vpop.permute.xlu0 %1539  ;;  %v2656_v3 = vmin.f32 %v1830_v53, %v1831_v20  ;;  %v8842_v61 = vld [vmem:[#allocation117_spill] sm:$0xff]  ;;  %v8844_v20 = vld [vmem:[#allocation152_spill] sm:$0xff] }
 0x23e   : > { %v6645_v30 = vadd.f32 %v1643_v32, %v8838_v16  ;;  %v1708_v13 = vadd.f32 %v1644_v46, %v8840_v45  ;;  %2651 = vmin.xlane.f32.xlu0 %v2650_v10  ;;  %v1709_v19 = vadd.f32 %v1645_v2, %v8841_v40  ;;  %v1646_v41 = vadd.f32 %v6147_v9, %v1535_v22  ;;  %v8845_v16 = vld [vmem:[#allocation118_spill] sm:$0xff]  ;;  %v8847_v10 = vld [vmem:[#allocation155_spill] sm:$0xff]  ;;  %v8848_v45 = vld [vmem:[#allocation181_spill] sm:$0xff] }
 0x23f   : > { %8837 = vst [vmem:[#allocation85_spill] sm:$0xff] %v6642_v47  ;;  %2654 = vmin.xlane.f32.xlu1 %v2653_v15  ;;  %v1647_v14 = vadd.f32 %v6159_v55, %v1535_v22  ;;  %v1648_v7 = vadd.f32 %v6147_v9, %v1540_v56  ;;  %v2659_v52 = vmin.f32 %v1832_v31, %v1833_v23  ;;  %v8850_v15 = vld [vmem:[#allocation183_spill] sm:$0xff] }
 0x240   : > { %8839 = vst [vmem:[#allocation86_spill] sm:$0xff] %v6645_v30  ;;  %v1649_v33 = vadd.f32 %v6159_v55, %v1540_v56  ;;  %v6654_v53 = vadd.f32 %v1708_v13, %v8842_v61  ;;  %v1836_v32 = vadd.f32 %v1708_v13, %v8844_v20  ;;  %v6658_v46 = vadd.f32 %v1709_v19, %v8845_v16  ;;  %v8853_v23 = vld [vmem:[#allocation187_spill] sm:$0xff] }
 0x241   : > { %v1837_v2 = vadd.f32 %v1709_v19, %v8847_v10  ;;  %v6662_v40 = vadd.f32 %v1646_v41, %v8848_v45  ;;  %v6665_v22 = vadd.f32 %v1647_v14, %v8850_v15  ;;  %v1712_v31 = vadd.f32 %v1648_v7, %v8852_v42  ;;  %v1545_v18 = vpop.permute.xlu1 %1544  ;;  %v1550_v61 = vpop.permute.xlu0 %1549  ;;  %v8854_v19 = vld [vmem:[#allocation215_spill] sm:$0xff]  ;;  %v8855_v10 = vld [vmem:[#allocation121_spill] sm:$0xff]  ;;  %v8858_v42 = vld [vmem:[#allocation122_spill] sm:$0xff] }
 0x242   : > { %8843 = vst [vmem:[#allocation81_spill] sm:$0xff] %v6654_v53  ;;  %8846 = vst [vmem:[#allocation82_spill] sm:$0xff] %v6658_v46  ;;  %v1713_v56 = vadd.f32 %v1649_v33, %v8853_v23  ;;  %2657 = vmin.xlane.f32.xlu0 %v2656_v3  ;;  %v1650_v13 = vadd.f32 %v6147_v9, %v1545_v18  ;;  %v1651_v20 = vadd.f32 %v6159_v55, %v1545_v18  ;;  %v8857_v14 = vld [vmem:[#allocation221_spill] sm:$0xff]  ;;  %v8860_v33 = vld [vmem:[#allocation222_spill] sm:$0xff] }
 0x243   : > { %8849 = vst [vmem:[#allocation89_spill] sm:$0xff] %v6662_v40  ;;  %8851 = vst [vmem:[#allocation90_spill] sm:$0xff] %v6665_v22  ;;  %v1652_v16 = vadd.f32 %v6147_v9, %v1550_v61  ;;  %v1834_v41 = vadd.f32 %v6642_v47, %v8854_v19  ;;  %v6675_v45 = vadd.f32 %v1712_v31, %v8855_v10  ;;  %2660 = vmin.xlane.f32.xlu1 %v2659_v52  ;;  %v8861_v23 = vld [vmem:[#allocation189_spill] sm:$0xff]  ;;  %v8863_v18 = vld [vmem:[#allocation190_spill] sm:$0xff] }
 0x244   : > { %v1840_v15 = vadd.f32 %v1712_v31, %v8857_v14  ;;  %v6679_v7 = vadd.f32 %v1713_v56, %v8858_v42  ;;  %v1841_v3 = vadd.f32 %v1713_v56, %v8860_v33  ;;  %v6683_v12 = vadd.f32 %v1650_v13, %v8861_v23  ;;  %v8866_v19 = vld [vmem:[#allocation217_spill] sm:$0xff]  ;;  %v8867_v42 = vld [vmem:[#allocation151_spill] sm:$0xff]  ;;  %v8868_v56 = vld [vmem:[#allocation218_spill] sm:$0xff] }
 0x245   : > { %8856 = vst [vmem:[#allocation83_spill] sm:$0xff] %v6675_v45  ;;  %v6686_v37 = vadd.f32 %v1651_v20, %v8863_v18  ;;  %v1716_v53 = vadd.f32 %v1652_v16, %v8865_v26  ;;  %v1835_v10 = vadd.f32 %v6645_v30, %v8866_v19  ;;  %v2665_v45 = vmin.f32 %v1836_v32, %v1837_v2  ;;  %v1555_v52 = vpop.permute.xlu1 %1554  ;;  %v1560_v14 = vpop.permute.xlu0 %1559  ;;  %v8869_v33 = vld [vmem:[#allocation125_spill] sm:$0xff]  ;;  %v8871_v20 = vld [vmem:[#allocation156_spill] sm:$0xff] }
 0x246   : > { %8859 = vst [vmem:[#allocation93_spill] sm:$0xff] %v6679_v7  ;;  %8862 = vst [vmem:[#allocation94_spill] sm:$0xff] %v6683_v12  ;;  %v1653_v31 = vadd.f32 %v6159_v55, %v1550_v61  ;;  %v1838_v7 = vadd.f32 %v6662_v40, %v8867_v42  ;;  %v1839_v13 = vadd.f32 %v6665_v22, %v8868_v56  ;;  %v8872_v32 = vld [vmem:[#allocation192_spill] sm:$0xff]  ;;  %v8873_v42 = vld [vmem:[#allocation193_spill] sm:$0xff] }
 0x247   : > { %8864 = vst [vmem:[#allocation168_spill] sm:$0xff] %v6686_v37  ;;  %v6697_v23 = vadd.f32 %v1716_v53, %v8869_v33  ;;  %v1844_v18 = vadd.f32 %v1716_v53, %v8871_v20  ;;  %v2662_v26 = vmin.f32 %v1834_v41, %v1835_v10  ;;  %v1654_v16 = vadd.f32 %v6147_v9, %v1555_v52  ;;  %v8876_v41 = vld [vmem:[#allocation126_spill] sm:$0xff] }
 0x248   : > { %2666 = vmin.xlane.f32.xlu1 %v2665_v45  ;;  %v1717_v2 = vadd.f32 %v1653_v31, %v8872_v32  ;;  %v1655_v61 = vadd.f32 %v6159_v55, %v1555_v52  ;;  %v1656_v19 = vadd.f32 %v6147_v9, %v1560_v14  ;;  %v2668_v46 = vmin.f32 %v1838_v7, %v1839_v13  ;;  %v8878_v45 = vld [vmem:[#allocation51_spill] sm:$0xff]  ;;  %v8879_v20 = vld [vmem:[#allocation194_spill] sm:$0xff] }
 0x249   : > { %8870 = vst [vmem:[#allocation84_spill] sm:$0xff] %v6697_v23  ;;  %2663 = vmin.xlane.f32.xlu0 %v2662_v26  ;;  %v6705_v40 = vadd.f32 %v1654_v16, %v8873_v42  ;;  %v2671_v56 = vmin.f32 %v1840_v15, %v1841_v3  ;;  %v1657_v33 = vadd.f32 %v6159_v55, %v1560_v14  ;;  %v8875_v23 = vld [vmem:[#allocation219_spill] sm:$0xff]  ;;  %v1565_v13 = vpop.permute.xlu1 %1564  ;;  %v1570_v26 = vpop.permute.xlu0 %1569  ;;  %v8882_v16 = vld [vmem:[#allocation196_spill] sm:$0xff]  ;;  %v8891_v22 = vld [vmem:[#allocation198_spill] sm:$0xff] }
 0x24a   : > { %v1842_v53 = vadd.f32 %v6683_v12, %v8875_v23  ;;  %v6711_v10 = vadd.f32 %v1717_v2, %v8876_v41  ;;  %v1845_v31 = vadd.f32 %v1717_v2, %v8878_v45  ;;  %v6715_v52 = vadd.f32 %v1655_v61, %v8879_v20  ;;  %v8881_v32 = vld [vmem:[#allocation195_spill] sm:$0xff]  ;;  %v8883_v23 = vld [vmem:[#allocation129_spill] sm:$0xff]  ;;  %v8886_v61 = vld [vmem:[#allocation220_spill] sm:$0xff] }
 0x24b   : > { %8874 = vst [vmem:[#allocation97_spill] sm:$0xff] %v6705_v40  ;;  %v1720_v7 = vadd.f32 %v1656_v19, %v8881_v32  ;;  %v1721_v42 = vadd.f32 %v1657_v33, %v8882_v16  ;;  %v1658_v15 = vadd.f32 %v6147_v9, %v1565_v13  ;;  %v1659_v3 = vadd.f32 %v6159_v55, %v1565_v13  ;;  %v8887_v20 = vld [vmem:[#allocation130_spill] sm:$0xff]  ;;  %v8889_v33 = vld [vmem:[#allocation228_spill] sm:$0xff]  ;;  %v8890_v12 = vld [vmem:[#allocation197_spill] sm:$0xff] }
 0x24c   : > { %8877 = vst [vmem:[#allocation98_spill] sm:$0xff] %v6711_v10  ;;  %8880 = vst [vmem:[#allocation101_spill] sm:$0xff] %v6715_v52  ;;  %v1660_v14 = vadd.f32 %v6147_v9, %v1570_v26  ;;  %v8885_v10 = vld [vmem:[#allocation227_spill] sm:$0xff]  ;;  %2672 = vmin.xlane.f32.xlu1 %v2671_v56  ;;  %v1843_v45 = vadd.f32 %v6686_v37, %v8886_v61  ;;  %v2677_v19 = vmin.f32 %v1844_v18, %v1845_v31 }
 0x24d   : > { %v6723_v41 = vadd.f32 %v1720_v7, %v8883_v23  ;;  %v1848_v2 = vadd.f32 %v1720_v7, %v8885_v10  ;;  %2669 = vmin.xlane.f32.xlu0 %v2668_v46  ;;  %v6729_v32 = vadd.f32 %v1721_v42, %v8887_v20  ;;  %v1849_v16 = vadd.f32 %v1721_v42, %v8889_v33  ;;  %v8892_v23 = vld [vmem:[#allocation199_spill] sm:$0xff]  ;;  %v1575_v7 = vpop.permute.xlu1 %1574  ;;  %v1580_v61 = vpop.permute.xlu0 %1579 }
 0x24e   : > { %v6733_v13 = vadd.f32 %v1658_v15, %v8890_v12  ;;  %v6736_v30 = vadd.f32 %v1659_v3, %v8891_v22  ;;  %v2674_v10 = vmin.f32 %v1842_v53, %v1843_v45  ;;  %v1661_v56 = vadd.f32 %v6159_v55, %v1570_v26  ;;  %v8893_v18 = vld [vmem:[#allocation223_spill] sm:$0xff]  ;;  %v8894_v15 = vld [vmem:[#allocation224_spill] sm:$0xff]  ;;  %v8895_v3 = vld [vmem:[#allocation133_spill] sm:$0xff] }
 0x24f   : > { %8884 = vst [vmem:[#allocation102_spill] sm:$0xff] %v6723_v41  ;;  %8888 = vst [vmem:[#allocation169_spill] sm:$0xff] %v6729_v32  ;;  %v1724_v41 = vadd.f32 %v1660_v14, %v8892_v23  ;;  %v1846_v46 = vadd.f32 %v6705_v40, %v8893_v18  ;;  %v1662_v31 = vadd.f32 %v6147_v9, %v1575_v7  ;;  %v8897_v53 = vld [vmem:[#allocation161_spill] sm:$0xff]  ;;  %v8898_v26 = vld [vmem:[#allocation200_spill] sm:$0xff] }
 0x250   : > { %v1663_v42 = vadd.f32 %v6159_v55, %v1575_v7  ;;  %v1664_v12 = vadd.f32 %v6147_v9, %v1580_v61  ;;  %v1847_v22 = vadd.f32 %v6715_v52, %v8894_v15  ;;  %2678 = vmin.xlane.f32.xlu1 %v2677_v19  ;;  %v1725_v45 = vadd.f32 %v1661_v56, %v8898_v26  ;;  %v8899_v23 = vld [vmem:[#allocation201_spill] sm:$0xff]  ;;  %v8900_v32 = vld [vmem:[#allocation202_spill] sm:$0xff]  ;;  %v8901_v40 = vld [vmem:[#allocation203_spill] sm:$0xff] }
 0x251   : > { %v6748_v20 = vadd.f32 %v1724_v41, %v8895_v3  ;;  %v1852_v14 = vadd.f32 %v1724_v41, %v8897_v53  ;;  %v2683_v33 = vmin.f32 %v1848_v2, %v1849_v16  ;;  %2675 = vmin.xlane.f32.xlu0 %v2674_v10  ;;  %v6753_v18 = vadd.f32 %v1662_v31, %v8899_v23  ;;  %v8902_v15 = vld [vmem:[#allocation134_spill] sm:$0xff]  ;;  %v1585_v19 = vpop.permute.xlu1 %1584  ;;  %v1590_v56 = vpop.permute.xlu0 %1589  ;;  %v8905_v10 = vld [vmem:[#allocation137_spill] sm:$0xff] }
 0x252   : > { %v6756_v7 = vadd.f32 %v1663_v42, %v8900_v32  ;;  %v1728_v37 = vadd.f32 %v1664_v12, %v8901_v40  ;;  %v2680_v47 = vmin.f32 %v1846_v46, %v1847_v22  ;;  %v6760_v52 = vadd.f32 %v1725_v45, %v8902_v15  ;;  %v8903_v3 = vld [vmem:[#allocation162_spill] sm:$0xff]  ;;  %v8907_v42 = vld [vmem:[#allocation204_spill] sm:$0xff] }
 0x253   : > { %8896 = vst [vmem:[#allocation170_spill] sm:$0xff] %v6748_v20  ;;  %v1853_v20 = vadd.f32 %v1725_v45, %v8903_v3  ;;  %v1665_v41 = vadd.f32 %v6159_v55, %v1580_v61  ;;  %v8904_v2 = vld [vmem:[#allocation154_spill] sm:$0xff]  ;;  %v1666_v40 = vadd.f32 %v6147_v9, %v1585_v19  ;;  %v1667_v46 = vadd.f32 %v6159_v55, %v1585_v19  ;;  %v8908_v61 = vld [vmem:[#allocation225_spill] sm:$0xff] }
 0x254   : > { %v1850_v16 = vadd.f32 %v6733_v13, %v8904_v2  ;;  %v6767_v31 = vadd.f32 %v1728_v37, %v8905_v10  ;;  %v1856_v32 = vadd.f32 %v1728_v37, %v6444_v17  ;;  %2684 = vmin.xlane.f32.xlu1 %v2683_v33  ;;  %v1668_v22 = vadd.f32 %v6147_v9, %v1590_v56  ;;  %v8909_v45 = vld [vmem:[#allocation205_spill] sm:$0xff]  ;;  %v8910_v15 = vld [vmem:[#allocation206_spill] sm:$0xff]  ;;  %v8914_v10 = vld [vmem:[#allocation207_spill] sm:$0xff] }
 0x255   : > { %v1729_v12 = vadd.f32 %v1665_v41, %v8907_v42  ;;  %v1851_v53 = vadd.f32 %v6736_v30, %v8908_v61  ;;  %v2689_v26 = vmin.f32 %v1852_v14, %v1853_v20  ;;  %2681 = vmin.xlane.f32.xlu0 %v2680_v47  ;;  %v6777_v23 = vadd.f32 %v1666_v40, %v8909_v45  ;;  %v8911_v37 = vld [vmem:[#allocation226_spill] sm:$0xff]  ;;  %v1595_v47 = vpop.permute.xlu1 %1594  ;;  %v8915_v14 = vld [vmem:[#allocation208_spill] sm:$0xff] }
 0x256   : > { %8906 = vst [vmem:[#allocation172_spill] sm:$0xff] %v6767_v31  ;;  %v6780_v3 = vadd.f32 %v1667_v46, %v8910_v15  ;;  %v1669_v17 = vadd.f32 %v6159_v55, %v1590_v56  ;;  %v1854_v33 = vadd.f32 %v6753_v18, %v8911_v37  ;;  %v8912_v19 = vld [vmem:[#allocation138_spill] sm:$0xff]  ;;  %v1732_v42 = vadd.f32 %v1668_v22, %v8914_v10  ;;  %v8917_v15 = vld [vmem:[#allocation139_spill] sm:$0xff]  ;;  %v8921_v22 = vld [vmem:[#allocation140_spill] sm:$0xff] }
 0x257   : > { %v6786_v41 = vadd.f32 %v1729_v12, %v8912_v19  ;;  %v1857_v2 = vadd.f32 %v1729_v12, %v6467_v6  ;;  %v2686_v20 = vmin.f32 %v1850_v16, %v1851_v53  ;;  %v1670_v61 = vadd.f32 %v6147_v9, %v1595_v47  ;;  %v8916_v46 = vld [vmem:[#allocation158_spill] sm:$0xff]  ;;  %v8919_v19 = vld [vmem:[#allocation164_spill] sm:$0xff]  ;;  %v8920_v12 = vld [vmem:[#allocation159_spill] sm:$0xff] }
 0x258   : > { %v1733_v40 = vadd.f32 %v1669_v17, %v8915_v14  ;;  %v1855_v45 = vadd.f32 %v6756_v7, %v8916_v46  ;;  %v1671_v56 = vadd.f32 %v6159_v55, %v1595_v47  ;;  %v6796_v37 = vadd.f32 %v1732_v42, %v8917_v15  ;;  %2690 = vmin.xlane.f32.xlu1 %v2689_v26  ;;  %v8922_v9 = vld [vmem:[#allocation165_spill] sm:$0xff]  ;;  %v8924_v55 = vld [vmem:[#allocation210_spill] sm:$0xff]  ;;  %v8925_v15 = vld [vmem:[#allocation160_spill] sm:$0xff] }
 0x259   : > { %8913 = vst [vmem:[#allocation211_spill] sm:$0xff] %v6786_v41  ;;  %v1860_v31 = vadd.f32 %v1732_v42, %v8919_v19  ;;  %v2695_v6 = vmin.f32 %v1856_v32, %v1857_v2  ;;  %v1858_v16 = vadd.f32 %v6777_v23, %v8920_v12  ;;  %2687 = vmin.xlane.f32.xlu0 %v2686_v20  ;;  %v8923_v10 = vld [vmem:[#allocation209_spill] sm:$0xff]  ;;  %v8927_v20 = vld [vmem:[#allocation166_spill] sm:$0xff]  ;;  %v8928_v12 = vld [vmem:[#allocation87_spill] sm:$0xff] }
 0x25a   : > { %8918 = vst [vmem:[#allocation212_spill] sm:$0xff] %v6796_v37  ;;  %v6802_v53 = vadd.f32 %v1733_v40, %v8921_v22  ;;  %v1861_v17 = vadd.f32 %v1733_v40, %v8922_v9  ;;  %v1734_v14 = vadd.f32 %v1670_v61, %v8923_v10  ;;  %v2692_v46 = vmin.f32 %v1854_v33, %v1855_v45  ;;  %v8926_v2 = vld [vmem:[#allocation141_spill] sm:$0xff]  ;;  %v8929_v61 = vld [vmem:[#allocation142_spill] sm:$0xff]  ;;  %v8931_v10 = vld [vmem:[#allocation88_spill] sm:$0xff] }
 0x25b   : > { %v1735_v47 = vadd.f32 %v1671_v56, %v8924_v55  ;;  %v1859_v37 = vadd.f32 %v6780_v3, %v8925_v15  ;;  %v6819_v33 = vadd.f32 %v6490_v11, %v8928_v12  ;;  %v8930_v56 = vld [vmem:[#allocation167_spill] sm:$0xff]  ;;  %v1747_v55 = vadd.f32 %v6493_v54, %v8931_v10  ;;  %v8944_v10 = vld [vmem:[#allocation86_spill] sm:$0xff] }
 0x25c   : > { %v6814_v42 = vadd.f32 %v1734_v14, %v8926_v2  ;;  %v1862_v19 = vadd.f32 %v1734_v14, %v8927_v20  ;;  %v2701_v40 = vmin.f32 %v1860_v31, %v1861_v17  ;;  %2696 = vmin.xlane.f32.xlu1 %v2695_v6  ;;  %v2469_v15 = vmin.f32 %v6503_v39, %v6507_v0  ;;  %v8932_v14 = vld [vmem:[#allocation91_spill] sm:$0xff]  ;;  %v8933_v17 = vld [vmem:[#allocation92_spill] sm:$0xff] }
 0x25d   : > { %v6822_v45 = vadd.f32 %v1735_v47, %v8929_v61  ;;  %v1863_v22 = vadd.f32 %v1735_v47, %v8930_v56  ;;  %v2698_v9 = vmin.f32 %v1858_v16, %v1859_v37  ;;  %2693 = vmin.xlane.f32.xlu0 %v2692_v46  ;;  %v1750_v31 = vadd.f32 %v6519_v63, %v8932_v14  ;;  %v8934_v54 = vld [vmem:[#allocation95_spill] sm:$0xff]  ;;  %v8935_v0 = vld [vmem:[#allocation96_spill] sm:$0xff]  ;;  %v8942_v56 = vld [vmem:[#allocation85_spill] sm:$0xff] }
 0x25e   : > { %v1751_v11 = vadd.f32 %v6522_v27, %v8933_v17  ;;  %v2475_v6 = vmin.f32 %v6533_v36, %v6538_v50  ;;  %v2466_v47 = vmin.f32 %v6819_v33, %v1747_v55  ;;  %v6840_v16 = vadd.f32 %v6542_v4, %v8934_v54  ;;  %v8936_v46 = vld [vmem:[#allocation99_spill] sm:$0xff]  ;;  %v8937_v36 = vld [vmem:[#allocation100_spill] sm:$0xff]  ;;  %v8945_v14 = vld [vmem:[#allocation82_spill] sm:$0xff] }
 0x25f   : > { %v2704_v2 = vmin.f32 %v1862_v19, %v1863_v22  ;;  %v6844_v63 = vadd.f32 %v6545_v8, %v8935_v0  ;;  %v6848_v27 = vadd.f32 %v6565_v38, %v8936_v46  ;;  %v6852_v50 = vadd.f32 %v6568_v57, %v8937_v36  ;;  %v8939_v19 = vld [vmem:[#allocation103_spill] sm:$0xff]  ;;  %v8940_v8 = vld [vmem:[#allocation104_spill] sm:$0xff]  ;;  %v8948_v54 = vld [vmem:[#allocation89_spill] sm:$0xff] }
 0x260   : > { %v2472_v39 = vmin.f32 %v1750_v31, %v1751_v11  ;;  %v8938_v20 = vmin.f32 %v6430_v21, %v6433_v5  ;;  %v6861_v12 = vadd.f32 %v6586_v62, %v8939_v19  ;;  %v6865_v33 = vadd.f32 %v6589_v28, %v8940_v8  ;;  %v8941_v61 = vld [vmem:[#allocation111_spill] sm:$0xff]  ;;  %v8946_v31 = vld [vmem:[#allocation81_spill] sm:$0xff]  ;;  %v8949_v46 = vld [vmem:[#allocation116_spill] sm:$0xff] }
 0x261   : > { %2699 = vmin.xlane.f32.xlu0 %v2698_v9  ;;  %v6881_v22 = vadd.f32 %v8942_v56, %v8941_v61  ;;  %v8943_v9 = vld [vmem:[#allocation112_spill] sm:$0xff]  ;;  %v8947_v11 = vld [vmem:[#allocation115_spill] sm:$0xff]  ;;  %v8950_v36 = vld [vmem:[#allocation90_spill] sm:$0xff] }
 0x262   : > { %2452 = vmin.xlane.f32.xlu1 %v8938_v20  ;;  %v6885_v55 = vadd.f32 %v8944_v10, %v8943_v9  ;;  %v6891_v0 = vadd.f32 %v8948_v54, %v8947_v11  ;;  %v6895_v20 = vadd.f32 %v8950_v36, %v8949_v46  ;;  %v8951_v19 = vld [vmem:[#allocation93_spill] sm:$0xff]  ;;  %v8952_v8 = vld [vmem:[#allocation83_spill] sm:$0xff]  ;;  %v8954_v56 = vld [vmem:[#allocation94_spill] sm:$0xff] }
 0x263   : > { %v8953_v61 = vld [vmem:[#allocation119_spill] sm:$0xff]  ;;  %v8955_v10 = vld [vmem:[#allocation120_spill] sm:$0xff]  ;;  %v8957_v11 = vld [vmem:[#allocation98_spill] sm:$0xff] }
 0x264   : > { %v6901_v5 = vadd.f32 %v8954_v56, %v8953_v61  ;;  %v8956_v17 = vld [vmem:[#allocation168_spill] sm:$0xff]  ;;  %v8959_v46 = vld [vmem:[#allocation123_spill] sm:$0xff]  ;;  %v8960_v36 = vld [vmem:[#allocation97_spill] sm:$0xff] }
 0x265   : > { %v6907_v38 = vadd.f32 %v8956_v17, %v8955_v10  ;;  %v8958_v54 = vld [vmem:[#allocation84_spill] sm:$0xff]  ;;  %v6913_v4 = vadd.f32 %v8960_v36, %v8959_v46  ;;  %v8961_v62 = vld [vmem:[#allocation163_spill] sm:$0xff]  ;;  %v8962_v21 = vld [vmem:[#allocation157_spill] sm:$0xff] }
 0x266   : > { %2702 = vmin.xlane.f32.xlu1 %v2701_v40  ;;  %v8963_v57 = vmin.f32 %v8961_v62, %v8962_v21  ;;  %v8964_v61 = vld [vmem:[#allocation124_spill] sm:$0xff]  ;;  %v8965_v56 = vld [vmem:[#allocation101_spill] sm:$0xff]  ;;  %v8967_v10 = vld [vmem:[#allocation102_spill] sm:$0xff] }
 0x267   : > { %v6922_v9 = vadd.f32 %v8965_v56, %v8964_v61  ;;  %v8966_v17 = vld [vmem:[#allocation169_spill] sm:$0xff]  ;;  %v8968_v32 = vld [vmem:[#allocation127_spill] sm:$0xff]  ;;  %v8969_v36 = vld [vmem:[#allocation128_spill] sm:$0xff] }
 0x268   : > { %2455 = vmin.xlane.f32.xlu0 %v8963_v57  ;;  %v6928_v28 = vadd.f32 %v6733_v13, %v8968_v32  ;;  %v6934_v57 = vadd.f32 %v6736_v30, %v8969_v36  ;;  %v8970_v21 = vld [vmem:[#allocation170_spill] sm:$0xff]  ;;  %v8971_v40 = vld [vmem:[#allocation131_spill] sm:$0xff]  ;;  %v8972_v37 = vld [vmem:[#allocation132_spill] sm:$0xff] }
 0x269   : > { %v6940_v61 = vadd.f32 %v6753_v18, %v8971_v40  ;;  %v6946_v13 = vadd.f32 %v6756_v7, %v8972_v37  ;;  %v8973_v32 = vld [vmem:[#allocation172_spill] sm:$0xff]  ;;  %v8974_v26 = vld [vmem:[#allocation135_spill] sm:$0xff]  ;;  %v8985_v37 = vld [vmem:[#allocation21_spill] sm:$0xff]  ;;  %v9052_v36 = vmin.f32 %v6913_v4, %v6922_v9 }
 0x26a   : > { %v6952_v30 = vadd.f32 %v6777_v23, %v8974_v26  ;;  %2705 = vmin.xlane.f32.xlu1 %v2704_v2  ;;  %v8975_v18 = vld [vmem:[#allocation136_spill] sm:$0xff]  ;;  %v8977_v46 = vld [vmem:[#allocation79_spill] sm:$0xff]  ;;  %v8981_v2 = vmin.f32 %v6500_v59, %v6526_v35  ;;  %v8990_v59 = vmov 0  ;;  %v2857_v35 = vstv %s2856_s5  ;;  %v9050_v23 = vld [vmem:[#allocation54_spill] sm:$0xff] }
 0x26b   : > { %v6958_v40 = vadd.f32 %v6780_v3, %v8975_v18  ;;  %v8976_v62 = vld [vmem:[#allocation212_spill] sm:$0xff]  ;;  %v8980_v3 = vmin.f32 %v6482_v25, %v6486_v34  ;;  %v8984_v18 = vld [vmem:[#allocation19_spill] sm:$0xff]  ;;  %v2822_v25 = vstv %s2821_s24  ;;  %vm7017_vm4 = vcmp.eq.s32.totalorder %v2857_v35, 1  ;;  %s4426_s24 = sshll.u32 %s4533_s21, 4  ;;  %s4427_s24 = int_to_ptr.vmem [resolvable:$false] %s4426_s24 }
 0x26c   : > { %v8978_v56 = vld [vmem:[#allocation80_spill] sm:$0xff]  ;;  %v4193_v7 = vpack.i.bf16 %v8985_v37, %v8984_v18  ;;  %vm6988_vm3 = vcmp.eq.s32.totalorder %v2822_v25, 1  ;;  %vm8995_vm13 = vcmp.gt.f32.partialorder %v8984_v18, 0.5  ;;  %v9000_v35 = vmin.f32 %v6557_v44, %v6561_v58  ;;  %s4428_s5 = scalar_lea.vmem %s4427_s24, 256 }
 0x26d   : > { %v8979_v41 = vmin.f32 %v8977_v46, %v8978_v56  ;;  %v8982_v46 = vld [vmem:[#allocation20_spill] sm:$0xff]  ;;  %vm7009_vm2 = vmxor %vm8995_vm13, %vm8988_vm0  ;;  %v9001_v26 = vmin.f32 %v6840_v16, %v6844_v63 }
 0x26e   : > { %2464 = vmin.xlane.f32.xlu1 %v8980_v3  ;;  %vm8989_vm1 = vcmp.gt.f32.partialorder %v8982_v46, 0.5  ;;  %vm2826_vm13 = vmor %vm7009_vm2, %vm6988_vm3  ;;  %v9005_v58 = vld [vmem:[#allocation24_spill] sm:$0xff] }
 0x26f   : > { %2458 = vmin.xlane.f32.xlu0 %v8979_v41  ;;  %v8983_v41 = vld [vmem:[#allocation22_spill] sm:$0xff]  ;;  %vm6995_vm7 = vmxor %vm8989_vm1, %vm8988_vm0 }
 0x270   : > { %v4188_v56 = vpack.i.bf16 %v8983_v41, %v8982_v46  ;;  %v8991_v59 = vsel %vm6995_vm7, 4294967295, %v8990_v59  ;;  %vm8992_vm5 = vcmp.gt.f32.partialorder %v8983_v41, 0.5  ;;  %vm2824_vm1 = vmor %vm6995_vm7, %vm6988_vm3 }
 0x271   : > { %vm7002_vm8 = vmxor %vm8992_vm5, %vm8988_vm0 }
 0x272   : > { %2470 = vmin.xlane.f32.xlu1 %v2469_v15  ;;  %v8993_v15 = vmov 0  ;;  %vm2825_vm5 = vmor %vm7002_vm8, %vm6988_vm3 }
 0x273   : > { %2461 = vmin.xlane.f32.xlu0 %v8981_v2  ;;  %v8994_v15 = vsel %vm7002_vm8, 4294967295, %v8993_v15  ;;  %vm2859_vm6 = vmand %vm7017_vm4, %vm2824_vm1 }
 0x274   : > { %vm2860_vm7 = vmand %vm7017_vm4, %vm2825_vm5  ;;  %vm9006_vm5 = vcmp.gt.f32.partialorder %v9005_v58, 0.5 }
 0x275   : > { %vm2861_vm8 = vmand %vm7017_vm4, %vm2826_vm13 }
 0x276   : > { %vm7060_vm13 = vmxor %vm9006_vm5, %vm8988_vm0 }
 0x277   : > { %2467 = vmin.xlane.f32.xlu0 %v2466_v47  ;;  %vm2830_vm5 = vmor %vm4906_vm11, %vm6988_vm3 }
 0x27b   : > { %2473 = vmin.xlane.f32.xlu0 %v2472_v39 }
 0x27f   : > { %2476 = vmin.xlane.f32.xlu0 %v2475_v6 }
 0x283   : > { %4189 = vrot.lane.b32.xlu1 %v4188_v56, %s4530_s30 }
 0x287   : > { %4194 = vrot.lane.b32.xlu1 %v4193_v7, %s4530_s30 }
 0x2aa   : > { %v2616_v7 = vpop.xlane.xlu1 %2615 }
 0x2ab   : > { %v2924_v2 = vsel %vm2860_vm7, %v2616_v7, 0.0 }
 0x2ac   : > { %v2613_v39 = vpop.xlane.xlu0 %2612  ;;  %2989 = vrot.lane.b32.xlu1 %v2924_v2, %s4530_s30 }
 0x2ad   : > { %v2923_v3 = vsel %vm2859_vm6, %v2613_v39, 0.0  ;;  %vm9002_vm6 = vcmp.gt.f32.partialorder %v8985_v37, 0.5 }
 0x2ae   : > { %2987 = vrot.lane.b32.xlu0 %v2923_v3, %s4530_s30  ;;  %vm7047_vm7 = vmxor %vm9002_vm6, %vm8988_vm0 }
 0x2af   : > { %vm2828_vm6 = vmor %vm7060_vm13, %vm6988_vm3 }
 0x2b0   : > { %v2619_v56 = vpop.xlane.xlu0 %2618  ;;  %vm2829_vm0 = vmor %vm4871_vm9, %vm6988_vm3 }
 0x2b1   : > { %v2925_v25 = vsel %vm2861_vm8, %v2619_v56, 0.0  ;;  %vm2827_vm8 = vmor %vm7047_vm7, %vm6988_vm3  ;;  %v9010_v56 = vmin.f32 %v6848_v27, %v6852_v50  ;;  %v9015_v50 = vld [vmem:[#allocation33_spill] sm:$0xff] }
 0x2b2   : > { %2991 = vrot.lane.b32.xlu0 %v2925_v25, %s4530_s30  ;;  %vm2862_vm1 = vmand %vm7017_vm4, %vm2827_vm8  ;;  %v9011_v25 = vmin.f32 %v6577_v1, %v6596_v49 }
 0x2b3   : > { %vm2863_vm8 = vmand %vm7017_vm4, %vm2828_vm6 }
 0x2b4   : > { %v2625_v3 = vpop.xlane.xlu1 %2624  ;;  %vm2865_vm6 = vmand %vm7017_vm4, %vm2830_vm5 }
 0x2b5   : > { %v2927_v2 = vsel %vm2863_vm8, %v2625_v3, 0.0  ;;  %v9014_v3 = vld [vmem:[#allocation25_spill] sm:$0xff]  ;;  %vm2831_vm8 = vmor %vm4888_vm10, %vm6988_vm3 }
 0x2b6   : > { %v2622_v44 = vpop.xlane.xlu0 %2621 }
 0x2b7   : > { %v2926_v63 = vsel %vm2862_vm1, %v2622_v44, 0.0  ;;  %vm2864_vm1 = vmand %vm7017_vm4, %vm2829_vm0 }
 0x2b8   : > { %v2631_v1 = vpop.xlane.xlu1 %2630  ;;  %vm2866_vm0 = vmand %vm7017_vm4, %vm2831_vm8 }
 0x2b9   : > { %v2929_v49 = vsel %vm2865_vm6, %v2631_v1, 0.0  ;;  %v9020_v1 = vld [vmem:[#allocation27_spill] sm:$0xff]  ;;  %vm2833_vm6 = vmor %vm4919_vm14, %vm6988_vm3 }
 0x2ba   : > { %v2628_v44 = vpop.xlane.xlu0 %2627  ;;  %vm2868_vm8 = vmand %vm7017_vm4, %vm2833_vm6 }
 0x2d0   : > { %2479 = vmin.xlane.f32.xlu1 %v9001_v26  ;;  %v9009_v26 = vld [vmem:[#allocation23_spill] sm:$0xff] }
 0x2d1   : > { %2482 = vmin.xlane.f32.xlu0 %v9000_v35  ;;  %v4198_v7 = vpack.i.bf16 %v9009_v26, %v9005_v58  ;;  %v9012_v35 = vld [vmem:[#allocation29_spill] sm:$0xff] }
 0x2e1   : > { %2993 = vrot.lane.b32.xlu1 %v2926_v63, %s4530_s30  ;;  %v2928_v63 = vsel %vm2864_vm1, %v2628_v44, 0.0  ;;  %v2634_v44 = vpop.xlane.xlu0 %2633  ;;  %vm2832_vm1 = vmor %vm4929_vm15, %vm6988_vm3  ;;  %vm9110_vm15 = vnez %v8991_v59 }
 0x2e2   : > { %vm2867_vm5 = vmand %vm7017_vm4, %vm2832_vm1 }
 0x2e7   : > { %4199 = vrot.lane.b32.xlu0 %v4198_v7, %s4530_s30  ;;  %v9013_v7 = vld [vmem:[#allocation26_spill] sm:$0xff] }
 0x2e8   : > { %v4203_v27 = vpack.i.bf16 %v9014_v3, %v9013_v7 }
 0x2eb   : > { %2995 = vrot.lane.b32.xlu0 %v2927_v2, %s4530_s30  ;;  %v9016_v2 = vmin.f32 %v6861_v12, %v6865_v33  ;;  %v9021_v33 = vld [vmem:[#allocation37_spill] sm:$0xff] }
 0x305   : > { %2485 = vmin.xlane.f32.xlu1 %v9010_v56  ;;  %v9017_v56 = vmin.f32 %v6605_v48, %v6609_v29  ;;  %v2637_v48 = vpop.xlane.xlu1 %2636 }
 0x306   : > { %v2931_v29 = vsel %vm2867_vm5, %v2637_v48, 0.0  ;;  %v9026_v48 = vld [vmem:[#allocation30_spill] sm:$0xff] }
 0x30a   : > { %2488 = vmin.xlane.f32.xlu0 %v9011_v25  ;;  %v9018_v25 = vld [vmem:[#allocation31_spill] sm:$0xff] }
 0x316   : > { %2997 = vrot.lane.b32.xlu1 %v2928_v63, %s4530_s30  ;;  %v2930_v63 = vsel %vm2866_vm0, %v2634_v44, 0.0  ;;  %v2640_v44 = vpop.xlane.xlu0 %2639  ;;  %vm2834_vm0 = vmor %vm4958_vm12, %vm6988_vm3 }
 0x317   : > { %vm2869_vm1 = vmand %vm7017_vm4, %vm2834_vm0 }
 0x320   : > { %4204 = vrot.lane.b32.xlu0 %v4203_v27, %s4530_s30  ;;  %v9019_v27 = vld [vmem:[#allocation28_spill] sm:$0xff] }
 0x321   : > { %v4208_v12 = vpack.i.bf16 %v9020_v1, %v9019_v27  ;;  %v9068_v1 = vmin.f32 %v6940_v61, %v6946_v13 }
 0x324   : > { %2999 = vrot.lane.b32.xlu0 %v2929_v49, %s4530_s30  ;;  %v9022_v49 = vmin.f32 %v6621_v24, %v6629_v51  ;;  %v9027_v51 = vld [vmem:[#allocation41_spill] sm:$0xff] }
 0x33a   : > { %2491 = vmin.xlane.f32.xlu1 %v9016_v2  ;;  %v9023_v2 = vld [vmem:[#allocation35_spill] sm:$0xff] }
 0x343   : > { %2494 = vmin.xlane.f32.xlu0 %v9017_v56  ;;  %v9024_v56 = vmin.f32 %v6625_v60, %v6638_v43  ;;  %v2643_v60 = vpop.xlane.xlu1 %2642 }
 0x344   : > { %v2933_v43 = vsel %vm2869_vm1, %v2643_v60, 0.0  ;;  %v9033_v60 = vld [vmem:[#allocation34_spill] sm:$0xff] }
 0x34b   : > { %3001 = vrot.lane.b32.xlu1 %v2930_v63, %s4530_s30  ;;  %v2932_v63 = vsel %vm2868_vm8, %v2640_v44, 0.0  ;;  %v9031_v44 = vmin.f32 %v8946_v31, %v8945_v14  ;;  %v2649_v14 = vpop.xlane.xlu1 %2648  ;;  %v9037_v31 = vld [vmem:[#allocation43_spill] sm:$0xff] }
 0x359   : > { %4209 = vrot.lane.b32.xlu0 %v4208_v12, %s4530_s30  ;;  %v9025_v12 = vld [vmem:[#allocation32_spill] sm:$0xff] }
 0x35a   : > { %v4213_v24 = vpack.i.bf16 %v9026_v48, %v9025_v12 }
 0x35d   : > { %3003 = vrot.lane.b32.xlu0 %v2931_v29, %s4530_s30  ;;  %v9028_v29 = vmin.f32 %v6881_v22, %v6885_v55  ;;  %v9034_v55 = vld [vmem:[#allocation45_spill] sm:$0xff] }
 0x35e   : > { %vm9035_vm0 = vnez %v9034_v55 }
 0x35f   : > { %vm2836_vm1 = vmor %vm9035_vm0, %vm6988_vm3 }
 0x36f   : > { %2497 = vmin.xlane.f32.xlu1 %v9022_v49  ;;  %v9029_v49 = vld [vmem:[#allocation39_spill] sm:$0xff] }
 0x370   : > { %vm9030_vm5 = vnez %v9029_v49 }
 0x371   : > { %vm2835_vm6 = vmor %vm9030_vm5, %vm6988_vm3 }
 0x372   : > { %vm2870_vm8 = vmand %vm7017_vm4, %vm2835_vm6 }
 0x373   : > { %vm2871_vm6 = vmand %vm7017_vm4, %vm2836_vm1 }
 0x37c   : > { %2500 = vmin.xlane.f32.xlu0 %v9024_v56  ;;  %v2646_v56 = vpop.xlane.xlu0 %2645 }
 0x380   : > { %3005 = vrot.lane.b32.xlu1 %v2932_v63, %s4530_s30  ;;  %v2934_v63 = vsel %vm2870_vm8, %v2646_v56, 0.0  ;;  %vm9038_vm8 = vnez %v9037_v31  ;;  %v2935_v56 = vsel %vm2871_vm6, %v2649_v14, 0.0  ;;  %v9066_v31 = vld [vmem:[#allocation62_spill] sm:$0xff] }
 0x381   : > { %vm2837_vm5 = vmor %vm9038_vm8, %vm6988_vm3 }
 0x382   : > { %vm2872_vm0 = vmand %vm7017_vm4, %vm2837_vm5 }
 0x392   : > { %4214 = vrot.lane.b32.xlu0 %v4213_v24, %s4530_s30  ;;  %v9032_v24 = vld [vmem:[#allocation36_spill] sm:$0xff] }
 0x393   : > { %v4218_v22 = vpack.i.bf16 %v9033_v60, %v9032_v24  ;;  %v9065_v24 = vld [vmem:[#allocation50_spill] sm:$0xff] }
 0x396   : > { %3007 = vrot.lane.b32.xlu0 %v2933_v43, %s4530_s30  ;;  %v9036_v43 = vmin.f32 %v6891_v0, %v6895_v20  ;;  %v2652_v0 = vpop.xlane.xlu0 %2651 }
 0x397   : > { %v2936_v20 = vsel %vm2872_vm0, %v2652_v0, 0.0  ;;  %v9045_v0 = vld [vmem:[#allocation48_spill] sm:$0xff] }
 0x398   : > { %vm9046_vm5 = vnez %v9045_v0 }
 0x399   : > { %vm2839_vm0 = vmor %vm9046_vm5, %vm6988_vm3 }
 0x39a   : > { %v2658_v14 = vpop.xlane.xlu0 %2657 }
 0x3a4   : > { %2503 = vmin.xlane.f32.xlu1 %v9028_v29  ;;  %v9039_v29 = vmin.f32 %v8952_v8, %v8951_v19  ;;  %v2655_v19 = vpop.xlane.xlu1 %2654 }
 0x3b5   : > { %2506 = vmin.xlane.f32.xlu0 %v9031_v44  ;;  %3009 = vrot.lane.b32.xlu1 %v2934_v63, %s4530_s30  ;;  %v9040_v44 = vld [vmem:[#allocation40_spill] sm:$0xff]  ;;  %v9041_v63 = vld [vmem:[#allocation38_spill] sm:$0xff] }
 0x3b9   : > { %2509 = vmin.xlane.f32.xlu0 %v9036_v43  ;;  %4219 = vrot.lane.b32.xlu1 %v4218_v22, %s4530_s30  ;;  %v4223_v22 = vpack.i.bf16 %v9041_v63, %v9040_v44  ;;  %v9042_v43 = vld [vmem:[#allocation49_spill] sm:$0xff]  ;;  %v9056_v63 = vld [vmem:[#allocation47_spill] sm:$0xff] }
 0x3ba   : > { %vm9043_vm1 = vnez %v9042_v43  ;;  %v9064_v43 = vld [vmem:[#allocation53_spill] sm:$0xff] }
 0x3bb   : > { %vm2838_vm8 = vmor %vm9043_vm1, %vm6988_vm3 }
 0x3bc   : > { %vm2873_vm6 = vmand %vm7017_vm4, %vm2838_vm8 }
 0x3bd   : > { %2512 = vmin.xlane.f32.xlu0 %v9039_v29  ;;  %3011 = vrot.lane.b32.xlu1 %v2935_v56, %s4530_s30  ;;  %v2937_v8 = vsel %vm2873_vm6, %v2655_v19, 0.0  ;;  %v9044_v29 = vmin.f32 %v6901_v5, %v6907_v38  ;;  %v2664_v56 = vpop.xlane.xlu0 %2663  ;;  %vm2874_vm8 = vmand %vm7017_vm4, %vm2839_vm0  ;;  %v9048_v38 = vld [vmem:[#allocation44_spill] sm:$0xff]  ;;  %v9049_v5 = vld [vmem:[#allocation42_spill] sm:$0xff]  ;;  %vm9051_vm6 = vnez %v9050_v23 }
 0x3be   : > { %v2938_v19 = vsel %vm2874_vm8, %v2658_v14, 0.0  ;;  %vm2840_vm5 = vmor %vm9051_vm6, %vm6988_vm3  ;;  %v9055_v14 = vmin.f32 %v8967_v10, %v8966_v17  ;;  %v9057_v17 = vld [vmem:[#allocation46_spill] sm:$0xff] }
 0x3bf   : > { %vm2875_vm0 = vmand %vm7017_vm4, %vm2840_vm5  ;;  %v4233_v10 = vpack.i.bf16 %v9057_v17, %v9056_v63 }
 0x3c1   : > { %3013 = vrot.lane.b32.xlu1 %v2936_v20, %s4530_s30  ;;  %v2670_v20 = vpop.xlane.xlu0 %2669 }
 0x3d3   : > { %4224 = vrot.lane.b32.xlu0 %v4223_v22, %s4530_s30  ;;  %v9047_v22 = vmin.f32 %v8958_v54, %v8957_v11  ;;  %v2661_v11 = vpop.xlane.xlu1 %2660  ;;  %v9053_v54 = vld [vmem:[#allocation52_spill] sm:$0xff] }
 0x3d4   : > { %vm9054_vm8 = vnez %v9053_v54 }
 0x3d5   : > { %vm2841_vm1 = vmor %vm9054_vm8, %vm6988_vm3 }
 0x3d6   : > { %vm2876_vm6 = vmand %vm7017_vm4, %vm2841_vm1 }
 0x3d7   : > { %3015 = vrot.lane.b32.xlu0 %v2937_v8, %s4530_s30  ;;  %v7202_v8 = vpop.xlane.xlu0 %2675  ;;  %v2940_v4 = vsel %vm2876_vm6, %v2664_v56, 0.0 }
 0x3e5   : > { %2515 = vmin.xlane.f32.xlu1 %v9044_v29  ;;  %v4228_v29 = vpack.i.bf16 %v9049_v5, %v9048_v38 }
 0x3f6   : > { %2518 = vmin.xlane.f32.xlu0 %v9047_v22  ;;  %3017 = vrot.lane.b32.xlu1 %v2938_v19, %s4530_s30  ;;  %v7224_v22 = vpop.xlane.xlu0 %2681  ;;  %v2939_v19 = vsel %vm2875_vm0, %v2661_v11, 0.0  ;;  %v9058_v11 = vld [vmem:[#allocation58_spill] sm:$0xff] }
 0x3f7   : > { %vm9059_vm5 = vnez %v9058_v11 }
 0x3f8   : > { %vm2842_vm0 = vmor %vm9059_vm5, %vm6988_vm3 }
 0x3f9   : > { %vm2877_vm1 = vmand %vm7017_vm4, %vm2842_vm0 }
 0x3fa   : > { %2521 = vmin.xlane.f32.xlu0 %v9052_v36  ;;  %4229 = vrot.lane.b32.xlu1 %v4228_v29, %s4530_s30  ;;  %v7229_v9 = vpop.xlane.xlu0 %2687  ;;  %v2667_v36 = vpop.xlane.xlu1 %2666 }
 0x3fb   : > { %v2941_v56 = vsel %vm2877_vm1, %v2667_v36, 0.0 }
 0x3fe   : > { %2524 = vmin.xlane.f32.xlu0 %v9055_v14  ;;  %3019 = vrot.lane.b32.xlu1 %v2939_v19, %s4530_s30  ;;  %v7232_v29 = vpop.xlane.xlu0 %2693  ;;  %v2673_v5 = vpop.xlane.xlu1 %2672 }
 0x402   : > { %3021 = vrot.lane.b32.xlu1 %v2940_v4, %s4530_s30  ;;  %v7240_v14 = vpop.xlane.xlu0 %2699  ;;  %v2679_v19 = vpop.xlane.xlu1 %2678 }
 0x406   : > { %v7245_v4 = vpop.xlane.xlu0 %2455  ;;  %v7247_v54 = vpop.xlane.xlu1 %2684 }
 0x40a   : > { %v7250_v17 = vpop.xlane.xlu0 %2458  ;;  %v7252_v63 = vpop.xlane.xlu1 %2690 }
 0x40e   : > { %v7254_v11 = vpop.xlane.xlu0 %2461  ;;  %v7256_v38 = vpop.xlane.xlu1 %2696 }
 0x412   : > { %v7258_v60 = vpop.xlane.xlu0 %2467  ;;  %v7263_v36 = vpop.xlane.xlu1 %2452 }
 0x414   : > { %4234 = vrot.lane.b32.xlu0 %v4233_v10, %s4530_s30  ;;  %v9060_v10 = vmin.f32 %v6928_v28, %v6934_v57  ;;  %v9063_v28 = vmin.f32 %v8970_v21, %v6760_v52  ;;  %v9069_v52 = vld [vmem:[#allocation60_spill] sm:$0xff] }
 0x416   : > { %v7265_v23 = vpop.xlane.xlu0 %2473  ;;  %v7267_v44 = vpop.xlane.xlu1 %2702 }
 0x418   : > { %3023 = vrot.lane.b32.xlu0 %v2941_v56, %s4530_s30  ;;  %v9061_v56 = vld [vmem:[#allocation56_spill] sm:$0xff] }
 0x419   : > { %vm9062_vm6 = vnez %v9061_v56  ;;  %v4238_v56 = vpack.i.bf16 %v9065_v24, %v9064_v43 }
 0x41a   : > { %vm2843_vm0 = vmor %vm9062_vm6, %vm6988_vm3  ;;  %v7273_v0 = vpop.xlane.xlu0 %2476  ;;  %v7277_v48 = vpop.xlane.xlu1 %2705  ;;  %vm9067_vm6 = vnez %v9066_v31 }
 0x41b   : > { %vm2878_vm1 = vmand %vm7017_vm4, %vm2843_vm0 }
 0x41c   : > { %v2942_v57 = vsel %vm2878_vm1, %v2670_v20, 0.0  ;;  %vm2844_vm8 = vmor %vm9067_vm6, %vm6988_vm3  ;;  %vm9070_vm1 = vnez %v9069_v52  ;;  %v9071_v20 = vld [vmem:[#allocation211_spill] sm:$0xff] }
 0x41d   : > { %vm2879_vm0 = vmand %vm7017_vm4, %vm2844_vm8 }
 0x41e   : > { %v7294_v49 = vpop.xlane.xlu1 %2464  ;;  %vm2845_vm5 = vmor %vm9070_vm1, %vm6988_vm3  ;;  %v2943_v61 = vsel %vm2879_vm0, %v2673_v5, 0.0 }
 0x41f   : > { %vm2880_vm6 = vmand %vm7017_vm4, %vm2845_vm5 }
 0x422   : > { %v7310_v13 = vpop.xlane.xlu1 %2470 }
 0x426   : > { %2527 = vmin.xlane.f32.xlu1 %v9060_v10  ;;  %v7282_v10 = vpop.permute.xlu0 %2987 }
 0x42a   : > { %v7303_v21 = vpop.permute.xlu0 %2991 }
 0x437   : > { %2530 = vmin.xlane.f32.xlu0 %v9063_v28  ;;  %3025 = vrot.lane.b32.xlu1 %v2942_v57, %s4530_s30  ;;  %v9072_v28 = vmin.f32 %v8973_v32, %v9071_v20  ;;  %v7316_v57 = vpop.permute.xlu1 %4189  ;;  %v9074_v20 = vld [vmem:[#allocation57_spill] sm:$0xff] }
 0x438   : > { %v4191_v34 = vunpack.i.l.bf16 %v7316_v57 }
 0x43b   : > { %2533 = vmin.xlane.f32.xlu0 %v9068_v1  ;;  %4239 = vrot.lane.b32.xlu1 %v4238_v56, %s4530_s30  ;;  %v7313_v1 = vpop.xlane.xlu0 %2482  ;;  %v2944_v56 = vsel %vm2880_vm6, %v7202_v8, 0.0  ;;  %v7321_v32 = vpop.permute.xlu1 %4194 }
 0x43c   : > { %9073 = vst [vmem:[#allocation105_spill] sm:$0xff] %v7313_v1  ;;  %v4197_v39 = vunpack.i.h.bf16 %v7321_v32 }
 0x43f   : > { %2536 = vmin.xlane.f32.xlu0 %v9072_v28  ;;  %3027 = vrot.lane.b32.xlu1 %v2943_v61, %s4530_s30  ;;  %v7319_v24 = vpop.permute.xlu0 %4199  ;;  %v9075_v28 = vld [vmem:[#allocation55_spill] sm:$0xff]  ;;  %v9076_v61 = vld [vmem:[#allocation66_spill] sm:$0xff]  ;;  %v7331_v52 = vpop.permute.xlu1 %2989 }
 0x440   : > { %v4243_v43 = vpack.i.bf16 %v9075_v28, %v9074_v20  ;;  %vm9077_vm8 = vnez %v9076_v61 }
 0x441   : > { %vm2846_vm5 = vmor %vm9077_vm8, %vm6988_vm3 }
 0x442   : > { %vm2881_vm6 = vmand %vm7017_vm4, %vm2846_vm5 }
 0x443   : > { %3029 = vrot.lane.b32.xlu1 %v2944_v56, %s4530_s30  ;;  %v7323_v5 = vpop.permute.xlu0 %2995  ;;  %v7338_v56 = vpop.xlane.xlu1 %2479  ;;  %v2945_v31 = vsel %vm2881_vm6, %v2679_v19, 0.0  ;;  %v9083_v19 = vmin.f32 %v6952_v30, %v6958_v40  ;;  %v9089_v30 = vmin.f32 %v8976_v62, %v6802_v53  ;;  %v9095_v53 = vmin.f32 %v6814_v42, %v6822_v45  ;;  %v9099_v42 = vld [vmem:[#allocation65_spill] sm:$0xff]  ;;  %v9100_v45 = vld [vmem:[#allocation63_spill] sm:$0xff] }
 0x444   : > { %9079 = vst [vmem:[#allocation174_spill] sm:$0xff] %v7338_v56 }
 0x447   : > { %v7333_v8 = vpop.xlane.xlu0 %2488  ;;  %v7343_v28 = vpop.permute.xlu1 %2993 }
 0x448   : > { %9078 = vst [vmem:[#allocation147_spill] sm:$0xff] %v7333_v8 }
 0x44b   : > { %v7340_v1 = vpop.permute.xlu0 %4204  ;;  %v7347_v61 = vpop.xlane.xlu1 %2485 }
 0x44c   : > { %9080 = vst [vmem:[#allocation176_spill] sm:$0xff] %v7347_v61 }
 0x44f   : > { %v7345_v20 = vpop.permute.xlu0 %2999  ;;  %v7351_v12 = vpop.permute.xlu1 %2997 }
 0x453   : > { %v7349_v8 = vpop.xlane.xlu0 %2494 }
 0x454   : > { %9081 = vst [vmem:[#allocation178_spill] sm:$0xff] %v7349_v8  ;;  %v9086_v8 = vld [vmem:[#allocation64_spill] sm:$0xff] }
 0x455   : > { %4244 = vrot.lane.b32.xlu0 %v4243_v43, %s4530_s30  ;;  %v7355_v43 = vpop.xlane.xlu1 %2491  ;;  %vm9087_vm0 = vnez %v9086_v8  ;;  %v9091_v8 = vld [vmem:[#allocation61_spill] sm:$0xff] }
 0x456   : > { %9082 = vst [vmem:[#allocation143_spill] sm:$0xff] %v7355_v43  ;;  %vm2847_vm5 = vmor %vm9087_vm0, %vm6988_vm3 }
 0x457   : > { %v7353_v3 = vpop.permute.xlu0 %4209  ;;  %vm2882_vm6 = vmand %vm7017_vm4, %vm2847_vm5 }
 0x459   : > { %3031 = vrot.lane.b32.xlu0 %v2945_v31, %s4530_s30  ;;  %v7363_v31 = vpop.permute.xlu1 %3001 }
 0x45a   : > { %9084 = vst [vmem:[#allocation213_spill] sm:$0xff] %v7363_v31 }
 0x45b   : > { %v7360_v56 = vpop.permute.xlu0 %3003 }
 0x45d   : > { %v7371_v55 = vpop.xlane.xlu1 %2497 }
 0x45e   : > { %9088 = vst [vmem:[#allocation146_spill] sm:$0xff] %v7371_v55  ;;  %v9093_v55 = vld [vmem:[#allocation70_spill] sm:$0xff] }
 0x45f   : > { %v7365_v61 = vpop.xlane.xlu0 %2500  ;;  %vm9094_vm5 = vnez %v9093_v55 }
 0x460   : > { %9085 = vst [vmem:[#allocation106_spill] sm:$0xff] %v7365_v61  ;;  %v9092_v61 = vld [vmem:[#allocation59_spill] sm:$0xff]  ;;  %vm2848_vm0 = vmor %vm9094_vm5, %vm6988_vm3 }
 0x461   : > { %v7381_v43 = vpop.permute.xlu1 %3005  ;;  %v4248_v31 = vpack.i.bf16 %v9092_v61, %v9091_v8  ;;  %v9101_v8 = vld [vmem:[#allocation74_spill] sm:$0xff] }
 0x462   : > { %9090 = vst [vmem:[#allocation182_spill] sm:$0xff] %v7381_v43  ;;  %vm9102_vm5 = vnez %v9101_v8  ;;  %v4192_v8 = vunpack.i.h.bf16 %v7316_v57 }
 0x463   : > { %v7378_v40 = vpop.permute.xlu0 %4214  ;;  %vm2850_vm8 = vmor %vm9102_vm5, %vm6988_vm3 }
 0x464   : > { %vm2885_vm14 = vmand %vm7017_vm4, %vm2850_vm8 }
 0x465   : > { %v7394_v62 = vpop.xlane.xlu1 %2503 }
 0x466   : > { %9096 = vst [vmem:[#allocation184_spill] sm:$0xff] %v7394_v62 }
 0x467   : > { %2539 = vmin.xlane.f32.xlu1 %v9083_v19  ;;  %v2946_v19 = vsel %vm2882_vm6, %v7224_v22, 0.0  ;;  %vm2883_vm6 = vmand %vm7017_vm4, %vm2848_vm0  ;;  %v7398_v22 = vpop.permute.xlu0 %3007 }
 0x468   : > { %9097 = vst [vmem:[#allocation107_spill] sm:$0xff] %v7398_v22 }
 0x469   : > { %v7411_v55 = vpop.permute.xlu1 %3009 }
 0x46a   : > { %9103 = vst [vmem:[#allocation108_spill] sm:$0xff] %v7411_v55 }
 0x46b   : > { %v7402_v61 = vpop.xlane.xlu0 %2506 }
 0x46c   : > { %9098 = vst [vmem:[#allocation149_spill] sm:$0xff] %v7402_v61  ;;  %v9125_v61 = vld [vmem:[#allocation67_spill] sm:$0xff] }
 0x478   : > { %2542 = vmin.xlane.f32.xlu0 %v9089_v30  ;;  %3033 = vrot.lane.b32.xlu1 %v2946_v19, %s4530_s30  ;;  %v2947_v30 = vsel %vm2883_vm6, %v7247_v54, 0.0  ;;  %v2752_v19 = vstv %s2751_s16  ;;  %v9106_v54 = vld [vmem:[#allocation68_spill] sm:$0xff] }
 0x479   : > { %vm7413_vm0 = vcmp.eq.s32.totalorder %v2752_v19, 1  ;;  %vm9107_vm6 = vnez %v9106_v54  ;;  %v7438_v19 = vpop.xlane.xlu0 %2509  ;;  %v2787_v54 = vstv %s2786_s17 }
 0x47a   : > { %vm2849_vm1 = vmor %vm9107_vm6, %vm6988_vm3  ;;  %9113 = vst [vmem:[#allocation214_spill] sm:$0xff] %v7438_v19  ;;  %v9124_v19 = vld [vmem:[#allocation69_spill] sm:$0xff] }
 0x47b   : > { %vm7434_vm9 = vmand %vm7017_vm4, %vm2849_vm1  ;;  %v4258_v55 = vpack.i.bf16 %v9125_v61, %v9124_v19 }
 0x47c   : > { %2545 = vmin.xlane.f32.xlu0 %v9095_v53  ;;  %4249 = vrot.lane.b32.xlu1 %v4248_v31, %s4530_s30  ;;  %v4253_v53 = vpack.i.bf16 %v9100_v45, %v9099_v42  ;;  %v9108_v31 = vld [vmem:[#allocation72_spill] sm:$0xff]  ;;  %v7445_v42 = vpop.permute.xlu1 %4219  ;;  %v2948_v43 = vsel %vm7434_vm9, %v7229_v9, 0.0 }
 0x47d   : > { %vm9109_vm5 = vnez %v9108_v31  ;;  %v9114_v45 = vld [vmem:[#allocation76_spill] sm:$0xff] }
 0x47e   : > { %vm2851_vm12 = vmor %vm9109_vm5, %vm6988_vm3  ;;  %vm9115_vm8 = vnez %v9114_v45  ;;  %v9143_v45 = vld [vmem:[#allocation73_spill] sm:$0xff] }
 0x47f   : > { %vm2852_vm5 = vmor %vm9115_vm8, %vm6988_vm3 }
 0x480   : > { %3035 = vrot.lane.b32.xlu1 %v2947_v30, %s4530_s30  ;;  %vm2886_vm10 = vmand %vm7017_vm4, %vm2851_vm12  ;;  %v9144_v30 = vld [vmem:[#allocation71_spill] sm:$0xff] }
 0x481   : > { %vm7460_vm8 = vmand %vm7017_vm4, %vm2852_vm5  ;;  %v2950_v31 = vsel %vm2886_vm10, %v7232_v29, 0.0  ;;  %v9126_v29 = vld [vmem:[#allocation77_spill] sm:$0xff] }
 0x482   : > { %vm9127_vm10 = vnez %v9126_v29  ;;  %v2951_v59 = vsel %vm7460_vm8, %v7256_v38, 0.0 }
 0x483   : > { %vm2855_vm5 = vmor %vm9127_vm10, %vm6988_vm3 }
 0x484   : > { %4254 = vrot.lane.b32.xlu1 %v4253_v53, %s4530_s30  ;;  %v2949_v53 = vsel %vm2885_vm14, %v7252_v63, 0.0  ;;  %v9116_v63 = vld [vmem:[#allocation75_spill] sm:$0xff]  ;;  %vm7507_vm9 = vmand %vm7017_vm4, %vm2855_vm5 }
 0x485   : > { %vm9117_vm14 = vnez %v9116_v63  ;;  %v7475_v63 = vpop.xlane.xlu0 %2512 }
 0x486   : > { %vm2853_vm6 = vmor %vm9117_vm14, %vm6988_vm3 }
 0x487   : > { %vm7471_vm1 = vmand %vm7017_vm4, %vm2853_vm6  ;;  %vm7489_vm6 = vcmp.eq.s32.totalorder %v2787_v54, 1  ;;  %v4196_v54 = vunpack.i.l.bf16 %v7321_v32  ;;  %v4206_v32 = vunpack.i.l.bf16 %v7340_v1 }
 0x488   : > { %3039 = vrot.lane.b32.xlu1 %v2949_v53, %s4530_s30  ;;  %v9120_v53 = vld [vmem:[#allocation78_spill] sm:$0xff]  ;;  %v2952_v47 = vsel %vm7471_vm1, %v7240_v14, 0.0  ;;  %v3243_v14 = vsub.f32 %v8982_v46, %v4191_v34  ;;  %v4201_v46 = vunpack.i.l.bf16 %v7319_v24  ;;  %v4263_v34 = vpack.i.bf16 %v9144_v30, %v9143_v45 }
 0x489   : > { %vm9121_vm12 = vnez %v9120_v53  ;;  %v7484_v53 = vpop.permute.xlu1 %3011 }
 0x48a   : > { %vm2854_vm11 = vmor %vm9121_vm12, %vm6988_vm3  ;;  %vm9132_vm3 = vnez %v8994_v15  ;;  %v3275_v45 = vmul.f32 %v3243_v14, %v3243_v14 }
 0x48b   : > { %vm7495_vm12 = vmand %vm7017_vm4, %vm2854_vm11 }
 0x48c   : > { %3041 = vrot.lane.b32.xlu1 %v2950_v31, %s4530_s30  ;;  %vm2755_vm10 = vmor %vm9132_vm3, %vm7413_vm0  ;;  %v2953_v15 = vsel %vm7495_vm12, %v7267_v44, 0.0 }
 0x48d   : > { %vm9135_vm11 = vmor %vm9110_vm15, %vm7413_vm0  ;;  %v7544_v16 = vpop.permute.xlu1 %3013 }
 0x48e   : > { %vm7519_vm3 = vmand %vm7489_vm6, %vm9135_vm11 }
 0x48f   : > { %vm2758_vm4 = vmor %vm7060_vm13, %vm7413_vm0  ;;  %v2891_v38 = vsel %vm7519_vm3, %v7263_v36, 0.0 }
 0x490   : > { %4259 = vrot.lane.b32.xlu1 %v4258_v55, %s4530_s30  ;;  %v7530_v55 = vpop.permute.xlu0 %4224  ;;  %vm7537_vm15 = vmand %vm7489_vm6, %vm2755_vm10  ;;  %v3083_v36 = vadd.f32 %v7282_v10, %v2891_v38  ;;  %vm9147_vm10 = vnez %v9015_v50 }
 0x491   : > { %vm9140_vm13 = vmor %vm7009_vm2, %vm7413_vm0  ;;  %v7585_v10 = vpop.xlane.xlu1 %2515 }
 0x492   : > { %3037 = vrot.lane.b32.xlu0 %v2948_v43, %s4530_s30  ;;  %vm7557_vm8 = vmand %vm7489_vm6, %vm9140_vm13  ;;  %v2954_v43 = vsel %vm7507_vm9, %v7277_v48, 0.0  ;;  %v3246_v48 = vsub.f32 %v8985_v37, %v4197_v39  ;;  %vm9156_vm13 = vnez %v9021_v33 }
 0x493   : > { %vm7567_vm1 = vmand %vm7489_vm6, %vm2758_vm4  ;;  %v2893_v44 = vsel %vm7557_vm8, %v7250_v17, 0.0 }
 0x494   : > { %3043 = vrot.lane.b32.xlu1 %v2951_v59, %s4530_s30  ;;  %vm2757_vm2 = vmor %vm7047_vm7, %vm7413_vm0  ;;  %v3245_v59 = vsub.f32 %v8984_v18, %v4196_v54  ;;  %vm9148_vm7 = vnez %v9012_v35  ;;  %v7597_v31 = vpop.permute.xlu0 %3015  ;;  %v2892_v18 = vsel %vm7537_vm15, %v7245_v4, 0.0  ;;  %v3403_v35 = vmul.f32 %v3275_v45, %v3083_v36 }
 0x495   : > { %vm2760_vm5 = vmor %vm9147_vm10, %vm7413_vm0  ;;  %v3084_v4 = vadd.f32 %v7331_v52, %v2892_v18  ;;  %vm9155_vm15 = vnez %v9018_v25  ;;  %v3249_v45 = vsub.f32 %v9013_v7, %v4206_v32  ;;  %v7651_v6 = vpop.permute.xlu1 %3017  ;;  %v9167_v18 = vld [vmem:[#allocation25_spill] sm:$0xff] }
 0x496   : > { %3045 = vrot.lane.b32.xlu0 %v2952_v47, %s4530_s30  ;;  %v3244_v47 = vsub.f32 %v8983_v41, %v4192_v8  ;;  %vm2759_vm12 = vmor %vm9148_vm7, %vm7413_vm0  ;;  %v3247_v41 = vsub.f32 %v9005_v58, %v4201_v46  ;;  %v3085_v8 = vadd.f32 %v7303_v21, %v2893_v44  ;;  %v2895_v21 = vsel %vm7567_vm1, %v7294_v49, 0.0  ;;  %v9170_v58 = vld [vmem:[#allocation32_spill] sm:$0xff] }
 0x497   : > { %vm7605_vm11 = vmand %vm7489_vm6, %vm2757_vm2  ;;  %v3277_v54 = vmul.f32 %v3245_v59, %v3245_v59  ;;  %v4202_v49 = vunpack.i.h.bf16 %v7319_v24  ;;  %v3087_v52 = vadd.f32 %v7323_v5, %v2895_v21  ;;  %vm9159_vm2 = vnez %v9027_v51  ;;  %v9165_v51 = vld [vmem:[#allocation45_spill] sm:$0xff] }
 0x498   : > { %4264 = vrot.lane.b32.xlu1 %v4263_v34, %s4530_s30  ;;  %vm7618_vm3 = vmand %vm7489_vm6, %vm2760_vm5  ;;  %v3276_v14 = vmul.f32 %v3244_v47, %v3244_v47  ;;  %v3279_v9 = vmul.f32 %v3247_v41, %v3247_v41  ;;  %v7643_v38 = vpop.xlane.xlu0 %2518  ;;  %v2894_v57 = vsel %vm7605_vm11, %v7254_v11, 0.0  ;;  %v4211_v34 = vunpack.i.l.bf16 %v7353_v3  ;;  %v9173_v21 = vld [vmem:[#allocation213_spill] sm:$0xff] }
 0x499   : > { %vm7631_vm4 = vmand %vm7489_vm6, %vm2759_vm12  ;;  %v3405_v46 = vmul.f32 %v3277_v54, %v3085_v8  ;;  %v3086_v24 = vadd.f32 %v7343_v28, %v2894_v57  ;;  %v2897_v5 = vsel %vm7618_vm3, %v7310_v13, 0.0  ;;  %v3278_v11 = vmul.f32 %v3246_v48, %v3246_v48  ;;  %v9179_v57 = vld [vmem:[#allocation43_spill] sm:$0xff] }
 0x49a   : > { %3047 = vrot.lane.b32.xlu0 %v2953_v15, %s4530_s30  ;;  %vm2761_vm9 = vmor %vm9155_vm15, %vm7413_vm0  ;;  %v3404_v37 = vmul.f32 %v3276_v14, %v3084_v4  ;;  %v2896_v7 = vsel %vm7631_vm4, %v7258_v60, 0.0  ;;  %v3248_v60 = vsub.f32 %v9009_v26, %v4202_v49  ;;  %v3407_v25 = vmul.f32 %v3279_v9, %v3087_v52  ;;  %v9174_v14 = vld [vmem:[#allocation105_spill] sm:$0xff]  ;;  %v9178_v52 = vld [vmem:[#allocation174_spill] sm:$0xff] }
 0x49b   : > { %vm2762_vm8 = vmor %vm9156_vm13, %vm7413_vm0  ;;  %v4207_v13 = vunpack.i.h.bf16 %v7340_v1  ;;  %v3089_v36 = vadd.f32 %v7345_v20, %v2897_v5  ;;  %v3281_v15 = vmul.f32 %v3249_v45, %v3249_v45  ;;  %v3251_v47 = vsub.f32 %v9019_v27, %v4211_v34  ;;  %v9181_v34 = vld [vmem:[#allocation36_spill] sm:$0xff] }
 0x49c   : > { %3049 = vrot.lane.b32.xlu1 %v2954_v43, %s4530_s30  ;;  %vm7671_vm1 = vmand %vm7489_vm6, %vm2761_vm9  ;;  %v4216_v59 = vunpack.i.l.bf16 %v7378_v40  ;;  %vm9162_vm7 = vnez %v9023_v2  ;;  %v3406_v26 = vmul.f32 %v3278_v11, %v3086_v24  ;;  %v3088_v1 = vadd.f32 %v7351_v12, %v2896_v7  ;;  %v7697_v44 = vpop.xlane.xlu0 %2521  ;;  %v7714_v12 = vpop.permute.xlu1 %4229  ;;  %v9171_v43 = vld [vmem:[#allocation39_spill] sm:$0xff] }
 0x49d   : > { %vm2764_vm10 = vmor %vm9159_vm2, %vm7413_vm0  ;;  %v2898_v39 = vsel %vm7671_vm1, %v7265_v23, 0.0  ;;  %v4212_v20 = vunpack.i.h.bf16 %v7353_v3  ;;  %vm9166_vm3 = vnez %v9165_v51  ;;  %v3280_v41 = vmul.f32 %v3248_v60, %v3248_v60  ;;  %v9182_v7 = vld [vmem:[#allocation107_spill] sm:$0xff] }
 0x49e   : > { %3467 = vrot.lane.b32.xlu0 %v3403_v35, %s4531_s20  ;;  %vm7685_vm5 = vmand %vm7489_vm6, %vm2762_vm8  ;;  %v3250_v17 = vsub.f32 %v9167_v18, %v4207_v13  ;;  %v4221_v35 = vunpack.i.l.bf16 %v7445_v42  ;;  %v3283_v32 = vmul.f32 %v3251_v47, %v3251_v47  ;;  %v3253_v4 = vsub.f32 %v9170_v58, %v4216_v59  ;;  %v9188_v47 = vld [vmem:[#allocation147_spill] sm:$0xff]  ;;  %v9194_v18 = vld [vmem:[#allocation176_spill] sm:$0xff] }
 0x49f   : > { %vm2763_vm12 = vmor %vm9162_vm7, %vm7413_vm0  ;;  %v2899_v23 = vsel %vm7685_vm5, %v7273_v0, 0.0  ;;  %v3409_v0 = vmul.f32 %v3281_v15, %v3089_v36  ;;  %vm9172_vm9 = vnez %v9171_v43  ;;  %v3408_v2 = vmul.f32 %v3280_v41, %v3088_v1  ;;  %v9187_v36 = vld [vmem:[#allocation182_spill] sm:$0xff]  ;;  %v9200_v58 = vld [vmem:[#allocation108_spill] sm:$0xff] }
 0x4a0   : > { %3469 = vrot.lane.b32.xlu1 %v3404_v37, %s4531_s20  ;;  %vm7709_vm11 = vmand %vm7489_vm6, %vm2764_vm10  ;;  %v3091_v8 = vadd.f32 %v7360_v56, %v2899_v23  ;;  %v3090_v50 = vadd.f32 %v9173_v21, %v2898_v39  ;;  %v9177_v56 = vld [vmem:[#allocation27_spill] sm:$0xff]  ;;  %vm9180_vm1 = vnez %v9179_v57  ;;  %v4217_v45 = vunpack.i.h.bf16 %v7378_v40  ;;  %v7765_v24 = vpop.xlane.xlu0 %2524  ;;  %v3020_v13 = vpop.permute.xlu1 %3019  ;;  %v9191_v39 = vld [vmem:[#allocation30_spill] sm:$0xff] }
 0x4a1   : > { %vm2766_vm4 = vmor %vm9166_vm3, %vm7413_vm0  ;;  %v2901_v54 = vsel %vm7709_vm11, %v9174_v14, 0.0  ;;  %v3252_v49 = vsub.f32 %v9177_v56, %v4212_v20  ;;  %v3255_v37 = vsub.f32 %v9181_v34, %v4221_v35  ;;  %v3285_v60 = vmul.f32 %v3253_v4, %v3253_v4  ;;  %v9195_v35 = vld [vmem:[#allocation48_spill] sm:$0xff] }
 0x4a2   : > { %3471 = vrot.lane.b32.xlu0 %v3405_v46, %s4531_s20  ;;  %vm7734_vm15 = vmand %vm7489_vm6, %vm2763_vm12  ;;  %v3282_v46 = vmul.f32 %v3250_v17, %v3250_v17  ;;  %v3411_v5 = vmul.f32 %v3283_v32, %v3091_v8  ;;  %v3093_v33 = vadd.f32 %v9182_v7, %v2901_v54  ;;  %v4226_v11 = vunpack.i.l.bf16 %v7530_v55  ;;  %v9198_v32 = vld [vmem:[#allocation54_spill] sm:$0xff]  ;;  %v9212_v40 = vld [vmem:[#allocation52_spill] sm:$0xff] }
 0x4a3   : > { %vm2765_vm13 = vmor %vm9172_vm9, %vm7413_vm0  ;;  %v2900_v9 = vsel %vm7734_vm15, %v9178_v52, 0.0  ;;  %v3284_v1 = vmul.f32 %v3252_v49, %v3252_v49  ;;  %v3254_v27 = vsub.f32 %v9191_v39, %v4217_v45  ;;  %v4222_v20 = vunpack.i.h.bf16 %v7445_v42  ;;  %v9205_v49 = vld [vmem:[#allocation34_spill] sm:$0xff] }
 0x4a4   : > { %3473 = vrot.lane.b32.xlu1 %v3406_v26, %s4531_s20  ;;  %vm7750_vm8 = vmand %vm7489_vm6, %vm2766_vm4  ;;  %v3410_v28 = vmul.f32 %v3282_v46, %v3090_v50  ;;  %v3092_v15 = vadd.f32 %v9187_v36, %v2900_v9  ;;  %v3287_v51 = vmul.f32 %v3255_v37, %v3255_v37  ;;  %vm9196_vm3 = vnez %v9195_v35  ;;  %v4235_v43 = vpop.permute.xlu0 %4234  ;;  %v9202_v50 = vld [vmem:[#allocation178_spill] sm:$0xff]  ;;  %v3022_v54 = vpop.permute.xlu1 %3021  ;;  %v9208_v37 = vld [vmem:[#allocation44_spill] sm:$0xff] }
 0x4a5   : > { %vm2767_vm2 = vmor %vm9180_vm1, %vm7413_vm0  ;;  %v2903_v59 = vsel %vm7750_vm8, %v9188_v47, 0.0  ;;  %v3413_v42 = vmul.f32 %v3285_v60, %v3093_v33  ;;  %vm9199_vm15 = vnez %v9198_v32  ;;  %v3286_v56 = vmul.f32 %v3254_v27, %v3254_v27  ;;  %v9216_v27 = vld [vmem:[#allocation47_spill] sm:$0xff]  ;;  %v9223_v35 = vld [vmem:[#allocation42_spill] sm:$0xff] }
 0x4a6   : > { %3475 = vrot.lane.b32.xlu0 %v3407_v25, %s4531_s20  ;;  %v9183_v25 = vld [vmem:[#allocation49_spill] sm:$0xff]  ;;  %vm7781_vm7 = vmand %vm7489_vm6, %vm2765_vm13  ;;  %v3095_v23 = vadd.f32 %v7484_v53, %v2903_v59  ;;  %v9197_v53 = vld [vmem:[#allocation40_spill] sm:$0xff]  ;;  %v3412_v8 = vmul.f32 %v3284_v1, %v3092_v15  ;;  %v3256_v52 = vsub.f32 %v9205_v49, %v4222_v20  ;;  %v4227_v57 = vunpack.i.h.bf16 %v7530_v55 }
 0x4a7   : > { %vm9184_vm10 = vnez %v9183_v25  ;;  %vm7796_vm12 = vmand %vm7489_vm6, %vm2767_vm2  ;;  %v2902_v17 = vsel %vm7781_vm7, %v9194_v18, 0.0  ;;  %v3257_v3 = vsub.f32 %v9197_v53, %v4226_v11  ;;  %v4236_v7 = vunpack.i.l.bf16 %v4235_v43  ;;  %v9209_v55 = vld [vmem:[#allocation58_spill] sm:$0xff]  ;;  %v9221_v18 = vld [vmem:[#allocation56_spill] sm:$0xff] }
 0x4a8   : > { %3477 = vrot.lane.b32.xlu1 %v3408_v2, %s4531_s20  ;;  %vm2768_vm5 = vmor %vm9184_vm10, %vm7413_vm0  ;;  %v3094_v4 = vadd.f32 %v9200_v58, %v2902_v17  ;;  %v9201_v2 = vld [vmem:[#allocation143_spill] sm:$0xff]  ;;  %v3415_v9 = vmul.f32 %v3287_v51, %v3095_v23  ;;  %vm9210_vm1 = vnez %v9209_v55  ;;  %v9211_v11 = vld [vmem:[#allocation146_spill] sm:$0xff]  ;;  %vm9213_vm10 = vnez %v9212_v40 }
 0x4a9   : > { %vm7806_vm11 = vmand %vm7489_vm6, %vm2768_vm5  ;;  %v2904_v21 = vsel %vm7796_vm12, %v9201_v2, 0.0  ;;  %v3289_v34 = vmul.f32 %v3257_v3, %v3257_v3  ;;  %v3288_v36 = vmul.f32 %v3256_v52, %v3256_v52  ;;  %v9215_v15 = vld [vmem:[#allocation38_spill] sm:$0xff]  ;;  %v4232_v59 = vunpack.i.h.bf16 %v7714_v12  ;;  %v9224_v3 = vld [vmem:[#allocation149_spill] sm:$0xff] }
 0x4aa   : > { %3479 = vrot.lane.b32.xlu0 %v3409_v0, %s4531_s20  ;;  %vm2769_vm4 = vmor %vm9196_vm3, %vm7413_vm0  ;;  %v4231_v0 = vunpack.i.l.bf16 %v7714_v12  ;;  %v2905_v14 = vsel %vm7806_vm11, %v9202_v50, 0.0  ;;  %v3414_v33 = vmul.f32 %v3286_v56, %v3094_v4  ;;  %v3096_v60 = vadd.f32 %v7544_v16, %v2904_v21  ;;  %v9225_v32 = vld [vmem:[#allocation184_spill] sm:$0xff]  ;;  %v9226_v21 = vld [vmem:[#allocation62_spill] sm:$0xff] }
 0x4ab   : > { %vm2770_vm9 = vmor %vm9199_vm15, %vm7413_vm0  ;;  %v3097_v45 = vadd.f32 %v7597_v31, %v2905_v14  ;;  %v3258_v47 = vsub.f32 %v9215_v15, %v4227_v57  ;;  %v3261_v20 = vsub.f32 %v9216_v27, %v4236_v7  ;;  %vm9222_vm11 = vnez %v9221_v18  ;;  %v9228_v56 = vld [vmem:[#allocation46_spill] sm:$0xff] }
 0x4ac   : > { %3481 = vrot.lane.b32.xlu1 %v3410_v28, %s4531_s20  ;;  %vm7834_vm13 = vmand %vm7489_vm6, %vm2769_vm4  ;;  %v9214_v28 = vld [vmem:[#allocation106_spill] sm:$0xff]  ;;  %v3416_v51 = vmul.f32 %v3288_v36, %v3096_v60  ;;  %v4237_v53 = vunpack.i.h.bf16 %v4235_v43  ;;  %vm9227_vm4 = vnez %v9226_v21 }
 0x4ad   : > { %vm7843_vm8 = vmand %vm7489_vm6, %vm2770_vm9  ;;  %v2906_v25 = vsel %vm7834_vm13, %v9211_v11, 0.0  ;;  %v3417_v26 = vmul.f32 %v3289_v34, %v3097_v45  ;;  %v3293_v4 = vmul.f32 %v3261_v20, %v3261_v20  ;;  %v9229_v57 = vld [vmem:[#allocation214_spill] sm:$0xff]  ;;  %v9230_v45 = vld [vmem:[#allocation60_spill] sm:$0xff] }
 0x4ae   : > { %3483 = vrot.lane.b32.xlu0 %v3411_v5, %s4531_s20  ;;  %v3259_v5 = vsub.f32 %v9208_v37, %v4231_v0  ;;  %vm2772_vm2 = vmor %vm9210_vm1, %vm7413_vm0  ;;  %v2907_v16 = vsel %vm7843_vm8, %v9214_v28, 0.0  ;;  %v3098_v41 = vadd.f32 %v7651_v6, %v2906_v25  ;;  %v3290_v6 = vmul.f32 %v3258_v47, %v3258_v47  ;;  %v9233_v11 = vld [vmem:[#allocation50_spill] sm:$0xff] }
 0x4af   : > { %vm2771_vm5 = vmor %vm9213_vm10, %vm7413_vm0  ;;  %v3099_v1 = vadd.f32 %v3020_v13, %v2907_v16  ;;  %v3024_v13 = vpop.permute.xlu0 %3023  ;;  %v3262_v49 = vsub.f32 %v9228_v56, %v4237_v53  ;;  %vm9231_vm8 = vnez %v9230_v45  ;;  %v9234_v20 = vld [vmem:[#allocation66_spill] sm:$0xff] }
 0x4b0   : > { %3485 = vrot.lane.b32.xlu1 %v3412_v8, %s4531_s20  ;;  %v3291_v39 = vmul.f32 %v3259_v5, %v3259_v5  ;;  %vm7873_vm7 = vmand %vm7489_vm6, %vm2772_vm2  ;;  %v3418_v50 = vmul.f32 %v3290_v6, %v3098_v41  ;;  %v9232_v5 = vld [vmem:[#allocation53_spill] sm:$0xff]  ;;  %vm9235_vm10 = vnez %v9234_v20 }
 0x4b1   : > { %vm7885_vm12 = vmand %vm7489_vm6, %vm2771_vm5  ;;  %v2909_v0 = vsel %vm7873_vm7, %v9224_v3, 0.0  ;;  %v3294_v55 = vmul.f32 %v3262_v49, %v3262_v49  ;;  %v9239_v3 = vld [vmem:[#allocation55_spill] sm:$0xff] }
 0x4b2   : > { %3487 = vrot.lane.b32.xlu0 %v3413_v42, %s4531_s20  ;;  %vm2773_vm3 = vmor %vm9222_vm11, %vm7413_vm0  ;;  %v3260_v42 = vsub.f32 %v9223_v35, %v4232_v59  ;;  %v3419_v8 = vmul.f32 %v3291_v39, %v3099_v1  ;;  %v2908_v58 = vsel %vm7885_vm12, %v9225_v32, 0.0  ;;  %v3101_v2 = vadd.f32 %v3024_v13, %v2909_v0 }
 0x4b3   : > { %v7861_v31 = vpop.xlane.xlu1 %2527  ;;  %vm2774_vm15 = vmor %vm9227_vm4, %vm7413_vm0  ;;  %v3100_v43 = vadd.f32 %v3022_v54, %v2908_v58 }
 0x4b4   : > { %3489 = vrot.lane.b32.xlu1 %v3414_v33, %s4531_s20  ;;  %vm2808_vm9 = vmand %vm7489_vm6, %vm2773_vm3  ;;  %v3292_v48 = vmul.f32 %v3260_v42, %v3260_v42  ;;  %v3421_v54 = vmul.f32 %v3293_v4, %v3101_v2  ;;  %v9237_v42 = vld [vmem:[#allocation64_spill] sm:$0xff]  ;;  %v9240_v4 = vld [vmem:[#allocation70_spill] sm:$0xff] }
 0x4b5   : > { %vm2809_vm13 = vmand %vm7489_vm6, %vm2774_vm15  ;;  %v2910_v46 = vsel %vm2808_vm9, %v9229_v57, 0.0  ;;  %vm9238_vm12 = vnez %v9237_v42  ;;  %vm9241_vm4 = vnez %v9240_v4  ;;  %v9257_v4 = vld [vmem:[#allocation78_spill] sm:$0xff] }
 0x4b6   : > { %3491 = vrot.lane.b32.xlu0 %v3415_v9, %s4531_s20  ;;  %vm2775_vm1 = vmor %vm9231_vm8, %vm7413_vm0  ;;  %v3420_v34 = vmul.f32 %v3292_v48, %v3100_v43  ;;  %v2911_v60 = vsel %vm2809_vm13, %v7475_v63, 0.0  ;;  %v9242_v43 = vld [vmem:[#allocation61_spill] sm:$0xff] }
 0x4b7   : > { %v3026_v17 = vpop.permute.xlu1 %3025  ;;  %vm2810_vm2 = vmand %vm7489_vm6, %vm2775_vm1 }
 0x4b8   : > { %3493 = vrot.lane.b32.xlu1 %v3416_v51, %s4531_s20  ;;  %v3102_v37 = vadd.f32 %v3026_v17, %v2910_v46  ;;  %v2912_v47 = vsel %vm2810_vm2, %v7585_v10, 0.0  ;;  %vm2776_vm5 = vmor %vm9235_vm10, %vm7413_vm0  ;;  %v9236_v51 = vld [vmem:[#allocation57_spill] sm:$0xff]  ;;  %v9245_v46 = vld [vmem:[#allocation68_spill] sm:$0xff] }
 0x4b9   : > { %vm2811_vm7 = vmand %vm7489_vm6, %vm2776_vm5  ;;  %vm9246_vm1 = vnez %v9245_v46 }
 0x4ba   : > { %3495 = vrot.lane.b32.xlu0 %v3417_v26, %s4531_s20  ;;  %v3422_v36 = vmul.f32 %v3294_v55, %v3102_v37  ;;  %v2913_v12 = vsel %vm2811_vm7, %v7643_v38, 0.0  ;;  %vm2777_vm11 = vmor %vm9238_vm12, %vm7413_vm0 }
 0x4bb   : > { %v4240_v14 = vpop.permute.xlu1 %4239  ;;  %vm2812_vm3 = vmand %vm7489_vm6, %vm2777_vm11 }
 0x4bc   : > { %v4242_v52 = vunpack.i.h.bf16 %v4240_v14  ;;  %v4241_v9 = vunpack.i.l.bf16 %v4240_v14  ;;  %3497 = vrot.lane.b32.xlu1 %v3418_v50, %s4531_s20  ;;  %v2914_v38 = vsel %vm2812_vm3, %v7697_v44, 0.0  ;;  %vm2778_vm15 = vmor %vm9241_vm4, %vm7413_vm0 }
 0x4bd   : > { %vm2813_vm9 = vmand %vm7489_vm6, %vm2778_vm15 }
 0x4be   : > { %3499 = vrot.lane.b32.xlu0 %v3419_v8, %s4531_s20  ;;  %v3263_v7 = vsub.f32 %v9232_v5, %v4241_v9  ;;  %v3264_v25 = vsub.f32 %v9233_v11, %v4242_v52  ;;  %v2915_v44 = vsel %vm2813_vm9, %v7765_v24, 0.0  ;;  %v9243_v52 = vld [vmem:[#allocation74_spill] sm:$0xff]  ;;  %vm2779_vm2 = vmor %vm9246_vm1, %vm7413_vm0  ;;  %v9249_v5 = vld [vmem:[#allocation59_spill] sm:$0xff]  ;;  %vm9259_vm1 = vnez %v9126_v29 }
 0x4bf   : > { %v3028_v33 = vpop.permute.xlu1 %3027  ;;  %vm9244_vm13 = vnez %v9243_v52  ;;  %vm2814_vm12 = vmand %vm7489_vm6, %vm2779_vm2  ;;  %v9266_v52 = vld [vmem:[#allocation73_spill] sm:$0xff] }
 0x4c0   : > { %v3295_v40 = vmul.f32 %v3263_v7, %v3263_v7  ;;  %v3103_v28 = vadd.f32 %v3028_v33, %v2911_v60  ;;  %3501 = vrot.lane.b32.xlu1 %v3420_v34, %s4531_s20  ;;  %v3296_v63 = vmul.f32 %v3264_v25, %v3264_v25  ;;  %vm2780_vm8 = vmor %vm9244_vm13, %vm7413_vm0  ;;  %v9247_v34 = vld [vmem:[#allocation72_spill] sm:$0xff]  ;;  %v9250_v60 = vld [vmem:[#allocation65_spill] sm:$0xff] }
 0x4c1   : > { %vm2815_vm10 = vmand %vm7489_vm6, %vm2780_vm8  ;;  %vm9248_vm5 = vnez %v9247_v34 }
 0x4c2   : > { %3503 = vrot.lane.b32.xlu0 %v3421_v54, %s4531_s20  ;;  %v3423_v15 = vmul.f32 %v3295_v40, %v3103_v28  ;;  %vm2781_vm7 = vmor %vm9248_vm5, %vm7413_vm0 }
 0x4c3   : > { %v3030_v59 = vpop.permute.xlu1 %3029  ;;  %vm2816_vm11 = vmand %vm7489_vm6, %vm2781_vm7 }
 0x4c4   : > { %v7930_v16 = vpop.xlane.xlu0 %2530  ;;  %v3104_v26 = vadd.f32 %v3030_v59, %v2912_v47  ;;  %3505 = vrot.lane.b32.xlu1 %v3422_v36, %s4531_s20  ;;  %v2916_v36 = vsel %vm2814_vm12, %v7861_v31, 0.0  ;;  %v9251_v59 = vld [vmem:[#allocation63_spill] sm:$0xff]  ;;  %vm2783_vm15 = vmor %vm9117_vm14, %vm7413_vm0  ;;  %vm9258_vm14 = vnez %v9257_v4 }
 0x4c5   : > { %v2917_v11 = vsel %vm2815_vm10, %v7930_v16, 0.0  ;;  %v9252_v16 = vld [vmem:[#allocation76_spill] sm:$0xff]  ;;  %vm2818_vm13 = vmand %vm7489_vm6, %vm2783_vm15 }
 0x4c6   : > { %3507 = vrot.lane.b32.xlu0 %v3423_v15, %s4531_s20  ;;  %v3424_v39 = vmul.f32 %v3296_v63, %v3104_v26  ;;  %vm9253_vm3 = vnez %v9252_v16  ;;  %vm2784_vm8 = vmor %vm9258_vm14, %vm7413_vm0 }
 0x4c7   : > { %vm2782_vm4 = vmor %vm9253_vm3, %vm7413_vm0 }
 0x4c8   : > { %v7935_v1 = vpop.xlane.xlu0 %2533  ;;  %3509 = vrot.lane.b32.xlu1 %v3424_v39, %s4531_s20  ;;  %vm8009_vm9 = vmand %vm7489_vm6, %vm2782_vm4 }
 0x4c9   : > { %v2918_v20 = vsel %vm2816_vm11, %v7935_v1, 0.0  ;;  %vm2785_vm2 = vmor %vm9259_vm1, %vm7413_vm0 }
 0x4ca   : > { %vm8033_vm10 = vmand %vm7489_vm6, %vm2784_vm8 }
 0x4cb   : > { %vm8039_vm5 = vmand %vm7489_vm6, %vm2785_vm2 }
 0x4cc   : > { %v7938_v27 = vpop.xlane.xlu0 %2536 }
 0x4d0   : > { %v4245_v10 = vpop.permute.xlu0 %4244 }
 0x4d1   : > { %v4246_v23 = vunpack.i.l.bf16 %v4245_v10  ;;  %v4247_v35 = vunpack.i.h.bf16 %v4245_v10 }
 0x4d3   : > { %v3265_v41 = vsub.f32 %v9236_v51, %v4246_v23  ;;  %v3266_v0 = vsub.f32 %v9239_v3, %v4247_v35  ;;  %v3994_v35 = vld [vmem:[%s4755_s14] sm:$0xff]  }
 0x4d4   : > { %v3032_v13 = vpop.permute.xlu0 %3031 }
 0x4d5   : > { %v3297_v18 = vmul.f32 %v3265_v41, %v3265_v41  ;;  %v3105_v17 = vadd.f32 %v3032_v13, %v2913_v12  ;;  %v3298_v32 = vmul.f32 %v3266_v0, %v3266_v0 }
 0x4d7   : > { %v3425_v6 = vmul.f32 %v3297_v18, %v3105_v17 }
 0x4d9   : > { %3511 = vrot.lane.b32.xlu0 %v3425_v6, %s4531_s20 }
 0x4f4   : > { %v7953_v53 = vpop.xlane.xlu1 %2539 }
 0x4f8   : > { %v3034_v8 = vpop.permute.xlu1 %3033 }
 0x4f9   : > { %v3106_v58 = vadd.f32 %v3034_v8, %v2914_v38  ;;  %v2919_v38 = vsel %vm8009_vm9, %v7938_v27, 0.0  ;;  %v2920_v8 = vsel %vm2818_vm13, %v7953_v53, 0.0 }
 0x4fb   : > { %v3426_v2 = vmul.f32 %v3298_v32, %v3106_v58  ;;  %v3995_v58 = vunpack.c.l.bf16 %v3994_v35 }
 0x4fc   : > { %v4250_v21 = vpop.permute.xlu1 %4249 }
 0x4fd   : > { %v4251_v50 = vunpack.i.l.bf16 %v4250_v21  ;;  %3513 = vrot.lane.b32.xlu1 %v3426_v2, %s4531_s20  ;;  %v4252_v54 = vunpack.i.h.bf16 %v4250_v21  ;;  %vm8043_vm7 = vcmp.gt.f32.partialorder %v3995_v58, 0.5 }
 0x4ff   : > { %v3267_v14 = vsub.f32 %v9242_v43, %v4251_v50  ;;  %v3268_v7 = vsub.f32 %v9249_v5, %v4252_v54 }
 0x500   : > { %v3036_v48 = vpop.permute.xlu1 %3035 }
 0x501   : > { %v3299_v56 = vmul.f32 %v3267_v14, %v3267_v14  ;;  %v3107_v49 = vadd.f32 %v3036_v48, %v2915_v44  ;;  %v3300_v47 = vmul.f32 %v3268_v7, %v3268_v7  ;;  %v4064_v44 = vld [vmem:[%s4755_s14 + $0x40] sm:$0xff]  }
 0x503   : > { %v3427_v57 = vmul.f32 %v3299_v56, %v3107_v49 }
 0x504   : > { %v4255_v45 = vpop.permute.xlu1 %4254 }
 0x505   : > { %v7972_v9 = vpop.xlane.xlu0 %2542  ;;  %v4256_v24 = vunpack.i.l.bf16 %v4255_v45  ;;  %3515 = vrot.lane.b32.xlu0 %v3427_v57, %s4531_s20  ;;  %v4257_v33 = vunpack.i.h.bf16 %v4255_v45 }
 0x506   : > { %v2921_v54 = vsel %vm8033_vm10, %v7972_v9, 0.0 }
 0x507   : > { %v3269_v55 = vsub.f32 %v9250_v60, %v4256_v24  ;;  %v3270_v63 = vsub.f32 %v9251_v59, %v4257_v33  ;;  %v3996_v24 = vunpack.c.h.bf16 %v3994_v35 }
 0x508   : > { %v3040_v25 = vpop.permute.xlu1 %3039 }
 0x509   : > { %v7985_v37 = vpop.xlane.xlu0 %2545  ;;  %v3301_v40 = vmul.f32 %v3269_v55, %v3269_v55  ;;  %v3109_v28 = vadd.f32 %v3040_v25, %v2917_v11  ;;  %v3302_v12 = vmul.f32 %v3270_v63, %v3270_v63  ;;  %vm3372_vm0 = vcmp.gt.f32.partialorder %v3996_v24, 0.5  ;;  %v4059_v63 = vld [vmem:[%s4755_s14 + $0x18] sm:$0xff]  }
 0x50a   : > { %v2922_v57 = vsel %vm8039_vm5, %v7985_v37, 0.0 }
 0x50b   : > { %v3429_v26 = vmul.f32 %v3301_v40, %v3109_v28  ;;  %v4058_v40 = vld [vmem:[%s4755_s14 + $0x10] sm:$0xff]  }
 0x50c   : > { %v3042_v10 = vpop.permute.xlu1 %3041  ;;  %v4003_v59 = vunpack.c.l.bf16 %v4058_v40 }
 0x50d   : > { %v3038_v15 = vpop.permute.xlu0 %3037  ;;  %v3110_v51 = vadd.f32 %v3042_v10, %v2918_v20  ;;  %3519 = vrot.lane.b32.xlu0 %v3429_v26, %s4531_s20  ;;  %v4008_v20 = vunpack.c.h.bf16 %v4059_v63 }
 0x50e   : > { %v3108_v39 = vadd.f32 %v3038_v15, %v2916_v36  ;;  %v4004_v36 = vunpack.c.h.bf16 %v4058_v40  ;;  %vm3375_vm3 = vcmp.gt.f32.partialorder %v4003_v59, 0.5 }
 0x50f   : > { %v3430_v18 = vmul.f32 %v3302_v12, %v3110_v51  ;;  %v4060_v51 = vld [vmem:[%s4755_s14 + $0x20] sm:$0xff]   ;;  %vm3378_vm4 = vcmp.gt.f32.partialorder %v4008_v20, 0.5 }
 0x510   : > { %v3428_v23 = vmul.f32 %v3300_v47, %v3108_v39  ;;  %v4260_v13 = vpop.permute.xlu1 %4259  ;;  %vm3376_vm11 = vcmp.gt.f32.partialorder %v4004_v36, 0.5 }
 0x511   : > { %v3046_v41 = vpop.permute.xlu0 %3045  ;;  %v4262_v17 = vunpack.i.h.bf16 %v4260_v13  ;;  %v4261_v6 = vunpack.i.l.bf16 %v4260_v13 }
 0x512   : > { %3517 = vrot.lane.b32.xlu1 %v3428_v23, %s4531_s20  ;;  %v3112_v2 = vadd.f32 %v3046_v41, %v2920_v8  ;;  %v4007_v23 = vunpack.c.l.bf16 %v4059_v63  ;;  %v4012_v41 = vunpack.c.h.bf16 %v4060_v51 }
 0x513   : > { %v3272_v3 = vsub.f32 %v9125_v61, %v4262_v17  ;;  %v3271_v0 = vsub.f32 %v9124_v19, %v4261_v6  ;;  %v4061_v17 = vld [vmem:[%s4755_s14 + $0x28] sm:$0xff]  }
 0x514   : > { %v3044_v32 = vpop.permute.xlu1 %3043  ;;  %vm3377_vm15 = vcmp.gt.f32.partialorder %v4007_v23, 0.5  ;;  %vm3380_vm9 = vcmp.gt.f32.partialorder %v4012_v41, 0.5  ;;  %v4016_v35 = vunpack.c.h.bf16 %v4061_v17 }
 0x515   : > { %v3048_v42 = vpop.permute.xlu0 %3047  ;;  %v3304_v21 = vmul.f32 %v3272_v3, %v3272_v3  ;;  %v3303_v61 = vmul.f32 %v3271_v0, %v3271_v0  ;;  %v3111_v50 = vadd.f32 %v3044_v32, %v2919_v38  ;;  %v4015_v0 = vunpack.c.l.bf16 %v4061_v17  ;;  %v4062_v38 = vld [vmem:[%s4755_s14 + $0x30] sm:$0xff]  }
 0x516   : > { %3521 = vrot.lane.b32.xlu1 %v3430_v18, %s4531_s20  ;;  %v3113_v34 = vadd.f32 %v3048_v42, %v2921_v54  ;;  %v4011_v18 = vunpack.c.l.bf16 %v4060_v51  ;;  %vm3382_vm14 = vcmp.gt.f32.partialorder %v4016_v35, 0.5  ;;  %v4020_v58 = vunpack.c.h.bf16 %v4062_v38 }
 0x517   : > { %v3432_v27 = vmul.f32 %v3304_v21, %v3112_v2  ;;  %v3431_v43 = vmul.f32 %v3303_v61, %v3111_v50  ;;  %vm3381_vm8 = vcmp.gt.f32.partialorder %v4015_v0, 0.5  ;;  %v4019_v21 = vunpack.c.l.bf16 %v4062_v38  ;;  %v4063_v61 = vld [vmem:[%s4755_s14 + $0x38] sm:$0xff]  }
 0x518   : > { %v4265_v14 = vpop.permute.xlu1 %4264  ;;  %vm3379_vm13 = vcmp.gt.f32.partialorder %v4011_v18, 0.5  ;;  %vm3384_vm1 = vcmp.gt.f32.partialorder %v4020_v58, 0.5  ;;  %v4071_v38 = vld [vmem:[%s4755_s14 + $0x78] sm:$0xff]  }
 0x519   : > { %v3468_v19 = vpop.permute.xlu0 %3467  ;;  %v4267_v29 = vunpack.i.h.bf16 %v4265_v14  ;;  %v4266_v48 = vunpack.i.l.bf16 %v4265_v14  ;;  %3523 = vrot.lane.b32.xlu0 %v3431_v43, %s4531_s20  ;;  %vm3383_vm2 = vcmp.gt.f32.partialorder %v4019_v21, 0.5  ;;  %v4023_v14 = vunpack.c.l.bf16 %v4063_v61 }
 0x51a   : > { %3525 = vrot.lane.b32.xlu1 %v3432_v27, %s4531_s20  ;;  %v3563_v46 = vsel %vm8043_vm7, %v3468_v19, 0.0  ;;  %v4024_v19 = vunpack.c.h.bf16 %v4063_v61  ;;  %v4055_v21 = vunpack.c.l.bf16 %v4071_v38 }
 0x51b   : > { %v3274_v49 = vsub.f32 %v9144_v30, %v4267_v29  ;;  %v3273_v22 = vsub.f32 %v9266_v52, %v4266_v48  ;;  %v4057_v30 = vld [vmem:[%s4755_s14 + $0x8] sm:$0xff]   ;;  %v4028_v29 = vunpack.c.h.bf16 %v4064_v44  ;;  %vm3385_vm5 = vcmp.gt.f32.partialorder %v4023_v14, 0.5 }
 0x51c   : > { %v3050_v45 = vpop.permute.xlu1 %3049  ;;  %v4000_v9 = vunpack.c.h.bf16 %v4057_v30  ;;  %v3999_v25 = vunpack.c.l.bf16 %v4057_v30  ;;  %vm3386_vm10 = vcmp.gt.f32.partialorder %v4024_v19, 0.5 }
 0x51d   : > { %v3472_v56 = vpop.permute.xlu0 %3471  ;;  %v3306_v5 = vmul.f32 %v3274_v49, %v3274_v49  ;;  %v3305_v7 = vmul.f32 %v3273_v22, %v3273_v22  ;;  %v3114_v33 = vadd.f32 %v3050_v45, %v2922_v57  ;;  %v4027_v49 = vunpack.c.l.bf16 %v4064_v44  ;;  %v4065_v22 = vld [vmem:[%s4755_s14 + $0x48] sm:$0xff]  }
 0x51e   : > { %3627 = vrot.lane.b32.xlu1 %v3563_v46, %s4532_s18  ;;  %vm3374_vm6 = vcmp.gt.f32.partialorder %v4000_v9, 0.5  ;;  %vm3373_vm12 = vcmp.gt.f32.partialorder %v3999_v25, 0.5  ;;  %vm3388_vm7 = vcmp.gt.f32.partialorder %v4028_v29, 0.5  ;;  %v4032_v57 = vunpack.c.h.bf16 %v4065_v22 }
 0x51f   : > { %v3433_v55 = vmul.f32 %v3305_v7, %v3113_v34  ;;  %v3434_v11 = vmul.f32 %v3306_v5, %v3114_v33  ;;  %v3565_v10 = vsel %vm3373_vm12, %v3472_v56, 0.0  ;;  %v4031_v24 = vunpack.c.l.bf16 %v4065_v22  ;;  %v4066_v34 = vld [vmem:[%s4755_s14 + $0x50] sm:$0xff]  }
 0x520   : > { %v3470_v37 = vpop.permute.xlu1 %3469  ;;  %v4036_v7 = vunpack.c.h.bf16 %v4066_v34  ;;  %v4035_v9 = vunpack.c.l.bf16 %v4066_v34 }
 0x521   : > { %v3476_v60 = vpop.permute.xlu0 %3475  ;;  %3527 = vrot.lane.b32.xlu0 %v3433_v55, %s4531_s20  ;;  %v3564_v15 = vsel %vm3372_vm0, %v3470_v37, 0.0  ;;  %vm3387_vm0 = vcmp.gt.f32.partialorder %v4027_v49, 0.5  ;;  %vm3389_vm12 = vcmp.gt.f32.partialorder %v4031_v24, 0.5 }
 0x522   : > { %3529 = vrot.lane.b32.xlu1 %v3434_v11, %s4531_s20  ;;  %v3567_v1 = vsel %vm3375_vm3, %v3476_v60, 0.0  ;;  %v4067_v11 = vld [vmem:[%s4755_s14 + $0x58] sm:$0xff]   ;;  %vm3391_vm3 = vcmp.gt.f32.partialorder %v4035_v9, 0.5 }
 0x523   : > { %v4039_v36 = vunpack.c.l.bf16 %v4067_v11  ;;  %v4040_v63 = vunpack.c.h.bf16 %v4067_v11 }
 0x524   : > { %v3474_v47 = vpop.permute.xlu1 %3473 }
 0x525   : > { %v3480_v28 = vpop.permute.xlu0 %3479  ;;  %v3566_v26 = vsel %vm3374_vm6, %v3474_v47, 0.0  ;;  %3629 = vrot.lane.b32.xlu0 %v3564_v15, %s4532_s18  ;;  %vm3390_vm6 = vcmp.gt.f32.partialorder %v4032_v57, 0.5 }
 0x526   : > { %3633 = vrot.lane.b32.xlu1 %v3566_v26, %s4532_s18  ;;  %v3569_v42 = vsel %vm3377_vm15, %v3480_v28, 0.0  ;;  %vm3394_vm15 = vcmp.gt.f32.partialorder %v4040_v63, 0.5  ;;  %v4068_v26 = vld [vmem:[%s4755_s14 + $0x60] sm:$0xff]  }
 0x527   : > { %v4044_v41 = vunpack.c.h.bf16 %v4068_v26 }
 0x528   : > { %v3478_v16 = vpop.permute.xlu1 %3477 }
 0x529   : > { %v3484_v39 = vpop.permute.xlu0 %3483  ;;  %v3568_v31 = vsel %vm3376_vm11, %v3478_v16, 0.0  ;;  %3631 = vrot.lane.b32.xlu0 %v3565_v10, %s4532_s18  ;;  %vm3392_vm11 = vcmp.gt.f32.partialorder %v4036_v7, 0.5  ;;  %v4043_v10 = vunpack.c.l.bf16 %v4068_v26  ;;  %v4069_v16 = vld [vmem:[%s4755_s14 + $0x68] sm:$0xff]  }
 0x52a   : > { %3637 = vrot.lane.b32.xlu1 %v3568_v31, %s4532_s18  ;;  %v3571_v4 = vsel %vm3379_vm13, %v3484_v39, 0.0  ;;  %v4047_v31 = vunpack.c.l.bf16 %v4069_v16 }
 0x52c   : > { %v3482_v13 = vpop.permute.xlu1 %3481  ;;  %vm3397_vm13 = vcmp.gt.f32.partialorder %v4047_v31, 0.5 }
 0x52d   : > { %v3488_v12 = vpop.permute.xlu0 %3487  ;;  %v3570_v6 = vsel %vm3378_vm4, %v3482_v13, 0.0  ;;  %3635 = vrot.lane.b32.xlu0 %v3567_v1, %s4532_s18  ;;  %vm3393_vm4 = vcmp.gt.f32.partialorder %v4039_v36, 0.5  ;;  %v4048_v1 = vunpack.c.h.bf16 %v4069_v16 }
 0x52e   : > { %3641 = vrot.lane.b32.xlu1 %v3570_v6, %s4532_s18  ;;  %v3573_v43 = vsel %vm3381_vm8, %v3488_v12, 0.0  ;;  %v4070_v6 = vld [vmem:[%s4755_s14 + $0x70] sm:$0xff]   ;;  %s3950_s14 = sshll.u32 %s4751_s12, 3 }
 0x52f   : > { %vm3398_vm8 = vcmp.gt.f32.partialorder %v4048_v1, 0.5  ;;  %s282_s3 = scalar_lea.vmem [#allocation12], %s3950_s14 }
 0x530   : > { %v3486_v3 = vpop.permute.xlu1 %3485  ;;  %s3813_s8 = sshll.u32 %s282_s3, 4  ;;  %s8141_s8 = int_to_ptr.vmem [resolvable:$true] %s3813_s8 }
 0x531   : > { %v3492_v8 = vpop.permute.xlu0 %3491  ;;  %v3572_v32 = vsel %vm3380_vm9, %v3486_v3, 0.0  ;;  %3639 = vrot.lane.b32.xlu0 %v3569_v42, %s4532_s18  ;;  %vm3395_vm9 = vcmp.gt.f32.partialorder %v4043_v10, 0.5  ;;  %v4052_v42 = vunpack.c.h.bf16 %v4070_v6  ;;  %v4051_v3 = vunpack.c.l.bf16 %v4070_v6  ;;  %s4422_s19 = scalar_lea.vmem %s8141_s8, 128  ;;  %p4429_p0 = scmp.lt.s32.totalorder %s8141_s8, %s4427_s24 }
 0x532   : > { %3645 = vrot.lane.b32.xlu1 %v3572_v32, %s4532_s18  ;;  %v3575_v48 = vsel %vm3383_vm2, %v3492_v8, 0.0  ;;  %p4423_p4 = scmp.ne.s32.totalorder %s8141_s8, %s4422_s19  ;;  %p4430_p11 = scmp.lt.s32.totalorder %s4428_s5, %s4422_s19 }
 0x533   : > { %vm3399_vm2 = vcmp.gt.f32.partialorder %v4051_v3, 0.5 }
 0x534   : > { %v3490_v2 = vpop.permute.xlu1 %3489  ;;  %p4424_p10 = pnand %p4423_p4, %p9267_p5  ;;  %p4431_p9 = por %p4430_p11, %p4429_p0 }
 0x535   : > { %v3574_v50 = vsel %vm3382_vm14, %v3490_v2, 0.0  ;;  %3643 = vrot.lane.b32.xlu0 %v3571_v4, %s4532_s18  ;;  %v3496_v27 = vpop.permute.xlu0 %3495  ;;  %vm3396_vm14 = vcmp.gt.f32.partialorder %v4044_v41, 0.5  ;;  %v4056_v2 = vunpack.c.h.bf16 %v4071_v38 }
 0x536   : > { %3649 = vrot.lane.b32.xlu1 %v3574_v50, %s4532_s18  ;;  %v3577_v46 = vsel %vm3385_vm5, %v3496_v27, 0.0  ;;  %vm3401_vm5 = vcmp.gt.f32.partialorder %v4055_v21, 0.5  ;;  %p4425_p7 = pneg %p4424_p10 }
 0x538   : > { %v3494_v53 = vpop.permute.xlu1 %3493  ;;  %p4432_p13 = pnand %p4431_p9, %p4425_p7 }
 0x539   : > { %v3576_v62 = vsel %vm3384_vm1, %v3494_v53, 0.0  ;;  %3647 = vrot.lane.b32.xlu0 %v3573_v43, %s4532_s18  ;;  %v3500_v52 = vpop.permute.xlu0 %3499  ;;  %vm3400_vm1 = vcmp.gt.f32.partialorder %v4052_v42, 0.5 }
 0x53a   : > { %3653 = vrot.lane.b32.xlu1 %v3576_v62, %s4532_s18  ;;  %v3579_v33 = vsel %vm3387_vm0, %v3500_v52, 0.0 }
 0x53c   : > { %v3498_v56 = vpop.permute.xlu1 %3497 }
 0x53d   : > { %v3578_v54 = vsel %vm3386_vm10, %v3498_v56, 0.0  ;;  %3651 = vrot.lane.b32.xlu0 %v3575_v48, %s4532_s18  ;;  %v3504_v30 = vpop.permute.xlu0 %3503  ;;  %vm3402_vm10 = vcmp.gt.f32.partialorder %v4056_v2, 0.5 }
 0x53e   : > { %3657 = vrot.lane.b32.xlu1 %v3578_v54, %s4532_s18  ;;  %v3581_v37 = vsel %vm3389_vm12, %v3504_v30, 0.0 }
 0x540   : > { %v3502_v45 = vpop.permute.xlu1 %3501 }
 0x541   : > { %v3580_v5 = vsel %vm3388_vm7, %v3502_v45, 0.0  ;;  %3655 = vrot.lane.b32.xlu0 %v3577_v46, %s4532_s18  ;;  %v3508_v40 = vpop.permute.xlu0 %3507  ;;  %vm3723_vm7 = vcmask 7168  }
 0x542   : > { %3661 = vrot.lane.b32.xlu1 %v3580_v5, %s4532_s18  ;;  %v3583_v15 = vsel %vm3391_vm3, %v3508_v40, 0.0 }
 0x544   : > { %v3506_v60 = vpop.permute.xlu1 %3505 }
 0x545   : > { %v3582_v55 = vsel %vm3390_vm6, %v3506_v60, 0.0  ;;  %3659 = vrot.lane.b32.xlu0 %v3579_v33, %s4532_s18 }
 0x546   : > { %3665 = vrot.lane.b32.xlu1 %v3582_v55, %s4532_s18 }
 0x548   : > { %v3510_v25 = vpop.permute.xlu1 %3509 }
 0x549   : > { %v3584_v28 = vsel %vm3392_vm11, %v3510_v25, 0.0  ;;  %3663 = vrot.lane.b32.xlu0 %v3581_v37, %s4532_s18 }
 0x54a   : > { %3669 = vrot.lane.b32.xlu1 %v3584_v28, %s4532_s18 }
 0x54b   : > { %v3512_v47 = vpop.permute.xlu0 %3511 }
 0x54c   : > { %v3585_v59 = vsel %vm3393_vm4, %v3512_v47, 0.0 }
 0x54d   : > { %3667 = vrot.lane.b32.xlu0 %v3583_v15, %s4532_s18 }
 0x551   : > { %3671 = vrot.lane.b32.xlu0 %v3585_v59, %s4532_s18 }
 0x56f   : > { %v3514_v39 = vpop.permute.xlu1 %3513 }
 0x570   : > { %v3586_v20 = vsel %vm3394_vm15, %v3514_v39, 0.0 }
 0x571   : > { %3673 = vrot.lane.b32.xlu1 %v3586_v20, %s4532_s18 }
 0x577   : > { %v3516_v23 = vpop.permute.xlu0 %3515 }
 0x578   : > { %v3587_v51 = vsel %vm3395_vm9, %v3516_v23, 0.0 }
 0x579   : > { %3675 = vrot.lane.b32.xlu0 %v3587_v51, %s4532_s18 }
 0x57f   : > { %v3520_v12 = vpop.permute.xlu0 %3519 }
 0x580   : > { %v3589_v13 = vsel %vm3397_vm13, %v3520_v12, 0.0 }
 0x581   : > { %3679 = vrot.lane.b32.xlu0 %v3589_v13, %s4532_s18 }
 0x584   : > { %v3518_v18 = vpop.permute.xlu1 %3517 }
 0x585   : > { %v3588_v17 = vsel %vm3396_vm14, %v3518_v18, 0.0 }
 0x586   : > { %3677 = vrot.lane.b32.xlu1 %v3588_v17, %s4532_s18 }
 0x588   : > { %v3522_v35 = vpop.permute.xlu1 %3521 }
 0x589   : > { %v3590_v0 = vsel %vm3398_vm8, %v3522_v35, 0.0 }
 0x58a   : > { %3681 = vrot.lane.b32.xlu1 %v3590_v0, %s4532_s18 }
 0x58b   : > { %v3524_v32 = vpop.permute.xlu0 %3523 }
 0x58c   : > { %v3526_v8 = vpop.permute.xlu1 %3525  ;;  %v3591_v4 = vsel %vm3399_vm2, %v3524_v32, 0.0 }
 0x58d   : > { %v3592_v58 = vsel %vm3400_vm1, %v3526_v8, 0.0  ;;  %3683 = vrot.lane.b32.xlu0 %v3591_v4, %s4532_s18 }
 0x58e   : > { %3685 = vrot.lane.b32.xlu1 %v3592_v58, %s4532_s18 }
 0x590   : > { %v3628_v61 = vpop.permute.xlu1 %3627 }
 0x591   : > { %v3724_v62 = vsel %vm3723_vm7, %v3628_v61, 0.0 }
 0x593   : > { %v3528_v19 = vpop.permute.xlu0 %3527 }
 0x594   : > { %v3530_v50 = vpop.permute.xlu1 %3529  ;;  %v3593_v43 = vsel %vm3401_vm5, %v3528_v19, 0.0 }
 0x595   : > { %v3594_v27 = vsel %vm3402_vm10, %v3530_v50, 0.0  ;;  %3687 = vrot.lane.b32.xlu0 %v3593_v43, %s4532_s18 }
 0x596   : > { %3689 = vrot.lane.b32.xlu1 %v3594_v27, %s4532_s18 }
 0x597   : > { %v3630_v53 = vpop.permute.xlu0 %3629 }
 0x598   : > { %v3725_v44 = vsel %vm3723_vm7, %v3630_v53, 0.0  ;;  %v3634_v56 = vpop.permute.xlu1 %3633 }
 0x599   : > { %v3726_v48 = vadd.f32 %v3725_v44, %v3724_v62  ;;  %v3729_v22 = vsel %vm3723_vm7, %v3634_v56, 0.0 }
 0x59b   : > { %v3632_v14 = vpop.permute.xlu0 %3631 }
 0x59c   : > { %v3727_v29 = vsel %vm3723_vm7, %v3632_v14, 0.0  ;;  %v3638_v46 = vpop.permute.xlu1 %3637 }
 0x59d   : > { %v3728_v49 = vadd.f32 %v3727_v29, %v3726_v48  ;;  %v3733_v34 = vsel %vm3723_vm7, %v3638_v46, 0.0 }
 0x59f   : > { %v3636_v52 = vpop.permute.xlu0 %3635  ;;  %v3730_v54 = vadd.f32 %v3729_v22, %v3728_v49 }
 0x5a0   : > { %v3731_v57 = vsel %vm3723_vm7, %v3636_v52, 0.0  ;;  %v3642_v30 = vpop.permute.xlu1 %3641 }
 0x5a1   : > { %v3732_v45 = vadd.f32 %v3731_v57, %v3730_v54  ;;  %v3737_v9 = vsel %vm3723_vm7, %v3642_v30, 0.0 }
 0x5a3   : > { %v3640_v24 = vpop.permute.xlu0 %3639  ;;  %v3734_v5 = vadd.f32 %v3733_v34, %v3732_v45 }
 0x5a4   : > { %v3735_v7 = vsel %vm3723_vm7, %v3640_v24, 0.0  ;;  %v3646_v37 = vpop.permute.xlu1 %3645 }
 0x5a5   : > { %v3736_v33 = vadd.f32 %v3735_v7, %v3734_v5  ;;  %v3741_v28 = vsel %vm3723_vm7, %v3646_v37, 0.0 }
 0x5a7   : > { %v3644_v60 = vpop.permute.xlu0 %3643  ;;  %v3738_v55 = vadd.f32 %v3737_v9, %v3736_v33 }
 0x5a8   : > { %v3739_v11 = vsel %vm3723_vm7, %v3644_v60, 0.0  ;;  %v3650_v47 = vpop.permute.xlu1 %3649 }
 0x5a9   : > { %v3740_v25 = vadd.f32 %v3739_v11, %v3738_v55  ;;  %v3745_v26 = vsel %vm3723_vm7, %v3650_v47, 0.0 }
 0x5ab   : > { %v3648_v40 = vpop.permute.xlu0 %3647  ;;  %v3742_v36 = vadd.f32 %v3741_v28, %v3740_v25 }
 0x5ac   : > { %v3743_v15 = vsel %vm3723_vm7, %v3648_v40, 0.0  ;;  %v3654_v10 = vpop.permute.xlu1 %3653 }
 0x5ad   : > { %v3744_v59 = vadd.f32 %v3743_v15, %v3742_v36  ;;  %v3749_v51 = vsel %vm3723_vm7, %v3654_v10, 0.0 }
 0x5af   : > { %v3652_v63 = vpop.permute.xlu0 %3651  ;;  %v3746_v39 = vadd.f32 %v3745_v26, %v3744_v59 }
 0x5b0   : > { %v3747_v20 = vsel %vm3723_vm7, %v3652_v63, 0.0  ;;  %v3658_v12 = vpop.permute.xlu1 %3657 }
 0x5b1   : > { %v3748_v16 = vadd.f32 %v3747_v20, %v3746_v39  ;;  %v3753_v18 = vsel %vm3723_vm7, %v3658_v12, 0.0 }
 0x5b3   : > { %v3656_v23 = vpop.permute.xlu0 %3655  ;;  %v3750_v31 = vadd.f32 %v3749_v51, %v3748_v16 }
 0x5b4   : > { %v3751_v41 = vsel %vm3723_vm7, %v3656_v23, 0.0  ;;  %v3662_v35 = vpop.permute.xlu1 %3661 }
 0x5b5   : > { %v3752_v1 = vadd.f32 %v3751_v41, %v3750_v31  ;;  %v3757_v0 = vsel %vm3723_vm7, %v3662_v35, 0.0 }
 0x5b7   : > { %v3660_v13 = vpop.permute.xlu0 %3659  ;;  %v3754_v17 = vadd.f32 %v3753_v18, %v3752_v1 }
 0x5b8   : > { %v3755_v6 = vsel %vm3723_vm7, %v3660_v13, 0.0  ;;  %v3666_v32 = vpop.permute.xlu1 %3665 }
 0x5b9   : > { %v3756_v42 = vadd.f32 %v3755_v6, %v3754_v17  ;;  %v3761_v2 = vsel %vm3723_vm7, %v3666_v32, 0.0 }
 0x5bb   : > { %v3664_v3 = vpop.permute.xlu0 %3663  ;;  %v3758_v38 = vadd.f32 %v3757_v0, %v3756_v42 }
 0x5bc   : > { %v3759_v8 = vsel %vm3723_vm7, %v3664_v3, 0.0  ;;  %v3670_v50 = vpop.permute.xlu1 %3669 }
 0x5bd   : > { %v3760_v58 = vadd.f32 %v3759_v8, %v3758_v38  ;;  %v3765_v43 = vsel %vm3723_vm7, %v3670_v50, 0.0 }
 0x5bf   : > { %v3668_v4 = vpop.permute.xlu0 %3667  ;;  %v3762_v21 = vadd.f32 %v3761_v2, %v3760_v58 }
 0x5c0   : > { %v3763_v61 = vsel %vm3723_vm7, %v3668_v4, 0.0 }
 0x5c1   : > { %v3764_v19 = vadd.f32 %v3763_v61, %v3762_v21 }
 0x5c3   : > { %v3672_v27 = vpop.permute.xlu0 %3671  ;;  %v3766_v53 = vadd.f32 %v3765_v43, %v3764_v19 }
 0x5c4   : > { %v3767_v44 = vsel %vm3723_vm7, %v3672_v27, 0.0 }
 0x5c5   : > { %v3768_v48 = vadd.f32 %v3767_v44, %v3766_v53 }
 0x5e3   : > { %v3674_v14 = vpop.permute.xlu1 %3673 }
 0x5e4   : > { %v3769_v29 = vsel %vm3723_vm7, %v3674_v14, 0.0 }
 0x5e5   : > { %v3770_v49 = vadd.f32 %v3769_v29, %v3768_v48 }
 0x5eb   : > { %v3676_v62 = vpop.permute.xlu0 %3675 }
 0x5ec   : > { %v3771_v56 = vsel %vm3723_vm7, %v3676_v62, 0.0 }
 0x5ed   : > { %v3772_v54 = vadd.f32 %v3771_v56, %v3770_v49 }
 0x5f3   : > { %v3680_v57 = vpop.permute.xlu0 %3679 }
 0x5f4   : > { %v3775_v24 = vsel %vm3723_vm7, %v3680_v57, 0.0 }
 0x5f8   : > { %v3678_v52 = vpop.permute.xlu1 %3677 }
 0x5f9   : > { %v3773_v22 = vsel %vm3723_vm7, %v3678_v52, 0.0 }
 0x5fa   : > { %v3774_v46 = vadd.f32 %v3773_v22, %v3772_v54 }
 0x5fc   : > { %v3682_v45 = vpop.permute.xlu1 %3681  ;;  %v3776_v34 = vadd.f32 %v3775_v24, %v3774_v46 }
 0x5fd   : > { %v3777_v5 = vsel %vm3723_vm7, %v3682_v45, 0.0 }
 0x5fe   : > { %v3778_v33 = vadd.f32 %v3777_v5, %v3776_v34 }
 0x5ff   : > { %v3684_v7 = vpop.permute.xlu0 %3683 }
 0x600   : > { %v3779_v30 = vsel %vm3723_vm7, %v3684_v7, 0.0  ;;  %v3686_v60 = vpop.permute.xlu1 %3685 }
 0x601   : > { %v3780_v9 = vadd.f32 %v3779_v30, %v3778_v33  ;;  %v3781_v55 = vsel %vm3723_vm7, %v3686_v60, 0.0 }
 0x603   : > { %v3782_v37 = vadd.f32 %v3781_v55, %v3780_v9 }
 0x607   : > { %v3688_v25 = vpop.permute.xlu0 %3687 }
 0x608   : > { %v3690_v11 = vpop.permute.xlu1 %3689  ;;  %v3783_v40 = vsel %vm3723_vm7, %v3688_v25, 0.0 }
 0x609   : > { %v3784_v28 = vadd.f32 %v3783_v40, %v3782_v37  ;;  %v3785_v36 = vsel %vm3723_vm7, %v3690_v11, 0.0 }
 0x60b   : > { %v3786_v15 = vadd.f32 %v3785_v36, %v3784_v28 }
 0x60d   : > { %3787 = vadd.xlane.f32.xlu0 %v3786_v15 }
 0x69a   : > { %v3788_v47 = vpop.xlane.xlu0 %3787 }
 0x69b   : > { %v3789_v59 = vrot.slane %v3788_v47, 4 }
 0x69d   : > { %v3790_v63 = vadd.f32 %v3789_v59, %v3788_v47 }
 0x69f   : > { %v3791_v26 = vrot.slane %v3790_v63, 2 }
 0x6a1   : > { %v3792_v39 = vadd.f32 %v3791_v26, %v3790_v63 }
 0x6a3   : > { %v3793_v20 = vrot.slane %v3792_v39, 1 }
 0x6a5   : > { %v3794_v10 = vadd.f32 %v3793_v20, %v3792_v39 }
 0x6a7   : > { %4088 = vpush %v3794_v10 }
 0x6d8   : > { %s4089_s22 = spop %4088 }
 0x6d9   : > { %v3796_v16 = vstv %s4089_s22 }
 0x6da   : > { %3797 = vst [vmem:[%s282_s3] sm:$0xff] %v3796_v16 }
 0x6db   : > { %4435 = shalt.err (!%p4432_p13)
}
 0x6dc   : > { %s4436_s12 = scalar_lea.hbm %s8147_s13, 128  ;;  %s4440_s1 = scalar_lea.hbm %s8198_s4, 256 }
 0x6dd   : > { %p4437_p2 = scmp.ne.s32.totalorder %s8147_s13, %s4436_s12  ;;  %p4441_p3 = scmp.lt.u32.totalorder %s8147_s13, %s8198_s4 }
 0x6de   : > { %p4442_p8 = scmp.lt.u32.totalorder %s4440_s1, %s4436_s12  ;;  %p4444_p4 = scmp.lt.u32.totalorder %s4436_s12, %s8147_s13 }
 0x6df   : > { %p4438_p6 = pnand %p4437_p2, %p9267_p5 }
 0x6e0   : > { %p4443_p12 = por %p4442_p8, %p4441_p3 }
 0x6e1   : > { %p4439_p1 = pneg %p4438_p6 }
 0x6e2   : > { %p4445_p10 = por %p4444_p4, %p4443_p12 }
 0x6e4   : > { %p4446_p7 = pnand %p4445_p10, %p4439_p1 }
 0x6e6   : > { %4449 = shalt.err (!%p4446_p7)
}
 0x6e7   : > { %4098 = dma.vmem_to_hbm [thread:$0]  (%p9267_p5), %s8141_s8, 128, %s8147_s13, %s3799_s10  }
 0x6e8 PF: > { %s3825_s17 = sand.u32 1, %s4494_s25   ;;  %p9268_p0 = scmp.ne.s32.totalorder %s8420_s7, 0 }
 0x6e9   : > { %p9269_p11 = scmp.ge.s32.totalorder %s4514_s0, 2  ;;  %s3826_s20 = scalar_lea.sflag [#allocation8], %s3825_s17 }
 0x6eb   : > { %p4112_p9 = pnand %p9269_p11, %p9268_p0 }
 0x6ed   : > { %4489 = dma.done.wait (!%p4112_p9), %s3826_s20, 128  }
 0x6ee   : > { %4491 = vsyncadd (!%p4112_p9), %s3826_s20, 4294967168  ;;  %s27_s0 = sadd.s32 1, %s4514_s0   ;;  %s9270_s11 = sld [smem:[#allocation18_spill]] }
 0x6ef   : > { %p24_p13 = scmp.ge.s32.totalorder %s27_s0, 4   ;;  %s9271_s25 = smov %s4498_s26 }
 0x6f0   : > { %s9272_s26 = smov %s4502_s27  ;;  %s9273_s27 = smov %s4675_s15 }
 0x6f1   : > { %s9274_s28 = smov %s4510_s29  ;;  %26 = sbr.rel (!%p24_p13) target bundleno = 21 (0x15), region = 110 }
 0x6f4   : > { %s9275_s29 = smov %s9270_s11 }
 0x6f8   :  { %3831 = vsyncpa [#allocation7], 1 }
 0x6f9   :  { %3833 = vsyncpa [#allocation7 + $0x1], 1 }
 0x6fa   :  { %3834 = vsyncpa [#allocation10], 1 }
 0x6fb   :  { %3836 = vsyncpa [#allocation10 + $0x1], 1 }
 0x6fc   :  { %3837 = vsyncpa [#allocation8], 1 }
 0x6fd   :  { %3839 = vsyncpa [#allocation8 + $0x1], 1 }

</bundles_post_ra>
